<compile_context>
chip_gen: v5e
topology: v5e:2x2
jax: 0.10.0
libtpu: 0.0.40
codegen_flags: <defaults>
</compile_context>

<pallas_src>
import numpy as np
import jax
import jax.numpy as jnp
from jax import lax
from jax.experimental import pallas as pl
from jax.experimental.pallas import tpu as pltpu

EPS = 1e-5


# ---------------------------------------------------------------------------
# helpers
# ---------------------------------------------------------------------------
def _largest_divisor_leq(n, cap):
    cap = max(1, min(n, cap))
    for d in range(cap, 0, -1):
        if n % d == 0:
            return d
    return 1


def _vmem_limit(need_bytes):
    # computed from actual buffer sizes + headroom; never the full v7x VMEM.
    return int(min(96 * 1024 * 1024, max(32 * 1024 * 1024,
                                         2 * need_bytes + (16 << 20))))


# ---------------------------------------------------------------------------
# Kernel 1: DeConvBlock  =  ConvTranspose2d(k=2, s=2, p=0) + BN(eval) + ReLU
# A 2x2/stride-2 transposed conv is 4 independent 1x1 convs.  One grid step
# (b-tile, h-tile) does a single matmul  (tb*th*W, Cin) @ (Cin, 4*Cout) whose
# columns are ordered (di, dj, cout); the two di halves are stored through the
# (B, H, 2, W, 2*Cout) output view ==  NHWC (B, 2H, 2W, Cout), so the upsample
# interleave costs no data movement in HBM.
# ---------------------------------------------------------------------------
def _deconv_bn_relu_kernel(x_ref, w_ref, s_ref, b_ref, o_ref):
    tb, th, W, Cin = x_ref.shape
    N4 = w_ref.shape[1]                                   # 4 * Cout
    N2 = N4 // 2                                          # 2 * Cout

    x = x_ref[...].reshape(tb * th * W, Cin)              # merge majors only
    z = jnp.dot(x, w_ref[...], preferred_element_type=jnp.float32)
    y = jnp.maximum(z * s_ref[...] + b_ref[...], 0.0)     # folded BN + ReLU

    y0 = y[:, :N2].reshape(tb, th, W, N2)                 # di = 0
    y1 = y[:, N2:].reshape(tb, th, W, N2)                 # di = 1
    o_ref[:, :, 0, :, :] = y0.astype(o_ref.dtype)
    o_ref[:, :, 1, :, :] = y1.astype(o_ref.dtype)


def deconv_bn_relu_upsample(x_nhwc, w4, scale4, bias4, *, out_dtype):
    B, H, W, Cin = x_nhwc.shape
    N4 = w4.shape[1]                                      # 4 * Cout
    N2 = N4 // 2

    # Matmul M target: tb*th*W rows per step (>=128 where shapes allow),
    # bounded so the per-step blocks stay small (pipeline + megacore steps).
    th = _largest_divisor_leq(H, max(1, 1024 // max(W, 1)))
    tb = _largest_divisor_leq(B, max(1, 2048 // max(th * W, 1)))
    nB, nH = B // tb, H // th

    out_isz = jnp.dtype(out_dtype).itemsize
    in_blk = tb * th * W * Cin * x_nhwc.dtype.itemsize
    out_blk = tb * th * 2 * W * N2 * out_isz
    const_b = w4.size * w4.dtype.itemsize + (scale4.size + bias4.size) * 4
    need = 2 * (in_blk + out_blk) + 2 * const_b

    flops = 2 * B * H * W * Cin * N4
    bytes_acc = (x_nhwc.size * x_nhwc.dtype.itemsize
                 + w4.size * w4.dtype.itemsize
                 + B * H * 2 * W * N2 * out_isz)

    return pl.pallas_call(
        _deconv_bn_relu_kernel,
        out_shape=jax.ShapeDtypeStruct((B, H, 2, W, N2), out_dtype),
        grid=(nB, nH),
        in_specs=[
            pl.BlockSpec((tb, th, W, Cin), lambda bi, hi: (bi, hi, 0, 0)),
            pl.BlockSpec((Cin, N4), lambda bi, hi: (0, 0)),
            pl.BlockSpec((1, N4), lambda bi, hi: (0, 0)),
            pl.BlockSpec((1, N4), lambda bi, hi: (0, 0)),
        ],
        out_specs=pl.BlockSpec((tb, th, 2, W, N2),
                               lambda bi, hi: (bi, hi, 0, 0, 0)),
        compiler_params=pltpu.CompilerParams(
            dimension_semantics=("parallel", "parallel"),
            vmem_limit_bytes=_vmem_limit(need)),
        cost_estimate=pl.CostEstimate(flops=int(flops), transcendentals=0,
                                      bytes_accessed=int(bytes_acc)),
    )(x_nhwc, w4, scale4, bias4)


# ---------------------------------------------------------------------------
# Kernel 2: ConvBlock  =  conv3x3+BN+ReLU, conv3x3+BN+ReLU, residual add.
# One batch image per grid step.  The skip concat lives only in VMEM (two
# interior stores into one halo-padded slab; only the halo ring is zeroed per
# step), each 3x3 conv is ONE matmul over a full (kh,kw) im2col built in VMEM
# scratch (K = 9*Cin), and the result is stored channels-first (lane-dense,
# NCHW-compatible) via an exact identity-matmul transpose on the MXU, with the
# identity passed in as a resident constant block.
# ---------------------------------------------------------------------------
def _convblock_kernel(eye_ref, y_ref, x2_ref, w1_ref, w2_ref,
                      s1_ref, b1_ref, s2_ref, b2_ref, o_ref,
                      in_slab, x1_slab, col1, col2):
    P, Q, S = y_ref.shape[1], y_ref.shape[2], y_ref.shape[3]
    K2 = x2_ref.shape[3]
    C1 = S + K2
    M = P * Q

    # ---- zero only the 1-wide halo ring (interior fully overwritten below) -
    def zero_halo(slab, C):
        zrow = jnp.zeros((1, Q + 2, C), slab.dtype)
        slab[0:1, :, :] = zrow
        slab[P + 1:P + 2, :, :] = zrow
        zcol = jnp.zeros((P + 2, 1, C), slab.dtype)
        slab[:, 0:1, :] = zcol
        slab[:, Q + 1:Q + 2, :] = zcol

    zero_halo(in_slab, C1)
    zero_halo(x1_slab, S)

    # ---- skip concat done in VMEM only: [y | x2] side by side in one slab ---
    in_slab[1:P + 1, 1:Q + 1, 0:S] = y_ref[0].astype(in_slab.dtype)
    in_slab[1:P + 1, 1:Q + 1, S:C1] = x2_ref[0].astype(in_slab.dtype)

    # ---- conv1 + BN + ReLU: full (kh,kw) im2col -> ONE matmul, K = 9*C1 -----
    for kh in range(3):
        for kw in range(3):
            off = (kh * 3 + kw) * C1
            col1[:, :, off:off + C1] = in_slab[kh:kh + P, kw:kw + Q, :]
    a1 = jnp.dot(col1[...].reshape(M, 9 * C1), w1_ref[...],
                 preferred_element_type=jnp.float32)
    x1 = jnp.maximum(a1 * s1_ref[...] + b1_ref[...], 0.0)        # (M, S) f32

    # ---- conv2 + BN + ReLU: same, K = 9*S -----------------------------------
    x1_slab[1:P + 1, 1:Q + 1, :] = x1.reshape(P, Q, S).astype(x1_slab.dtype)
    for kh in range(3):
        for kw in range(3):
            off = (kh * 3 + kw) * S
            col2[:, :, off:off + S] = x1_slab[kh:kh + P, kw:kw + Q, :]
    a2 = jnp.dot(col2[...].reshape(M, 9 * S), w2_ref[...],
                 preferred_element_type=jnp.float32)
    z2 = jnp.maximum(a2 * s2_ref[...] + b2_ref[...], 0.0)
    out = x1 + z2                                                 # residual

    # ---- lane-dense channels-first store (NCHW view is free in the wrapper)
    #      via an exact identity matmul on the MXU; eye is a resident input. --
    out_cf = lax.dot_general(eye_ref[...], out, (((1,), (1,)), ((), ())),
                             preferred_element_type=jnp.float32)  # (S, M)
    o_ref[0] = out_cf.astype(o_ref.dtype)


def convblock_fused(y_nhwc, x2_nhwc, eye, w1p, w2p, s1, b1, s2, b2):
    B, P, Q, S = y_nhwc.shape
    K2 = x2_nhwc.shape[3]
    C1 = S + K2
    M = P * Q
    cdt = w1p.dtype
    csz = jnp.dtype(cdt).itemsize

    in_blk = (P * Q * S + P * Q * K2) * y_nhwc.dtype.itemsize
    out_blk = S * M * 4
    const_b = ((w1p.size + w2p.size) * csz
               + (eye.size + s1.size + b1.size + s2.size + b2.size) * 4)
    scratch_b = ((P + 2) * (Q + 2) * (C1 + S) + M * 9 * (C1 + S)) * csz
    need = 2 * (in_blk + out_blk) + 2 * const_b + scratch_b

    flops = 2 * B * M * 9 * (C1 * S + S * S)
    bytes_acc = (y_nhwc.size * y_nhwc.dtype.itemsize
                 + x2_nhwc.size * x2_nhwc.dtype.itemsize
                 + (w1p.size + w2p.size) * csz + B * S * M * 4)

    return pl.pallas_call(
        _convblock_kernel,
        out_shape=jax.ShapeDtypeStruct((B, S, M), jnp.float32),
        grid=(B,),
        in_specs=[
            pl.BlockSpec((S, S), lambda b: (0, 0)),              # resident eye
            pl.BlockSpec((1, P, Q, S), lambda b: (b, 0, 0, 0)),
            pl.BlockSpec((1, P, Q, K2), lambda b: (b, 0, 0, 0)),
            pl.BlockSpec((9 * C1, S), lambda b: (0, 0)),
            pl.BlockSpec((9 * S, S), lambda b: (0, 0)),
            pl.BlockSpec((1, S), lambda b: (0, 0)),
            pl.BlockSpec((1, S), lambda b: (0, 0)),
            pl.BlockSpec((1, S), lambda b: (0, 0)),
            pl.BlockSpec((1, S), lambda b: (0, 0)),
        ],
        out_specs=pl.BlockSpec((1, S, M), lambda b: (b, 0, 0)),
        scratch_shapes=[
            pltpu.VMEM((P + 2, Q + 2, C1), cdt),   # halo-padded [y | x2] slab
            pltpu.VMEM((P + 2, Q + 2, S), cdt),    # halo-padded x1 slab
            pltpu.VMEM((P, Q, 9 * C1), cdt),       # conv1 im2col
            pltpu.VMEM((P, Q, 9 * S), cdt),        # conv2 im2col
        ],
        compiler_params=pltpu.CompilerParams(
            dimension_semantics=("parallel",),
            vmem_limit_bytes=_vmem_limit(need)),
        cost_estimate=pl.CostEstimate(flops=int(flops), transcendentals=0,
                                      bytes_accessed=int(bytes_acc)),
    )(eye, y_nhwc, x2_nhwc, w1p, w2p, s1, b1, s2, b2)


# ---------------------------------------------------------------------------
# Parameter preparation (BN folding + weight packing) -- run once, outside the
# per-step forward.
# ---------------------------------------------------------------------------
def prepare_params(p, compute_dtype=jnp.float32):
    f32 = jnp.float32
    Cin, S = p['deconv_w'].shape[0], p['deconv_w'].shape[1]
    K2 = p['conv1_w'].shape[1] - S
    C1 = S + K2

    s_dc = p['dc_gamma'] / jnp.sqrt(p['dc_var'] + EPS)
    b_dc = p['dc_beta'] + (p['deconv_b'] - p['dc_mean']) * s_dc
    # (Cin, Cout, 2[di], 2[dj]) -> (Cin, 4*Cout), col = di*2C + dj*C + cout
    wd = jnp.transpose(p['deconv_w'], (0, 2, 3, 1)).reshape(Cin, 4 * S)

    s1 = p['bn1_gamma'] / jnp.sqrt(p['bn1_var'] + EPS)
    b1 = p['bn1_beta'] + (p['conv1_b'] - p['bn1_mean']) * s1
    s2 = p['bn2_gamma'] / jnp.sqrt(p['bn2_var'] + EPS)
    b2 = p['bn2_beta'] + (p['conv2_b'] - p['bn2_mean']) * s2
    # OIHW -> ((kh*3+kw)*Cin_tot + cin, O), matching the in-kernel im2col order
    w1p = jnp.transpose(p['conv1_w'], (2, 3, 1, 0)).reshape(9 * C1, S)
    w2p = jnp.transpose(p['conv2_w'], (2, 3, 1, 0)).reshape(9 * S, S)

    return {
        'wd': wd.astype(compute_dtype),
        'sd': jnp.tile(s_dc, 4).reshape(1, 4 * S).astype(f32),
        'bd': jnp.tile(b_dc, 4).reshape(1, 4 * S).astype(f32),
        'eye': jnp.eye(S, dtype=f32),
        'w1': w1p.astype(compute_dtype),
        'w2': w2p.astype(compute_dtype),
        's1': s1.reshape(1, S).astype(f32),
        'b1': b1.reshape(1, S).astype(f32),
        's2': s2.reshape(1, S).astype(f32),
        'b2': b2.reshape(1, S).astype(f32),
    }


# ---------------------------------------------------------------------------
# SkipUpScale forward.  Accepts / returns NCHW (PyTorch convention); the only
# XLA-side layout ops left are two small input-edge transposes (+ dtype casts)
# and free reshape views on the kernel outputs.
# ---------------------------------------------------------------------------
def skip_upscale_forward(x_nchw, x2_nchw, prep):
    B, Cin, H, W = x_nchw.shape
    S = prep['s1'].shape[1]
    cdt = prep['wd'].dtype
    assert x2_nchw.shape[2] == 2 * H and x2_nchw.shape[3] == 2 * W
    assert W % 8 == 0, "W must be a multiple of 8 (sublane tiling)"
    # TODO(synk): support arbitrary W by padding the spatial tiles.

    # input-edge layout + dtype casts (bf16 I/O on v6e/v7x halves DMA bytes)
    x_nhwc = jnp.transpose(x_nchw, (0, 2, 3, 1)).astype(cdt)
    x2_nhwc = jnp.transpose(x2_nchw, (0, 2, 3, 1)).astype(cdt)

    # DeConvBlock with fused upsample interleave (via out index_map view).
    y5 = deconv_bn_relu_upsample(x_nhwc, prep['wd'], prep['sd'], prep['bd'],
                                 out_dtype=cdt)
    y_nhwc = y5.reshape(B, 2 * H, 2 * W, S)              # free view

    # Fused ConvBlock (concat never hits HBM; residual fused).
    out = convblock_fused(y_nhwc, x2_nhwc, prep['eye'], prep['w1'], prep['w2'],
                          prep['s1'], prep['b1'], prep['s2'], prep['b2'])
    return out.reshape(B, S, 2 * H, 2 * W)               # free view -> NCHW


# ---------------------------------------------------------------------------
# NumPy reference (explicit NCHW, eval-mode BN) for verification
# ---------------------------------------------------------------------------
def ref_forward(x, x2, p):
    def bn(z, g, b, m, v):
        return ((z - m[None, :, None, None]) / np.sqrt(v[None, :, None, None] + EPS)
                * g[None, :, None, None] + b[None, :, None, None])

    def relu(z):
        return np.maximum(z, 0.0)

    B, Cin, H, W = x.shape
    Wt = p['deconv_w']
    Cout = Wt.shape[1]
    t = np.einsum('bchw,cokl->bohkwl', x, Wt).reshape(B, Cout, 2 * H, 2 * W)
    t = t + p['deconv_b'][None, :, None, None]
    y = relu(bn(t, p['dc_gamma'], p['dc_beta'], p['dc_mean'], p['dc_var']))
    xc = np.concatenate([y, x2], axis=1)

    def conv3(z, w, b):
        B_, C_, H_, W_ = z.shape
        O = w.shape[0]
        zp = np.pad(z, ((0, 0), (0, 0), (1, 1), (1, 1)))
        out = np.zeros((B_, O, H_, W_), np.float32)
        for kh in range(3):
            for kw in range(3):
                out += np.einsum('bchw,oc->bohw',
                                 zp[:, :, kh:kh + H_, kw:kw + W_], w[:, :, kh, kw])
        return out + b[None, :, None, None]

    x1 = relu(bn(conv3(xc, p['conv1_w'], p['conv1_b']),
                 p['bn1_gamma'], p['bn1_beta'], p['bn1_mean'], p['bn1_var']))
    z2 = relu(bn(conv3(x1, p['conv2_w'], p['conv2_b']),
                 p['bn2_gamma'], p['bn2_beta'], p['bn2_mean'], p['bn2_var']))
    return x1 + z2


if __name__ == "__main__":
    B, in_ch, out_ch, skip_in, H, W = 2, 16, 8, 4, 8, 8

    key = jax.random.PRNGKey(0)
    keys = jax.random.split(key, 20)

    def rn(k, shape, scale=0.1):
        return jax.random.normal(k, shape, jnp.float32) * scale

    def un(k, shape):
        return jax.random.uniform(k, shape, jnp.float32, 0.5, 1.5)

    p = {
        'deconv_w': rn(keys[0], (in_ch, out_ch, 2, 2)),
        'deconv_b': rn(keys[1], (out_ch,)),
        'dc_gamma': un(keys[2], (out_ch,)),
        'dc_beta':  rn(keys[3], (out_ch,)),
        'dc_mean':  rn(keys[4], (out_ch,)),
        'dc_var':   un(keys[5], (out_ch,)),
        'conv1_w':  rn(keys[6], (out_ch, out_ch + skip_in, 3, 3)),
        'conv1_b':  rn(keys[7], (out_ch,)),
        'bn1_gamma': un(keys[8], (out_ch,)),
        'bn1_beta':  rn(keys[9], (out_ch,)),
        'bn1_mean':  rn(keys[10], (out_ch,)),
        'bn1_var':   un(keys[11], (out_ch,)),
        'conv2_w':  rn(keys[12], (out_ch, out_ch, 3, 3)),
        'conv2_b':  rn(keys[13], (out_ch,)),
        'bn2_gamma': un(keys[14], (out_ch,)),
        'bn2_beta':  rn(keys[15], (out_ch,)),
        'bn2_mean':  rn(keys[16], (out_ch,)),
        'bn2_var':   un(keys[17], (out_ch,)),
    }

    x = jax.random.normal(keys[18], (B, in_ch, H, W), jnp.float32)
    x2 = jax.random.normal(keys[19], (B, skip_in, 2 * H, 2 * W), jnp.float32)

    ref = ref_forward(np.asarray(x), np.asarray(x2),
                      {k: np.asarray(v) for k, v in p.items()})

    # --- f32 path (tight check) ---------------------------------------------
    prep_f32 = prepare_params(p, jnp.float32)
    fwd = jax.jit(skip_upscale_forward)
    out = jax.block_until_ready(fwd(x, x2, prep_f32))
    np.testing.assert_allclose(np.asarray(out), ref, rtol=5e-4, atol=5e-4)

    # --- bf16 compute path (v6e/v7x MXU + bf16 slabs/IO), f32 accumulation ---
    prep_bf16 = prepare_params(p, jnp.bfloat16)
    out_bf = jax.block_until_ready(fwd(x, x2, prep_bf16))
    np.testing.assert_allclose(np.asarray(out_bf), ref, rtol=5e-2, atol=5e-2)

    print("KERNEL_OK")
</pallas_src>

<mosaic_0001>
module attributes {stable_mosaic.version = 11 : i64} {
  func.func @_deconv_bn_relu_kernel(%arg0: i32, %arg1: i32, %arg2: memref<2x8x8x16xf32, #tpu.memory_space<vmem>>, %arg3: memref<16x32xf32, #tpu.memory_space<vmem>>, %arg4: memref<1x32xf32, #tpu.memory_space<vmem>>, %arg5: memref<1x32xf32, #tpu.memory_space<vmem>>, %arg6: memref<2x8x2x8x16xf32, #tpu.memory_space<vmem>>) attributes {dimension_semantics = [#tpu.dimension_semantics<parallel>, #tpu.dimension_semantics<parallel>], iteration_bounds = array<i64: 1, 1>, scalar_prefetch = 0 : i64, scratch_operands = 0 : i64, tpu.core_type = #tpu.core_type<tc>, window_params = [{transform_indices = @transform_0, window_bounds = array<i64: 2, 8, 8, 16>}, {pipeline_mode = #tpu.pipeline_mode<synchronous>, transform_indices = @transform_1, window_bounds = array<i64: 16, 32>}, {pipeline_mode = #tpu.pipeline_mode<synchronous>, transform_indices = @transform_2, window_bounds = array<i64: 1, 32>}, {pipeline_mode = #tpu.pipeline_mode<synchronous>, transform_indices = @transform_3, window_bounds = array<i64: 1, 32>}, {transform_indices = @transform_4, window_bounds = array<i64: 2, 8, 2, 8, 16>}]} {
    %c0 = arith.constant 0 : index
    %c0_0 = arith.constant 0 : index
    %c0_1 = arith.constant 0 : index
    %c0_2 = arith.constant 0 : index
    %0 = vector.load %arg2[%c0, %c0_0, %c0_1, %c0_2] : memref<2x8x8x16xf32, #tpu.memory_space<vmem>>, vector<2x8x8x16xf32>
    %1 = vector.shape_cast %0 : vector<2x8x8x16xf32> to vector<128x16xf32>
    %c0_3 = arith.constant 0 : index
    %c0_4 = arith.constant 0 : index
    %2 = vector.load %arg3[%c0_3, %c0_4] : memref<16x32xf32, #tpu.memory_space<vmem>>, vector<16x32xf32>
    %cst = arith.constant dense<0.000000e+00> : vector<128x32xf32>
    %3 = tpu.matmul %1, %2, %cst {dimension_numbers = #tpu.dot_dimension_numbers<[1], [0], [0], [1], [0, 0, 1, 1], [], []>} : vector<128x16xf32>, vector<16x32xf32>, vector<128x32xf32> -> vector<128x32xf32>
    %c0_5 = arith.constant 0 : index
    %c0_6 = arith.constant 0 : index
    %4 = vector.load %arg4[%c0_5, %c0_6] : memref<1x32xf32, #tpu.memory_space<vmem>>, vector<1x32xf32>
    %5 = vector.broadcast %4 : vector<1x32xf32> to vector<128x32xf32>
    %6 = arith.mulf %3, %5 : vector<128x32xf32>
    %c0_7 = arith.constant 0 : index
    %c0_8 = arith.constant 0 : index
    %7 = vector.load %arg5[%c0_7, %c0_8] : memref<1x32xf32, #tpu.memory_space<vmem>>, vector<1x32xf32>
    %8 = vector.broadcast %7 : vector<1x32xf32> to vector<128x32xf32>
    %9 = arith.addf %6, %8 : vector<128x32xf32>
    %cst_9 = arith.constant 0.000000e+00 : f32
    %10 = vector.broadcast %cst_9 : f32 to vector<128x32xf32>
    %11 = arith.maximumf %9, %10 : vector<128x32xf32>
    %12 = vector.extract_strided_slice %11 {offsets = [0, 0], sizes = [128, 16], strides = [1, 1]} : vector<128x32xf32> to vector<128x16xf32>
    %13 = vector.shape_cast %12 : vector<128x16xf32> to vector<2x8x8x16xf32>
    %14 = vector.extract_strided_slice %11 {offsets = [0, 16], sizes = [128, 16], strides = [1, 1]} : vector<128x32xf32> to vector<128x16xf32>
    %15 = vector.shape_cast %14 : vector<128x16xf32> to vector<2x8x8x16xf32>
    %c0_10 = arith.constant 0 : index
    %c0_11 = arith.constant 0 : index
    %c0_12 = arith.constant 0 : index
    %c0_13 = arith.constant 0 : index
    %c0_14 = arith.constant 0 : index
    %16 = vector.load %arg6[%c0_10, %c0_11, %c0_12, %c0_13, %c0_14] : memref<2x8x2x8x16xf32, #tpu.memory_space<vmem>>, vector<2x8x1x8x16xf32>
    %17 = vector.shape_cast %16 : vector<2x8x1x8x16xf32> to vector<2x8x8x16xf32>
    %18 = vector.shape_cast %13 : vector<2x8x8x16xf32> to vector<2x8x1x8x16xf32>
    tpu.vector_store %arg6[%c0_10, %c0_11, %c0_12, %c0_13, %c0_14], %18 {strides = array<i32>} : memref<2x8x2x8x16xf32, #tpu.memory_space<vmem>>, vector<2x8x1x8x16xf32>,
    %c0_15 = arith.constant 0 : index
    %c0_16 = arith.constant 0 : index
    %c1 = arith.constant 1 : index
    %c0_17 = arith.constant 0 : index
    %c0_18 = arith.constant 0 : index
    %19 = vector.load %arg6[%c0_15, %c0_16, %c1, %c0_17, %c0_18] : memref<2x8x2x8x16xf32, #tpu.memory_space<vmem>>, vector<2x8x1x8x16xf32>
    %20 = vector.shape_cast %19 : vector<2x8x1x8x16xf32> to vector<2x8x8x16xf32>
    %21 = vector.shape_cast %15 : vector<2x8x8x16xf32> to vector<2x8x1x8x16xf32>
    tpu.vector_store %arg6[%c0_15, %c0_16, %c1, %c0_17, %c0_18], %21 {strides = array<i32>} : memref<2x8x2x8x16xf32, #tpu.memory_space<vmem>>, vector<2x8x1x8x16xf32>,
    return
  }
  func.func @transform_0(%arg0: i32, %arg1: i32) -> (i32, i32, i32, i32) {
    %c0_i32 = arith.constant 0 : i32
    %c0_i32_0 = arith.constant 0 : i32
    %c0_i32_1 = arith.constant 0 : i32
    return %arg0, %arg1, %c0_i32, %c0_i32_0 : i32, i32, i32, i32
  }
  func.func @transform_1(%arg0: i32, %arg1: i32) -> (i32, i32) {
    %c0_i32 = arith.constant 0 : i32
    %c0_i32_0 = arith.constant 0 : i32
    %c0_i32_1 = arith.constant 0 : i32
    return %c0_i32, %c0_i32_0 : i32, i32
  }
  func.func @transform_2(%arg0: i32, %arg1: i32) -> (i32, i32) {
    %c0_i32 = arith.constant 0 : i32
    %c0_i32_0 = arith.constant 0 : i32
    %c0_i32_1 = arith.constant 0 : i32
    return %c0_i32, %c0_i32_0 : i32, i32
  }
  func.func @transform_3(%arg0: i32, %arg1: i32) -> (i32, i32) {
    %c0_i32 = arith.constant 0 : i32
    %c0_i32_0 = arith.constant 0 : i32
    %c0_i32_1 = arith.constant 0 : i32
    return %c0_i32, %c0_i32_0 : i32, i32
  }
  func.func @transform_4(%arg0: i32, %arg1: i32) -> (i32, i32, i32, i32, i32) {
    %c0_i32 = arith.constant 0 : i32
    %c0_i32_0 = arith.constant 0 : i32
    %c0_i32_1 = arith.constant 0 : i32
    %c0_i32_2 = arith.constant 0 : i32
    return %arg0, %arg1, %c0_i32, %c0_i32_0, %c0_i32_1 : i32, i32, i32, i32, i32
  }
}

module attributes {stable_mosaic.version = 11 : i64} {
  func.func @_convblock_kernel(%arg0: i32, %arg1: memref<8x8xf32, #tpu.memory_space<vmem>>, %arg2: memref<1x16x16x8xf32, #tpu.memory_space<vmem>>, %arg3: memref<1x16x16x4xf32, #tpu.memory_space<vmem>>, %arg4: memref<108x8xf32, #tpu.memory_space<vmem>>, %arg5: memref<72x8xf32, #tpu.memory_space<vmem>>, %arg6: memref<1x8xf32, #tpu.memory_space<vmem>>, %arg7: memref<1x8xf32, #tpu.memory_space<vmem>>, %arg8: memref<1x8xf32, #tpu.memory_space<vmem>>, %arg9: memref<1x8xf32, #tpu.memory_space<vmem>>, %arg10: memref<1x8x256xf32, #tpu.memory_space<vmem>>, %arg11: memref<18x18x12xf32, #tpu.memory_space<vmem>>, %arg12: memref<18x18x8xf32, #tpu.memory_space<vmem>>, %arg13: memref<16x16x108xf32, #tpu.memory_space<vmem>>, %arg14: memref<16x16x72xf32, #tpu.memory_space<vmem>>) attributes {dimension_semantics = [#tpu.dimension_semantics<parallel>], iteration_bounds = array<i64: 2>, scalar_prefetch = 0 : i64, scratch_operands = 4 : i64, tpu.core_type = #tpu.core_type<tc>, window_params = [{pipeline_mode = #tpu.pipeline_mode<synchronous>, transform_indices = @transform_0, window_bounds = array<i64: 8, 8>}, {transform_indices = @transform_1, window_bounds = array<i64: 1, 16, 16, 8>}, {transform_indices = @transform_2, window_bounds = array<i64: 1, 16, 16, 4>}, {pipeline_mode = #tpu.pipeline_mode<synchronous>, transform_indices = @transform_3, window_bounds = array<i64: 108, 8>}, {pipeline_mode = #tpu.pipeline_mode<synchronous>, transform_indices = @transform_4, window_bounds = array<i64: 72, 8>}, {pipeline_mode = #tpu.pipeline_mode<synchronous>, transform_indices = @transform_5, window_bounds = array<i64: 1, 8>}, {pipeline_mode = #tpu.pipeline_mode<synchronous>, transform_indices = @transform_6, window_bounds = array<i64: 1, 8>}, {pipeline_mode = #tpu.pipeline_mode<synchronous>, transform_indices = @transform_7, window_bounds = array<i64: 1, 8>}, {pipeline_mode = #tpu.pipeline_mode<synchronous>, transform_indices = @transform_8, window_bounds = array<i64: 1, 8>}, {transform_indices = @transform_9, window_bounds = array<i64: 1, 8, 256>}]} {
    %cst = arith.constant 0.000000e+00 : f32
    %0 = vector.broadcast %cst : f32 to vector<1x18x12xf32>
    %c0 = arith.constant 0 : index
    %c0_0 = arith.constant 0 : index
    %c0_1 = arith.constant 0 : index
    %1 = vector.load %arg11[%c0, %c0_0, %c0_1] : memref<18x18x12xf32, #tpu.memory_space<vmem>>, vector<1x18x12xf32>
    tpu.vector_store %arg11[%c0, %c0_0, %c0_1], %0 {strides = array<i32>} : memref<18x18x12xf32, #tpu.memory_space<vmem>>, vector<1x18x12xf32>,
    %c17 = arith.constant 17 : index
    %c0_2 = arith.constant 0 : index
    %c0_3 = arith.constant 0 : index
    %2 = vector.load %arg11[%c17, %c0_2, %c0_3] : memref<18x18x12xf32, #tpu.memory_space<vmem>>, vector<1x18x12xf32>
    tpu.vector_store %arg11[%c17, %c0_2, %c0_3], %0 {strides = array<i32>} : memref<18x18x12xf32, #tpu.memory_space<vmem>>, vector<1x18x12xf32>,
    %cst_4 = arith.constant 0.000000e+00 : f32
    %3 = vector.broadcast %cst_4 : f32 to vector<18x1x12xf32>
    %c0_5 = arith.constant 0 : index
    %c0_6 = arith.constant 0 : index
    %c0_7 = arith.constant 0 : index
    %4 = vector.load %arg11[%c0_5, %c0_6, %c0_7] : memref<18x18x12xf32, #tpu.memory_space<vmem>>, vector<18x1x12xf32>
    tpu.vector_store %arg11[%c0_5, %c0_6, %c0_7], %3 {strides = array<i32>} : memref<18x18x12xf32, #tpu.memory_space<vmem>>, vector<18x1x12xf32>,
    %c0_8 = arith.constant 0 : index
    %c17_9 = arith.constant 17 : index
    %c0_10 = arith.constant 0 : index
    %5 = vector.load %arg11[%c0_8, %c17_9, %c0_10] : memref<18x18x12xf32, #tpu.memory_space<vmem>>, vector<18x1x12xf32>
    tpu.vector_store %arg11[%c0_8, %c17_9, %c0_10], %3 {strides = array<i32>} : memref<18x18x12xf32, #tpu.memory_space<vmem>>, vector<18x1x12xf32>,
    %cst_11 = arith.constant 0.000000e+00 : f32
    %6 = vector.broadcast %cst_11 : f32 to vector<1x18x8xf32>
    %c0_12 = arith.constant 0 : index
    %c0_13 = arith.constant 0 : index
    %c0_14 = arith.constant 0 : index
    %7 = vector.load %arg12[%c0_12, %c0_13, %c0_14] : memref<18x18x8xf32, #tpu.memory_space<vmem>>, vector<1x18x8xf32>
    tpu.vector_store %arg12[%c0_12, %c0_13, %c0_14], %6 {strides = array<i32>} : memref<18x18x8xf32, #tpu.memory_space<vmem>>, vector<1x18x8xf32>,
    %c17_15 = arith.constant 17 : index
    %c0_16 = arith.constant 0 : index
    %c0_17 = arith.constant 0 : index
    %8 = vector.load %arg12[%c17_15, %c0_16, %c0_17] : memref<18x18x8xf32, #tpu.memory_space<vmem>>, vector<1x18x8xf32>
    tpu.vector_store %arg12[%c17_15, %c0_16, %c0_17], %6 {strides = array<i32>} : memref<18x18x8xf32, #tpu.memory_space<vmem>>, vector<1x18x8xf32>,
    %cst_18 = arith.constant 0.000000e+00 : f32
    %9 = vector.broadcast %cst_18 : f32 to vector<18x1x8xf32>
    %c0_19 = arith.constant 0 : index
    %c0_20 = arith.constant 0 : index
    %c0_21 = arith.constant 0 : index
    %10 = vector.load %arg12[%c0_19, %c0_20, %c0_21] : memref<18x18x8xf32, #tpu.memory_space<vmem>>, vector<18x1x8xf32>
    tpu.vector_store %arg12[%c0_19, %c0_20, %c0_21], %9 {strides = array<i32>} : memref<18x18x8xf32, #tpu.memory_space<vmem>>, vector<18x1x8xf32>,
    %c0_22 = arith.constant 0 : index
    %c17_23 = arith.constant 17 : index
    %c0_24 = arith.constant 0 : index
    %11 = vector.load %arg12[%c0_22, %c17_23, %c0_24] : memref<18x18x8xf32, #tpu.memory_space<vmem>>, vector<18x1x8xf32>
    tpu.vector_store %arg12[%c0_22, %c17_23, %c0_24], %9 {strides = array<i32>} : memref<18x18x8xf32, #tpu.memory_space<vmem>>, vector<18x1x8xf32>,
    %c0_25 = arith.constant 0 : index
    %c0_26 = arith.constant 0 : index
    %c0_27 = arith.constant 0 : index
    %c0_28 = arith.constant 0 : index
    %12 = vector.load %arg2[%c0_25, %c0_26, %c0_27, %c0_28] : memref<1x16x16x8xf32, #tpu.memory_space<vmem>>, vector<1x16x16x8xf32>
    %13 = vector.shape_cast %12 : vector<1x16x16x8xf32> to vector<16x16x8xf32>
    %c1 = arith.constant 1 : index
    %c1_29 = arith.constant 1 : index
    %c0_30 = arith.constant 0 : index
    %14 = vector.load %arg11[%c1, %c1_29, %c0_30] : memref<18x18x12xf32, #tpu.memory_space<vmem>>, vector<16x16x8xf32>
    tpu.vector_store %arg11[%c1, %c1_29, %c0_30], %13 {strides = array<i32>} : memref<18x18x12xf32, #tpu.memory_space<vmem>>, vector<16x16x8xf32>,
    %c0_31 = arith.constant 0 : index
    %c0_32 = arith.constant 0 : index
    %c0_33 = arith.constant 0 : index
    %c0_34 = arith.constant 0 : index
    %15 = vector.load %arg3[%c0_31, %c0_32, %c0_33, %c0_34] : memref<1x16x16x4xf32, #tpu.memory_space<vmem>>, vector<1x16x16x4xf32>
    %16 = vector.shape_cast %15 : vector<1x16x16x4xf32> to vector<16x16x4xf32>
    %c1_35 = arith.constant 1 : index
    %c1_36 = arith.constant 1 : index
    %c8 = arith.constant 8 : index
    %17 = vector.load %arg11[%c1_35, %c1_36, %c8] : memref<18x18x12xf32, #tpu.memory_space<vmem>>, vector<16x16x4xf32>
    tpu.vector_store %arg11[%c1_35, %c1_36, %c8], %16 {strides = array<i32>} : memref<18x18x12xf32, #tpu.memory_space<vmem>>, vector<16x16x4xf32>,
    %c0_37 = arith.constant 0 : index
    %c0_38 = arith.constant 0 : index
    %c0_39 = arith.constant 0 : index
    %18 = vector.load %arg11[%c0_37, %c0_38, %c0_39] : memref<18x18x12xf32, #tpu.memory_space<vmem>>, vector<16x16x12xf32>
    %c0_40 = arith.constant 0 : index
    %c0_41 = arith.constant 0 : index
    %c0_42 = arith.constant 0 : index
    %19 = vector.load %arg13[%c0_40, %c0_41, %c0_42] : memref<16x16x108xf32, #tpu.memory_space<vmem>>, vector<16x16x12xf32>
    tpu.vector_store %arg13[%c0_40, %c0_41, %c0_42], %18 {strides = array<i32>} : memref<16x16x108xf32, #tpu.memory_space<vmem>>, vector<16x16x12xf32>,
    %c0_43 = arith.constant 0 : index
    %c1_44 = arith.constant 1 : index
    %c0_45 = arith.constant 0 : index
    %20 = vector.load %arg11[%c0_43, %c1_44, %c0_45] : memref<18x18x12xf32, #tpu.memory_space<vmem>>, vector<16x16x12xf32>
    %c0_46 = arith.constant 0 : index
    %c0_47 = arith.constant 0 : index
    %c12 = arith.constant 12 : index
    %21 = vector.load %arg13[%c0_46, %c0_47, %c12] : memref<16x16x108xf32, #tpu.memory_space<vmem>>, vector<16x16x12xf32>
    tpu.vector_store %arg13[%c0_46, %c0_47, %c12], %20 {strides = array<i32>} : memref<16x16x108xf32, #tpu.memory_space<vmem>>, vector<16x16x12xf32>,
    %c0_48 = arith.constant 0 : index
    %c2 = arith.constant 2 : index
    %c0_49 = arith.constant 0 : index
    %22 = vector.load %arg11[%c0_48, %c2, %c0_49] : memref<18x18x12xf32, #tpu.memory_space<vmem>>, vector<16x16x12xf32>
    %c0_50 = arith.constant 0 : index
    %c0_51 = arith.constant 0 : index
    %c24 = arith.constant 24 : index
    %23 = vector.load %arg13[%c0_50, %c0_51, %c24] : memref<16x16x108xf32, #tpu.memory_space<vmem>>, vector<16x16x12xf32>
    tpu.vector_store %arg13[%c0_50, %c0_51, %c24], %22 {strides = array<i32>} : memref<16x16x108xf32, #tpu.memory_space<vmem>>, vector<16x16x12xf32>,
    %c1_52 = arith.constant 1 : index
    %c0_53 = arith.constant 0 : index
    %c0_54 = arith.constant 0 : index
    %24 = vector.load %arg11[%c1_52, %c0_53, %c0_54] : memref<18x18x12xf32, #tpu.memory_space<vmem>>, vector<16x16x12xf32>
    %c0_55 = arith.constant 0 : index
    %c0_56 = arith.constant 0 : index
    %c36 = arith.constant 36 : index
    %25 = vector.load %arg13[%c0_55, %c0_56, %c36] : memref<16x16x108xf32, #tpu.memory_space<vmem>>, vector<16x16x12xf32>
    tpu.vector_store %arg13[%c0_55, %c0_56, %c36], %24 {strides = array<i32>} : memref<16x16x108xf32, #tpu.memory_space<vmem>>, vector<16x16x12xf32>,
    %c1_57 = arith.constant 1 : index
    %c1_58 = arith.constant 1 : index
    %c0_59 = arith.constant 0 : index
    %26 = vector.load %arg11[%c1_57, %c1_58, %c0_59] : memref<18x18x12xf32, #tpu.memory_space<vmem>>, vector<16x16x12xf32>
    %c0_60 = arith.constant 0 : index
    %c0_61 = arith.constant 0 : index
    %c48 = arith.constant 48 : index
    %27 = vector.load %arg13[%c0_60, %c0_61, %c48] : memref<16x16x108xf32, #tpu.memory_space<vmem>>, vector<16x16x12xf32>
    tpu.vector_store %arg13[%c0_60, %c0_61, %c48], %26 {strides = array<i32>} : memref<16x16x108xf32, #tpu.memory_space<vmem>>, vector<16x16x12xf32>,
    %c1_62 = arith.constant 1 : index
    %c2_63 = arith.constant 2 : index
    %c0_64 = arith.constant 0 : index
    %28 = vector.load %arg11[%c1_62, %c2_63, %c0_64] : memref<18x18x12xf32, #tpu.memory_space<vmem>>, vector<16x16x12xf32>
    %c0_65 = arith.constant 0 : index
    %c0_66 = arith.constant 0 : index
    %c60 = arith.constant 60 : index
    %29 = vector.load %arg13[%c0_65, %c0_66, %c60] : memref<16x16x108xf32, #tpu.memory_space<vmem>>, vector<16x16x12xf32>
    tpu.vector_store %arg13[%c0_65, %c0_66, %c60], %28 {strides = array<i32>} : memref<16x16x108xf32, #tpu.memory_space<vmem>>, vector<16x16x12xf32>,
    %c2_67 = arith.constant 2 : index
    %c0_68 = arith.constant 0 : index
    %c0_69 = arith.constant 0 : index
    %30 = vector.load %arg11[%c2_67, %c0_68, %c0_69] : memref<18x18x12xf32, #tpu.memory_space<vmem>>, vector<16x16x12xf32>
    %c0_70 = arith.constant 0 : index
    %c0_71 = arith.constant 0 : index
    %c72 = arith.constant 72 : index
    %31 = vector.load %arg13[%c0_70, %c0_71, %c72] : memref<16x16x108xf32, #tpu.memory_space<vmem>>, vector<16x16x12xf32>
    tpu.vector_store %arg13[%c0_70, %c0_71, %c72], %30 {strides = array<i32>} : memref<16x16x108xf32, #tpu.memory_space<vmem>>, vector<16x16x12xf32>,
    %c2_72 = arith.constant 2 : index
    %c1_73 = arith.constant 1 : index
    %c0_74 = arith.constant 0 : index
    %32 = vector.load %arg11[%c2_72, %c1_73, %c0_74] : memref<18x18x12xf32, #tpu.memory_space<vmem>>, vector<16x16x12xf32>
    %c0_75 = arith.constant 0 : index
    %c0_76 = arith.constant 0 : index
    %c84 = arith.constant 84 : index
    %33 = vector.load %arg13[%c0_75, %c0_76, %c84] : memref<16x16x108xf32, #tpu.memory_space<vmem>>, vector<16x16x12xf32>
    tpu.vector_store %arg13[%c0_75, %c0_76, %c84], %32 {strides = array<i32>} : memref<16x16x108xf32, #tpu.memory_space<vmem>>, vector<16x16x12xf32>,
    %c2_77 = arith.constant 2 : index
    %c2_78 = arith.constant 2 : index
    %c0_79 = arith.constant 0 : index
    %34 = vector.load %arg11[%c2_77, %c2_78, %c0_79] : memref<18x18x12xf32, #tpu.memory_space<vmem>>, vector<16x16x12xf32>
    %c0_80 = arith.constant 0 : index
    %c0_81 = arith.constant 0 : index
    %c96 = arith.constant 96 : index
    %35 = vector.load %arg13[%c0_80, %c0_81, %c96] : memref<16x16x108xf32, #tpu.memory_space<vmem>>, vector<16x16x12xf32>
    tpu.vector_store %arg13[%c0_80, %c0_81, %c96], %34 {strides = array<i32>} : memref<16x16x108xf32, #tpu.memory_space<vmem>>, vector<16x16x12xf32>,
    %c0_82 = arith.constant 0 : index
    %c0_83 = arith.constant 0 : index
    %c0_84 = arith.constant 0 : index
    %36 = vector.load %arg13[%c0_82, %c0_83, %c0_84] : memref<16x16x108xf32, #tpu.memory_space<vmem>>, vector<16x16x108xf32>
    %37 = vector.shape_cast %36 : vector<16x16x108xf32> to vector<256x108xf32>
    %c0_85 = arith.constant 0 : index
    %c0_86 = arith.constant 0 : index
    %38 = vector.load %arg4[%c0_85, %c0_86] : memref<108x8xf32, #tpu.memory_space<vmem>>, vector<108x8xf32>
    %cst_87 = arith.constant dense<0.000000e+00> : vector<256x8xf32>
    %39 = tpu.matmul %37, %38, %cst_87 {dimension_numbers = #tpu.dot_dimension_numbers<[1], [0], [0], [1], [0, 0, 1, 1], [], []>} : vector<256x108xf32>, vector<108x8xf32>, vector<256x8xf32> -> vector<256x8xf32>
    %c0_88 = arith.constant 0 : index
    %c0_89 = arith.constant 0 : index
    %40 = vector.load %arg6[%c0_88, %c0_89] : memref<1x8xf32, #tpu.memory_space<vmem>>, vector<1x8xf32>
    %41 = vector.broadcast %40 : vector<1x8xf32> to vector<256x8xf32>
    %42 = arith.mulf %39, %41 : vector<256x8xf32>
    %c0_90 = arith.constant 0 : index
    %c0_91 = arith.constant 0 : index
    %43 = vector.load %arg7[%c0_90, %c0_91] : memref<1x8xf32, #tpu.memory_space<vmem>>, vector<1x8xf32>
    %44 = vector.broadcast %43 : vector<1x8xf32> to vector<256x8xf32>
    %45 = arith.addf %42, %44 : vector<256x8xf32>
    %cst_92 = arith.constant 0.000000e+00 : f32
    %46 = vector.broadcast %cst_92 : f32 to vector<256x8xf32>
    %47 = arith.maximumf %45, %46 : vector<256x8xf32>
    %48 = vector.shape_cast %47 : vector<256x8xf32> to vector<16x16x8xf32>
    %c1_93 = arith.constant 1 : index
    %c1_94 = arith.constant 1 : index
    %c0_95 = arith.constant 0 : index
    %49 = vector.load %arg12[%c1_93, %c1_94, %c0_95] : memref<18x18x8xf32, #tpu.memory_space<vmem>>, vector<16x16x8xf32>
    tpu.vector_store %arg12[%c1_93, %c1_94, %c0_95], %48 {strides = array<i32>} : memref<18x18x8xf32, #tpu.memory_space<vmem>>, vector<16x16x8xf32>,
    %c0_96 = arith.constant 0 : index
    %c0_97 = arith.constant 0 : index
    %c0_98 = arith.constant 0 : index
    %50 = vector.load %arg12[%c0_96, %c0_97, %c0_98] : memref<18x18x8xf32, #tpu.memory_space<vmem>>, vector<16x16x8xf32>
    %c0_99 = arith.constant 0 : index
    %c0_100 = arith.constant 0 : index
    %c0_101 = arith.constant 0 : index
    %51 = vector.load %arg14[%c0_99, %c0_100, %c0_101] : memref<16x16x72xf32, #tpu.memory_space<vmem>>, vector<16x16x8xf32>
    tpu.vector_store %arg14[%c0_99, %c0_100, %c0_101], %50 {strides = array<i32>} : memref<16x16x72xf32, #tpu.memory_space<vmem>>, vector<16x16x8xf32>,
    %c0_102 = arith.constant 0 : index
    %c1_103 = arith.constant 1 : index
    %c0_104 = arith.constant 0 : index
    %52 = vector.load %arg12[%c0_102, %c1_103, %c0_104] : memref<18x18x8xf32, #tpu.memory_space<vmem>>, vector<16x16x8xf32>
    %c0_105 = arith.constant 0 : index
    %c0_106 = arith.constant 0 : index
    %c8_107 = arith.constant 8 : index
    %53 = vector.load %arg14[%c0_105, %c0_106, %c8_107] : memref<16x16x72xf32, #tpu.memory_space<vmem>>, vector<16x16x8xf32>
    tpu.vector_store %arg14[%c0_105, %c0_106, %c8_107], %52 {strides = array<i32>} : memref<16x16x72xf32, #tpu.memory_space<vmem>>, vector<16x16x8xf32>,
    %c0_108 = arith.constant 0 : index
    %c2_109 = arith.constant 2 : index
    %c0_110 = arith.constant 0 : index
    %54 = vector.load %arg12[%c0_108, %c2_109, %c0_110] : memref<18x18x8xf32, #tpu.memory_space<vmem>>, vector<16x16x8xf32>
    %c0_111 = arith.constant 0 : index
    %c0_112 = arith.constant 0 : index
    %c16 = arith.constant 16 : index
    %55 = vector.load %arg14[%c0_111, %c0_112, %c16] : memref<16x16x72xf32, #tpu.memory_space<vmem>>, vector<16x16x8xf32>
    tpu.vector_store %arg14[%c0_111, %c0_112, %c16], %54 {strides = array<i32>} : memref<16x16x72xf32, #tpu.memory_space<vmem>>, vector<16x16x8xf32>,
    %c1_113 = arith.constant 1 : index
    %c0_114 = arith.constant 0 : index
    %c0_115 = arith.constant 0 : index
    %56 = vector.load %arg12[%c1_113, %c0_114, %c0_115] : memref<18x18x8xf32, #tpu.memory_space<vmem>>, vector<16x16x8xf32>
    %c0_116 = arith.constant 0 : index
    %c0_117 = arith.constant 0 : index
    %c24_118 = arith.constant 24 : index
    %57 = vector.load %arg14[%c0_116, %c0_117, %c24_118] : memref<16x16x72xf32, #tpu.memory_space<vmem>>, vector<16x16x8xf32>
    tpu.vector_store %arg14[%c0_116, %c0_117, %c24_118], %56 {strides = array<i32>} : memref<16x16x72xf32, #tpu.memory_space<vmem>>, vector<16x16x8xf32>,
    %c1_119 = arith.constant 1 : index
    %c1_120 = arith.constant 1 : index
    %c0_121 = arith.constant 0 : index
    %58 = vector.load %arg12[%c1_119, %c1_120, %c0_121] : memref<18x18x8xf32, #tpu.memory_space<vmem>>, vector<16x16x8xf32>
    %c0_122 = arith.constant 0 : index
    %c0_123 = arith.constant 0 : index
    %c32 = arith.constant 32 : index
    %59 = vector.load %arg14[%c0_122, %c0_123, %c32] : memref<16x16x72xf32, #tpu.memory_space<vmem>>, vector<16x16x8xf32>
    tpu.vector_store %arg14[%c0_122, %c0_123, %c32], %58 {strides = array<i32>} : memref<16x16x72xf32, #tpu.memory_space<vmem>>, vector<16x16x8xf32>,
    %c1_124 = arith.constant 1 : index
    %c2_125 = arith.constant 2 : index
    %c0_126 = arith.constant 0 : index
    %60 = vector.load %arg12[%c1_124, %c2_125, %c0_126] : memref<18x18x8xf32, #tpu.memory_space<vmem>>, vector<16x16x8xf32>
    %c0_127 = arith.constant 0 : index
    %c0_128 = arith.constant 0 : index
    %c40 = arith.constant 40 : index
    %61 = vector.load %arg14[%c0_127, %c0_128, %c40] : memref<16x16x72xf32, #tpu.memory_space<vmem>>, vector<16x16x8xf32>
    tpu.vector_store %arg14[%c0_127, %c0_128, %c40], %60 {strides = array<i32>} : memref<16x16x72xf32, #tpu.memory_space<vmem>>, vector<16x16x8xf32>,
    %c2_129 = arith.constant 2 : index
    %c0_130 = arith.constant 0 : index
    %c0_131 = arith.constant 0 : index
    %62 = vector.load %arg12[%c2_129, %c0_130, %c0_131] : memref<18x18x8xf32, #tpu.memory_space<vmem>>, vector<16x16x8xf32>
    %c0_132 = arith.constant 0 : index
    %c0_133 = arith.constant 0 : index
    %c48_134 = arith.constant 48 : index
    %63 = vector.load %arg14[%c0_132, %c0_133, %c48_134] : memref<16x16x72xf32, #tpu.memory_space<vmem>>, vector<16x16x8xf32>
    tpu.vector_store %arg14[%c0_132, %c0_133, %c48_134], %62 {strides = array<i32>} : memref<16x16x72xf32, #tpu.memory_space<vmem>>, vector<16x16x8xf32>,
    %c2_135 = arith.constant 2 : index
    %c1_136 = arith.constant 1 : index
    %c0_137 = arith.constant 0 : index
    %64 = vector.load %arg12[%c2_135, %c1_136, %c0_137] : memref<18x18x8xf32, #tpu.memory_space<vmem>>, vector<16x16x8xf32>
    %c0_138 = arith.constant 0 : index
    %c0_139 = arith.constant 0 : index
    %c56 = arith.constant 56 : index
    %65 = vector.load %arg14[%c0_138, %c0_139, %c56] : memref<16x16x72xf32, #tpu.memory_space<vmem>>, vector<16x16x8xf32>
    tpu.vector_store %arg14[%c0_138, %c0_139, %c56], %64 {strides = array<i32>} : memref<16x16x72xf32, #tpu.memory_space<vmem>>, vector<16x16x8xf32>,
    %c2_140 = arith.constant 2 : index
    %c2_141 = arith.constant 2 : index
    %c0_142 = arith.constant 0 : index
    %66 = vector.load %arg12[%c2_140, %c2_141, %c0_142] : memref<18x18x8xf32, #tpu.memory_space<vmem>>, vector<16x16x8xf32>
    %c0_143 = arith.constant 0 : index
    %c0_144 = arith.constant 0 : index
    %c64 = arith.constant 64 : index
    %67 = vector.load %arg14[%c0_143, %c0_144, %c64] : memref<16x16x72xf32, #tpu.memory_space<vmem>>, vector<16x16x8xf32>
    tpu.vector_store %arg14[%c0_143, %c0_144, %c64], %66 {strides = array<i32>} : memref<16x16x72xf32, #tpu.memory_space<vmem>>, vector<16x16x8xf32>,
    %c0_145 = arith.constant 0 : index
    %c0_146 = arith.constant 0 : index
    %c0_147 = arith.constant 0 : index
    %68 = vector.load %arg14[%c0_145, %c0_146, %c0_147] : memref<16x16x72xf32, #tpu.memory_space<vmem>>, vector<16x16x72xf32>
    %69 = vector.shape_cast %68 : vector<16x16x72xf32> to vector<256x72xf32>
    %c0_148 = arith.constant 0 : index
    %c0_149 = arith.constant 0 : index
    %70 = vector.load %arg5[%c0_148, %c0_149] : memref<72x8xf32, #tpu.memory_space<vmem>>, vector<72x8xf32>
    %cst_150 = arith.constant dense<0.000000e+00> : vector<256x8xf32>
    %71 = tpu.matmul %69, %70, %cst_150 {dimension_numbers = #tpu.dot_dimension_numbers<[1], [0], [0], [1], [0, 0, 1, 1], [], []>} : vector<256x72xf32>, vector<72x8xf32>, vector<256x8xf32> -> vector<256x8xf32>
    %c0_151 = arith.constant 0 : index
    %c0_152 = arith.constant 0 : index
    %72 = vector.load %arg8[%c0_151, %c0_152] : memref<1x8xf32, #tpu.memory_space<vmem>>, vector<1x8xf32>
    %73 = vector.broadcast %72 : vector<1x8xf32> to vector<256x8xf32>
    %74 = arith.mulf %71, %73 : vector<256x8xf32>
    %c0_153 = arith.constant 0 : index
    %c0_154 = arith.constant 0 : index
    %75 = vector.load %arg9[%c0_153, %c0_154] : memref<1x8xf32, #tpu.memory_space<vmem>>, vector<1x8xf32>
    %76 = vector.broadcast %75 : vector<1x8xf32> to vector<256x8xf32>
    %77 = arith.addf %74, %76 : vector<256x8xf32>
    %cst_155 = arith.constant 0.000000e+00 : f32
    %78 = vector.broadcast %cst_155 : f32 to vector<256x8xf32>
    %79 = arith.maximumf %77, %78 : vector<256x8xf32>
    %80 = arith.addf %47, %79 : vector<256x8xf32>
    %c0_156 = arith.constant 0 : index
    %c0_157 = arith.constant 0 : index
    %81 = vector.load %arg1[%c0_156, %c0_157] : memref<8x8xf32, #tpu.memory_space<vmem>>, vector<8x8xf32>
    %cst_158 = arith.constant dense<0.000000e+00> : vector<8x256xf32>
    %82 = tpu.matmul %81, %80, %cst_158 {dimension_numbers = #tpu.dot_dimension_numbers<[1], [1], [0], [0], [0, 0, 1, 0], [], []>} : vector<8x8xf32>, vector<256x8xf32>, vector<8x256xf32> -> vector<8x256xf32>
    %c0_159 = arith.constant 0 : index
    %c0_160 = arith.constant 0 : index
    %c0_161 = arith.constant 0 : index
    %83 = vector.load %arg10[%c0_159, %c0_160, %c0_161] : memref<1x8x256xf32, #tpu.memory_space<vmem>>, vector<1x8x256xf32>
    %84 = vector.shape_cast %83 : vector<1x8x256xf32> to vector<8x256xf32>
    %85 = vector.shape_cast %82 : vector<8x256xf32> to vector<1x8x256xf32>
    tpu.vector_store %arg10[%c0_159, %c0_160, %c0_161], %85 {strides = array<i32>} : memref<1x8x256xf32, #tpu.memory_space<vmem>>, vector<1x8x256xf32>,
    return
  }
  func.func @transform_0(%arg0: i32) -> (i32, i32) {
    %c0_i32 = arith.constant 0 : i32
    %c0_i32_0 = arith.constant 0 : i32
    %c0_i32_1 = arith.constant 0 : i32
    return %c0_i32, %c0_i32_0 : i32, i32
  }
  func.func @transform_1(%arg0: i32) -> (i32, i32, i32, i32) {
    %c0_i32 = arith.constant 0 : i32
    %c0_i32_0 = arith.constant 0 : i32
    %c0_i32_1 = arith.constant 0 : i32
    %c0_i32_2 = arith.constant 0 : i32
    return %arg0, %c0_i32, %c0_i32_0, %c0_i32_1 : i32, i32, i32, i32
  }
  func.func @transform_2(%arg0: i32) -> (i32, i32, i32, i32) {
    %c0_i32 = arith.constant 0 : i32
    %c0_i32_0 = arith.constant 0 : i32
    %c0_i32_1 = arith.constant 0 : i32
    %c0_i32_2 = arith.constant 0 : i32
    return %arg0, %c0_i32, %c0_i32_0, %c0_i32_1 : i32, i32, i32, i32
  }
  func.func @transform_3(%arg0: i32) -> (i32, i32) {
    %c0_i32 = arith.constant 0 : i32
    %c0_i32_0 = arith.constant 0 : i32
    %c0_i32_1 = arith.constant 0 : i32
    return %c0_i32, %c0_i32_0 : i32, i32
  }
  func.func @transform_4(%arg0: i32) -> (i32, i32) {
    %c0_i32 = arith.constant 0 : i32
    %c0_i32_0 = arith.constant 0 : i32
    %c0_i32_1 = arith.constant 0 : i32
    return %c0_i32, %c0_i32_0 : i32, i32
  }
  func.func @transform_5(%arg0: i32) -> (i32, i32) {
    %c0_i32 = arith.constant 0 : i32
    %c0_i32_0 = arith.constant 0 : i32
    %c0_i32_1 = arith.constant 0 : i32
    return %c0_i32, %c0_i32_0 : i32, i32
  }
  func.func @transform_6(%arg0: i32) -> (i32, i32) {
    %c0_i32 = arith.constant 0 : i32
    %c0_i32_0 = arith.constant 0 : i32
    %c0_i32_1 = arith.constant 0 : i32
    return %c0_i32, %c0_i32_0 : i32, i32
  }
  func.func @transform_7(%arg0: i32) -> (i32, i32) {
    %c0_i32 = arith.constant 0 : i32
    %c0_i32_0 = arith.constant 0 : i32
    %c0_i32_1 = arith.constant 0 : i32
    return %c0_i32, %c0_i32_0 : i32, i32
  }
  func.func @transform_8(%arg0: i32) -> (i32, i32) {
    %c0_i32 = arith.constant 0 : i32
    %c0_i32_0 = arith.constant 0 : i32
    %c0_i32_1 = arith.constant 0 : i32
    return %c0_i32, %c0_i32_0 : i32, i32
  }
  func.func @transform_9(%arg0: i32) -> (i32, i32, i32) {
    %c0_i32 = arith.constant 0 : i32
    %c0_i32_0 = arith.constant 0 : i32
    %c0_i32_1 = arith.constant 0 : i32
    return %arg0, %c0_i32, %c0_i32_0 : i32, i32, i32
  }
}

</mosaic_0001>

<bundles_post_ra>
// kernel: skip_upscale_forward.2
= control target key start
LH: loop header
LB: loop body
LE: loop exit
PB: predicated region body
PF: predicated region fallthrough
CT: control target
= control target key end

     0   :  { %vm35_vm0 = vcmask 130048   ;;  %s629_s1 = inlined_call_operand.vmem [shape: f32[16,32], index: 1, kind: input, shape index: {}]   ;;  %s630_s0 = inlined_call_operand.vmem [shape: f32[2,8,8,16], index: 0, kind: input, shape index: {}]   ;;  %s631_s2 = inlined_call_operand.vmem [shape: f32[1,32], index: 2, kind: input, shape index: {}]   ;;  %s632_s3 = inlined_call_operand.vmem [shape: f32[1,32], index: 3, kind: input, shape index: {}]   ;;  %s633_s4 = inlined_call_operand.vmem [shape: f32[2,8,2,8,16], index: 4, kind: output, shape index: {}]  }
   0x1   :  { %v34_v0 = vld [vmem:[%s629_s1 + $0x8] sm:$0xff]  ;;  %v33_v1 = vld [vmem:[%s629_s1] sm:$0xff]  ;;  %v19_v10 = vld [vmem:[%s630_s0 + $0x10] sm:$0xff] }
   0x2   :  { %98 = vmatpush.msra.mxu0 %v34_v0  ;;  %338 = vmatpush.msra.mxu1 %v34_v0  ;;  %v17_v2 = vld [vmem:[%s630_s0] sm:$0xff]  ;;  %v18_v6 = vld [vmem:[%s630_s0 + $0x8] sm:$0xff]  ;;  %v23_v11 = vld [vmem:[%s630_s0 + $0x30] sm:$0xff] }
   0x3   :  { %v21_v3 = vld [vmem:[%s630_s0 + $0x20] sm:$0xff]  ;;  %339 = vmatpush.msra.mxu2 %v34_v0  ;;  %340 = vmatpush.msra.mxu3 %v34_v0  ;;  %v22_v7 = vld [vmem:[%s630_s0 + $0x28] sm:$0xff]  ;;  %v27_v12 = vld [vmem:[%s630_s0 + $0x50] sm:$0xff] }
   0x4   :  { %99 = vmatpush.msra.mxu0 %v33_v1  ;;  %341 = vmatpush.msra.mxu1 %v33_v1  ;;  %v25_v4 = vld [vmem:[%s630_s0 + $0x40] sm:$0xff]  ;;  %v26_v8 = vld [vmem:[%s630_s0 + $0x48] sm:$0xff]  ;;  %v31_v13 = vld [vmem:[%s630_s0 + $0x70] sm:$0xff] }
   0x5   :  { %v29_v5 = vld [vmem:[%s630_s0 + $0x60] sm:$0xff]  ;;  %306 = vmatmul.msk.f32.vlgmr.msra.gmra.mxu0 %vm35_vm0, %v17_v2  ;;  %310 = vmatmul.msk.f32.vlgmr.msra.gmra.mxu1 %vm35_vm0, %v21_v3  ;;  %v30_v9 = vld [vmem:[%s630_s0 + $0x68] sm:$0xff]  ;;  %v20_v14 = vld [vmem:[%s630_s0 + $0x18] sm:$0xff] }
   0x6   :  { %342 = vmatpush.msra.mxu2 %v33_v1  ;;  %343 = vmatpush.msra.mxu3 %v33_v1  ;;  %v24_v15 = vld [vmem:[%s630_s0 + $0x38] sm:$0xff]  ;;  %v446_v18 = vld [vmem:[%s631_s2] ss:$0 sm:$0xff] }
   0x7   :  { %314 = vmatmul.msk.f32.vlgmr.msra.gmra.mxu2 %vm35_vm0, %v25_v4  ;;  %318 = vmatmul.msk.f32.vlgmr.msra.gmra.mxu3 %vm35_vm0, %v29_v5  ;;  %v28_v16 = vld [vmem:[%s630_s0 + $0x58] sm:$0xff]  ;;  %v451_v19 = vld [vmem:[%s632_s3] ss:$0 sm:$0xff] }
   0x8   :  { %v32_v17 = vld [vmem:[%s630_s0 + $0x78] sm:$0xff]  ;;  %s347_s0 = smov 112  }
   0xd   :  { %307 = vmatmul.msk.f32.gmra.mxu0 %vm35_vm0, %v18_v6  ;;  %311 = vmatmul.msk.f32.gmra.mxu1 %vm35_vm0, %v22_v7 }
   0xf   :  { %315 = vmatmul.msk.f32.gmra.mxu2 %vm35_vm0, %v26_v8  ;;  %319 = vmatmul.msk.f32.gmra.mxu3 %vm35_vm0, %v30_v9 }
  0x15   :  { %308 = vmatmul.msk.f32.gmra.mxu0 %vm35_vm0, %v19_v10  ;;  %312 = vmatmul.msk.f32.gmra.mxu1 %vm35_vm0, %v23_v11 }
  0x17   :  { %316 = vmatmul.msk.f32.gmra.mxu2 %vm35_vm0, %v27_v12  ;;  %320 = vmatmul.msk.f32.gmra.mxu3 %vm35_vm0, %v31_v13 }
  0x1d   :  { %309 = vmatmul.msk.f32.gmra.mxu0 %vm35_vm0, %v20_v14  ;;  %313 = vmatmul.msk.f32.gmra.mxu1 %vm35_vm0, %v24_v15 }
  0x1f   :  { %317 = vmatmul.msk.f32.gmra.mxu2 %vm35_vm0, %v28_v16  ;;  %321 = vmatmul.msk.f32.gmra.mxu3 %vm35_vm0, %v32_v17 }
  0x82   :  { %v101_v20 = vpop.f32.mrf.mxu0  ;;  %v113_v21 = vpop.f32.mrf.mxu1 }
  0x83   :  { %v153_v22 = vmul.f32 %v446_v18, %v101_v20  ;;  %v157_v23 = vmul.f32 %v446_v18, %v113_v21 }
  0x85   :  { %v177_v24 = vadd.f32 %v451_v19, %v157_v23  ;;  %v173_v25 = vadd.f32 %v451_v19, %v153_v22 }
  0x87   :  { %v193_v26 = vmax.f32 %v177_v24, 0.0  ;;  %v189_v27 = vmax.f32 %v173_v25, 0.0 }
  0x89   :  { %245 = vrot.lane.b32.xlu2 %v193_v26, %s347_s0  ;;  %209 = vst.msk [vmem:[%s633_s4 + $0x40] sm:$0xff] %vm35_vm0, %v193_v26  ;;  %237 = vrot.lane.b32.xlu0 %v189_v27, %s347_s0 }
  0x8a   :  { %205 = vst.msk [vmem:[%s633_s4] sm:$0xff] %vm35_vm0, %v189_v27  ;;  %v104_v28 = vpop.f32.mrf.mxu0  ;;  %v125_v29 = vpop.f32.mrf.mxu2 }
  0x8b   :  { %v154_v30 = vmul.f32 %v446_v18, %v104_v28  ;;  %v161_v31 = vmul.f32 %v446_v18, %v125_v29  ;;  %v137_v32 = vpop.f32.mrf.mxu3  ;;  %v116_v33 = vpop.f32.mrf.mxu1 }
  0x8c   :  { %v165_v34 = vmul.f32 %v446_v18, %v137_v32  ;;  %v158_v35 = vmul.f32 %v446_v18, %v116_v33 }
  0x8d   :  { %v174_v36 = vadd.f32 %v451_v19, %v154_v30  ;;  %v181_v37 = vadd.f32 %v451_v19, %v161_v31 }
  0x8e   :  { %v185_v38 = vadd.f32 %v451_v19, %v165_v34  ;;  %v178_v39 = vadd.f32 %v451_v19, %v158_v35 }
  0x8f   :  { %v190_v40 = vmax.f32 %v174_v36, 0.0  ;;  %v197_v41 = vmax.f32 %v181_v37, 0.0 }
  0x90   :  { %v201_v42 = vmax.f32 %v185_v38, 0.0  ;;  %v194_v43 = vmax.f32 %v178_v39, 0.0 }
  0x91   :  { %206 = vst.msk [vmem:[%s633_s4 + $0x10] sm:$0xff] %vm35_vm0, %v190_v40  ;;  %253 = vrot.lane.b32.xlu2 %v197_v41, %s347_s0 }
  0x92   :  { %213 = vst.msk [vmem:[%s633_s4 + $0x80] sm:$0xff] %vm35_vm0, %v197_v41  ;;  %261 = vrot.lane.b32.xlu0 %v201_v42, %s347_s0  ;;  %v107_v44 = vpop.f32.mrf.mxu0  ;;  %v128_v45 = vpop.f32.mrf.mxu2 }
  0x93   :  { %217 = vst.msk [vmem:[%s633_s4 + $0xc0] sm:$0xff] %vm35_vm0, %v201_v42  ;;  %v155_v46 = vmul.f32 %v446_v18, %v107_v44  ;;  %v162_v47 = vmul.f32 %v446_v18, %v128_v45  ;;  %v119_v48 = vpop.f32.mrf.mxu1  ;;  %v140_v49 = vpop.f32.mrf.mxu3 }
  0x94   :  { %210 = vst.msk [vmem:[%s633_s4 + $0x50] sm:$0xff] %vm35_vm0, %v194_v43  ;;  %v159_v50 = vmul.f32 %v446_v18, %v119_v48  ;;  %v166_v51 = vmul.f32 %v446_v18, %v140_v49 }
  0x95   :  { %v182_v52 = vadd.f32 %v451_v19, %v162_v47  ;;  %v175_v53 = vadd.f32 %v451_v19, %v155_v46 }
  0x96   :  { %v179_v54 = vadd.f32 %v451_v19, %v159_v50  ;;  %v186_v55 = vadd.f32 %v451_v19, %v166_v51 }
  0x97   :  { %v198_v56 = vmax.f32 %v182_v52, 0.0  ;;  %v191_v57 = vmax.f32 %v175_v53, 0.0 }
  0x98   :  { %v195_v58 = vmax.f32 %v179_v54, 0.0  ;;  %v202_v59 = vmax.f32 %v186_v55, 0.0 }
  0x99   :  { %214 = vst.msk [vmem:[%s633_s4 + $0x90] sm:$0xff] %vm35_vm0, %v198_v56  ;;  %241 = vrot.lane.b32.xlu1 %v191_v57, %s347_s0  ;;  %247 = vrot.lane.b32.xlu2 %v194_v43, %s347_s0 }
  0x9a   :  { %239 = vrot.lane.b32.xlu0 %v190_v40, %s347_s0  ;;  %207 = vst.msk [vmem:[%s633_s4 + $0x20] sm:$0xff] %vm35_vm0, %v191_v57  ;;  %v131_v60 = vpop.f32.mrf.mxu2  ;;  %v110_v61 = vpop.f32.mrf.mxu0 }
  0x9b   :  { %v163_v62 = vmul.f32 %v446_v18, %v131_v60  ;;  %v156_v63 = vmul.f32 %v446_v18, %v110_v61  ;;  %211 = vst.msk [vmem:[%s633_s4 + $0x60] sm:$0xff] %vm35_vm0, %v195_v58  ;;  %v122_v0 = vpop.f32.mrf.mxu1  ;;  %v143_v1 = vpop.f32.mrf.mxu3 }
  0x9c   :  { %218 = vst.msk [vmem:[%s633_s4 + $0xd0] sm:$0xff] %vm35_vm0, %v202_v59  ;;  %v160_v2 = vmul.f32 %v446_v18, %v122_v0  ;;  %v167_v3 = vmul.f32 %v446_v18, %v143_v1 }
  0x9d   :  { %v183_v4 = vadd.f32 %v451_v19, %v163_v62  ;;  %v176_v5 = vadd.f32 %v451_v19, %v156_v63 }
  0x9e   :  { %v180_v6 = vadd.f32 %v451_v19, %v160_v2  ;;  %v187_v7 = vadd.f32 %v451_v19, %v167_v3 }
  0x9f   :  { %v199_v8 = vmax.f32 %v183_v4, 0.0  ;;  %v192_v9 = vmax.f32 %v176_v5, 0.0 }
  0xa0   :  { %v196_v10 = vmax.f32 %v180_v6, 0.0  ;;  %v203_v11 = vmax.f32 %v187_v7, 0.0 }
  0xa1   :  { %215 = vst.msk [vmem:[%s633_s4 + $0xa0] sm:$0xff] %vm35_vm0, %v199_v8  ;;  %257 = vrot.lane.b32.xlu1 %v199_v8, %s347_s0 }
  0xa2   :  { %255 = vrot.lane.b32.xlu0 %v198_v56, %s347_s0  ;;  %208 = vst.msk [vmem:[%s633_s4 + $0x30] sm:$0xff] %vm35_vm0, %v192_v9  ;;  %v134_v12 = vpop.f32.mrf.mxu2 }
  0xa3   :  { %v164_v13 = vmul.f32 %v446_v18, %v134_v12  ;;  %212 = vst.msk [vmem:[%s633_s4 + $0x70] sm:$0xff] %vm35_vm0, %v196_v10  ;;  %v146_v14 = vpop.f32.mrf.mxu3 }
  0xa4   :  { %219 = vst.msk [vmem:[%s633_s4 + $0xe0] sm:$0xff] %vm35_vm0, %v203_v11  ;;  %v168_v15 = vmul.f32 %v446_v18, %v146_v14 }
  0xa5   :  { %v184_v16 = vadd.f32 %v451_v19, %v164_v13 }
  0xa6   :  { %v188_v17 = vadd.f32 %v451_v19, %v168_v15 }
  0xa7   :  { %v200_v20 = vmax.f32 %v184_v16, 0.0 }
  0xa8   :  { %v204_v21 = vmax.f32 %v188_v17, 0.0 }
  0xa9   :  { %216 = vst.msk [vmem:[%s633_s4 + $0xb0] sm:$0xff] %vm35_vm0, %v200_v20  ;;  %259 = vrot.lane.b32.xlu2 %v200_v20, %s347_s0  ;;  %243 = vrot.lane.b32.xlu1 %v192_v9, %s347_s0 }
  0xaa   :  { %249 = vrot.lane.b32.xlu0 %v195_v58, %s347_s0  ;;  %220 = vst.msk [vmem:[%s633_s4 + $0xf0] sm:$0xff] %vm35_vm0, %v204_v21 }
  0xb1   :  { %265 = vrot.lane.b32.xlu2 %v203_v11, %s347_s0  ;;  %251 = vrot.lane.b32.xlu1 %v196_v10, %s347_s0 }
  0xb2   :  { %267 = vrot.lane.b32.xlu0 %v204_v21, %s347_s0 }
  0xb9   :  { %263 = vrot.lane.b32.xlu1 %v202_v59, %s347_s0 }
  0xe3   :  { %v246_v18 = vpop.permute.xlu2 %245 }
  0xe4   :  { %326 = vst.msk [vmem:[%s633_s4 + $0x48] sm:$0xff] %vm35_vm0, %v246_v18 }
  0xeb   :  { %v254_v19 = vpop.permute.xlu2 %253 }
  0xec   :  { %330 = vst.msk [vmem:[%s633_s4 + $0x88] sm:$0xff] %vm35_vm0, %v254_v19 }
  0xf3   :  { %v248_v22 = vpop.permute.xlu2 %247 }
  0xf4   :  { %327 = vst.msk [vmem:[%s633_s4 + $0x58] sm:$0xff] %vm35_vm0, %v248_v22 }
  0xfb   :  { %v238_v23 = vpop.permute.xlu0 %237 }
  0xfc   :  { %322 = vst.msk [vmem:[%s633_s4 + $0x8] sm:$0xff] %vm35_vm0, %v238_v23 }
 0x103   :  { %v260_v24 = vpop.permute.xlu2 %259 }
 0x104   :  { %333 = vst.msk [vmem:[%s633_s4 + $0xb8] sm:$0xff] %vm35_vm0, %v260_v24  ;;  %v262_v25 = vpop.permute.xlu0 %261 }
 0x105   :  { %334 = vst.msk [vmem:[%s633_s4 + $0xc8] sm:$0xff] %vm35_vm0, %v262_v25 }
 0x10b   :  { %v266_v26 = vpop.permute.xlu2 %265  ;;  %v242_v27 = vpop.permute.xlu1 %241 }
 0x10c   :  { %336 = vst.msk [vmem:[%s633_s4 + $0xe8] sm:$0xff] %vm35_vm0, %v266_v26  ;;  %v240_v28 = vpop.permute.xlu0 %239 }
 0x10d   :  { %323 = vst.msk [vmem:[%s633_s4 + $0x18] sm:$0xff] %vm35_vm0, %v240_v28 }
 0x10e   :  { %324 = vst.msk [vmem:[%s633_s4 + $0x28] sm:$0xff] %vm35_vm0, %v242_v27 }
 0x113   :  { %v258_v29 = vpop.permute.xlu1 %257 }
 0x114   :  { %v256_v30 = vpop.permute.xlu0 %255  ;;  %332 = vst.msk [vmem:[%s633_s4 + $0xa8] sm:$0xff] %vm35_vm0, %v258_v29 }
 0x115   :  { %331 = vst.msk [vmem:[%s633_s4 + $0x98] sm:$0xff] %vm35_vm0, %v256_v30 }
 0x11b   :  { %v244_v31 = vpop.permute.xlu1 %243 }
 0x11c   :  { %v250_v32 = vpop.permute.xlu0 %249  ;;  %325 = vst.msk [vmem:[%s633_s4 + $0x38] sm:$0xff] %vm35_vm0, %v244_v31 }
 0x11d   :  { %328 = vst.msk [vmem:[%s633_s4 + $0x68] sm:$0xff] %vm35_vm0, %v250_v32 }
 0x123   :  { %v252_v33 = vpop.permute.xlu1 %251 }
 0x124   :  { %329 = vst.msk [vmem:[%s633_s4 + $0x78] sm:$0xff] %vm35_vm0, %v252_v33  ;;  %v268_v34 = vpop.permute.xlu0 %267 }
 0x125   :  { %337 = vst.msk [vmem:[%s633_s4 + $0xf8] sm:$0xff] %vm35_vm0, %v268_v34 }
 0x12b   :  { %v264_v35 = vpop.permute.xlu1 %263 }
 0x12c   :  { %335 = vst.msk [vmem:[%s633_s4 + $0xd8] sm:$0xff] %vm35_vm0, %v264_v35 }

// kernel: skip_upscale_forward.3
= control target key start
LH: loop header
LB: loop body
LE: loop exit
PB: predicated region body
PF: predicated region fallthrough
CT: control target
= control target key end

     0   :  { %s5154_s30 = smov 0   ;;  %s7932_s0 = inlined_call_operand.vmem [shape: f32[8,8], index: 0, kind: input, shape index: {}]   ;;  %s7933_s1 = inlined_call_operand.vmem [shape: f32[2,16,16,8], index: 1, kind: input, shape index: {}]   ;;  %s7934_s2 = inlined_call_operand.vmem [shape: f32[2,16,16,4], index: 2, kind: input, shape index: {}]   ;;  %s7935_s3 = inlined_call_operand.vmem [shape: f32[108,8], index: 3, kind: input, shape index: {}]   ;;  %s7936_s4 = inlined_call_operand.vmem [shape: f32[72,8], index: 4, kind: input, shape index: {}]   ;;  %s7937_s5 = inlined_call_operand.vmem [shape: f32[1,8], index: 5, kind: input, shape index: {}]   ;;  %s7938_s6 = inlined_call_operand.vmem [shape: f32[1,8], index: 6, kind: input, shape index: {}]   ;;  %s7939_s7 = inlined_call_operand.vmem [shape: f32[1,8], index: 7, kind: input, shape index: {}]   ;;  %s7940_s8 = inlined_call_operand.vmem [shape: f32[1,8], index: 8, kind: input, shape index: {}]   ;;  %s7941_s9 = inlined_call_operand.vmem [shape: f32[2,8,256], index: 9, kind: output, shape index: {}]  }
   0x1 LB: > { %s4914_s10 = sadd.s32 4294967295, %s5087_s30   ;;  %p4918_p0 = scmp.ge.s32.totalorder %s5087_s30, 1  ;;  %s5087_s30 = sphi %s5154_s30, %s19_s30  }
   0x2   : > { %p297_p1 = scmp.lt.s32.totalorder %s5087_s30, 3 }
   0x4   : > { %p298_p2 = pnand %p4918_p0, %p297_p1 }
   0x6   : > { %301 = sbr.rel (%p298_p2) target bundleno = 2188 (0x88c), region = 56 }
   0xb   : > { %p338_p3 = scmp.lt.s32.totalorder %s4914_s10, 1  ;;  %s5089_s15 = smov 8   ;;  %vm399_vm0 = vcmask 64512   ;;  %vm353_vm1 = vcmask 97280   ;;  %vm356_vm2 = vcmask 91136   ;;  %v7942_v31 = vmov 0.0  }
   0xc   : > { %355 = vst.msk [vmem:[#allocation2 + $0x8] sm:$0xff] %vm353_vm1, %v7942_v31  ;;  %s5091_s19 = smov 12   ;;  %vm362_vm3 = vcmask 90112   ;;  %vm670_vm4 = vcmask 97344   ;;  %vm927_vm5 = vcmask 195680   ;;  %s5092_s20 = smov 24  }
   0xd   : > { %s8168_s10 = smov (!%p338_p3, %s4914_s10), 1  ;;  %357 = vst.msk [vmem:[#allocation2 + $0x10] sm:$0x3] %vm356_vm2, %v7942_v31  ;;  %s5093_s21 = smov 36   ;;  %vm1120_vm6 = vcmask 294080   ;;  %vm1313_vm7 = vcmask 392480  }
   0xe   : > { %s5026_s11 = sshll.u32 %s8168_s10, 8  ;;  %354 = vst.msk [vmem:[#allocation2] sm:$0xff] %vm353_vm1, %v7942_v31  ;;  %s5094_s22 = smov 48   ;;  %vm1506_vm8 = vcmask 490880   ;;  %vm1699_vm9 = vcmask 589280   ;;  %vm1893_vm10 = vcmask 687680  }
   0xf   : > { %s5170_s14 = scalar_lea.vmem %s7934_s2, %s5026_s11  ;;  %s5225_s18 = scalar_lea.vmem %s7933_s1, %s5026_s11  ;;  %359 = vst.msk [vmem:[#allocation2 + $0x198] sm:$0xff] %vm353_vm1, %v7942_v31  ;;  %vm2086_vm11 = vcmask 786080   ;;  %vm2455_vm12 = vcmask 1043456   ;;  %vm2279_vm13 = vcmask 884480   ;;  %vm2358_vm14 = vcmask 883712  }
  0x10   : > { %v512_v0 = vld [vmem:[%s5170_s14 + $0x10] sm:$0xff]  ;;  %v510_v1 = vld [vmem:[%s5170_s14] sm:$0xff]  ;;  %v513_v3 = vld [vmem:[%s5170_s14 + $0x18] sm:$0xff]  ;;  %360 = vst.msk [vmem:[#allocation2 + $0x1a0] sm:$0xff] %vm353_vm1, %v7942_v31  ;;  %s5095_s23 = smov 60   ;;  %s5096_s24 = smov 72  }
  0x11   : > { %578 = vrot.lane.b32.xlu1 %v512_v0, %s5089_s15  ;;  %574 = vrot.lane.b32.xlu0 %v510_v1, %s5089_s15  ;;  %v514_v2 = vld [vmem:[%s5170_s14 + $0x20] sm:$0xff]  ;;  %v511_v4 = vld [vmem:[%s5170_s14 + $0x8] sm:$0xff]  ;;  %361 = vst.msk [vmem:[#allocation2 + $0x1a8] sm:$0x3] %vm356_vm2, %v7942_v31  ;;  %s5097_s25 = smov 84   ;;  %s5098_s26 = smov 96  }
  0x12   : > { %582 = vrot.lane.b32.xlu2 %v514_v2, %s5089_s15  ;;  %v515_v5 = vld [vmem:[%s5170_s14 + $0x28] sm:$0xff]  ;;  %v517_v6 = vld [vmem:[%s5170_s14 + $0x38] sm:$0xff]  ;;  %v516_v7 = vld [vmem:[%s5170_s14 + $0x30] sm:$0xff]  ;;  %400 = vst.msk [vmem:[#allocation3] sm:$0xff] %vm399_vm0, %v7942_v31  ;;  %vm402_vm15 = vcmask 58368   ;;  %vm2933_vm2 = vcmask 130112  }
  0x13   : > { %v518_v8 = vld [vmem:[%s5170_s14 + $0x40] sm:$0xff]  ;;  %v520_v9 = vld [vmem:[%s5170_s14 + $0x50] sm:$0xff]  ;;  %v519_v10 = vld [vmem:[%s5170_s14 + $0x48] sm:$0xff]  ;;  %401 = vst.msk [vmem:[#allocation3 + $0x8] sm:$0xff] %vm399_vm0, %v7942_v31  ;;  %s5099_s28 = smov 16   ;;  %s5100_s13 = smov 32  }
  0x14   : > { %v521_v11 = vld [vmem:[%s5170_s14 + $0x58] sm:$0xff]  ;;  %v523_v12 = vld [vmem:[%s5170_s14 + $0x68] sm:$0xff]  ;;  %v522_v13 = vld [vmem:[%s5170_s14 + $0x60] sm:$0xff]  ;;  %405 = vst.msk [vmem:[#allocation3 + $0x198] sm:$0xff] %vm399_vm0, %v7942_v31  ;;  %s5102_s16 = smov 40   ;;  %s5103_s17 = smov 64  }
  0x15   : > { %v524_v14 = vld [vmem:[%s5170_s14 + $0x70] sm:$0xff]  ;;  %v526_v15 = vld [vmem:[%s5170_s14 + $0x80] sm:$0xff]  ;;  %v525_v16 = vld [vmem:[%s5170_s14 + $0x78] sm:$0xff]  ;;  %406 = vst.msk [vmem:[#allocation3 + $0x1a0] sm:$0xff] %vm399_vm0, %v7942_v31 }
  0x16   : > { %v527_v17 = vld [vmem:[%s5170_s14 + $0x88] sm:$0xff]  ;;  %v529_v18 = vld [vmem:[%s5170_s14 + $0x98] sm:$0xff]  ;;  %v528_v19 = vld [vmem:[%s5170_s14 + $0x90] sm:$0xff]  ;;  %381 = vst.msk [vmem:[#allocation2 + $0x11] sm:$0x1] %vm362_vm3, %v7942_v31 }
  0x17   : > { %v530_v20 = vld [vmem:[%s5170_s14 + $0xa0] sm:$0xff]  ;;  %v532_v21 = vld [vmem:[%s5170_s14 + $0xb0] sm:$0xff]  ;;  %v531_v22 = vld [vmem:[%s5170_s14 + $0xa8] sm:$0xff]  ;;  %363 = vst.msk [vmem:[#allocation2] sm:$0x1] %vm362_vm3, %v7942_v31 }
  0x18   : > { %v533_v23 = vld [vmem:[%s5170_s14 + $0xb8] sm:$0xff]  ;;  %v449_v24 = vld [vmem:[%s5225_s18 + $0x20] sm:$0xff]  ;;  %v535_v25 = vld [vmem:[%s5170_s14 + $0xc8] sm:$0xff]  ;;  %364 = vst.msk [vmem:[#allocation2 + $0x18] sm:$0x1] %vm362_vm3, %v7942_v31 }
  0x19   : > { %580 = vrot.lane.b32.xlu1 %v513_v3, %s5089_s15  ;;  %576 = vrot.lane.b32.xlu0 %v511_v4, %s5089_s15  ;;  %v534_v26 = vld [vmem:[%s5170_s14 + $0xc0] sm:$0xff]  ;;  %482 = vst.msk [vmem:[#allocation2 + $0x49] sm:$0xff] %vm399_vm0, %v449_v24  ;;  %v536_v27 = vld [vmem:[%s5170_s14 + $0xd0] sm:$0xff] }
  0x1a   : > { %584 = vrot.lane.b32.xlu2 %v515_v5, %s5089_s15  ;;  %v537_v28 = vld [vmem:[%s5170_s14 + $0xd8] sm:$0xff]  ;;  %v538_v29 = vld [vmem:[%s5170_s14 + $0xe0] sm:$0xff]  ;;  %v539_v30 = vld [vmem:[%s5170_s14 + $0xe8] sm:$0xff]  ;;  %365 = vst.msk [vmem:[#allocation2 + $0x30] sm:$0x1] %vm362_vm3, %v7942_v31 }
  0x1b   : > { %v540_v32 = vld [vmem:[%s5170_s14 + $0xf0] sm:$0xff]  ;;  %v445_v34 = vld [vmem:[%s5225_s18] sm:$0xff]  ;;  %v541_v35 = vld [vmem:[%s5170_s14 + $0xf8] sm:$0xff]  ;;  %366 = vst.msk [vmem:[#allocation2 + $0x48] sm:$0x1] %vm362_vm3, %v7942_v31  ;;  %s5101_s14 = smov 56  }
  0x1c   : > { %v447_v33 = vld [vmem:[%s5225_s18 + $0x10] sm:$0xff]  ;;  %478 = vst.msk [vmem:[#allocation2 + $0x19] sm:$0xff] %vm399_vm0, %v445_v34  ;;  %v450_v37 = vld [vmem:[%s5225_s18 + $0x28] sm:$0xff]  ;;  %v448_v38 = vld [vmem:[%s5225_s18 + $0x18] sm:$0xff] }
  0x1d   : > { %480 = vst.msk [vmem:[#allocation2 + $0x31] sm:$0xff] %vm399_vm0, %v447_v33  ;;  %v768_v36 = vld [vmem:[#allocation2 + $0x9] sm:$0xff]  ;;  %v767_v40 = vld [vmem:[#allocation2 + $0x1] sm:$0xff]  ;;  %v452_v43 = vld [vmem:[%s5225_s18 + $0x38] sm:$0xff] }
  0x1e   : > { %483 = vst.msk [vmem:[#allocation2 + $0x51] sm:$0xff] %vm399_vm0, %v450_v37  ;;  %v446_v39 = vld [vmem:[%s5225_s18 + $0x8] sm:$0xff]  ;;  %v453_v42 = vld [vmem:[%s5225_s18 + $0x40] sm:$0xff]  ;;  %v451_v44 = vld [vmem:[%s5225_s18 + $0x30] sm:$0xff] }
  0x1f   : > { %481 = vst.msk [vmem:[#allocation2 + $0x39] sm:$0xff] %vm399_vm0, %v448_v38  ;;  %v456_v46 = vld [vmem:[%s5225_s18 + $0x58] sm:$0xff]  ;;  %v455_v47 = vld [vmem:[%s5225_s18 + $0x50] sm:$0xff]  ;;  %v454_v48 = vld [vmem:[%s5225_s18 + $0x48] sm:$0xff] }
  0x20   : > { %479 = vst.msk [vmem:[#allocation2 + $0x21] sm:$0xff] %vm399_vm0, %v446_v39  ;;  %v459_v50 = vld [vmem:[%s5225_s18 + $0x70] sm:$0xff]  ;;  %v458_v53 = vld [vmem:[%s5225_s18 + $0x68] sm:$0xff]  ;;  %v457_v55 = vld [vmem:[%s5225_s18 + $0x60] sm:$0xff] }
  0x21   : > { %588 = vrot.lane.b32.xlu1 %v517_v6, %s5089_s15  ;;  %586 = vrot.lane.b32.xlu0 %v516_v7, %s5089_s15  ;;  %486 = vst.msk [vmem:[#allocation2 + $0x79] sm:$0xff] %vm399_vm0, %v453_v42  ;;  %v462_v56 = vld [vmem:[%s5225_s18 + $0x88] sm:$0xff]  ;;  %v461_v61 = vld [vmem:[%s5225_s18 + $0x80] sm:$0xff] }
  0x22   : > { %590 = vrot.lane.b32.xlu2 %v518_v8, %s5089_s15  ;;  %367 = vst.msk [vmem:[#allocation2 + $0x60] sm:$0x1] %vm362_vm3, %v7942_v31  ;;  %v460_v63 = vld [vmem:[%s5225_s18 + $0x78] sm:$0xff]  ;;  %v465_v0 = vld [vmem:[%s5225_s18 + $0xa0] sm:$0xff]  ;;  %v463_v8 = vld [vmem:[%s5225_s18 + $0x90] sm:$0xff] }
  0x23   : > { %485 = vst.msk [vmem:[#allocation2 + $0x69] sm:$0xff] %vm399_vm0, %v452_v43  ;;  %v464_v6 = vld [vmem:[%s5225_s18 + $0x98] sm:$0xff]  ;;  %v470_v24 = vld [vmem:[%s5225_s18 + $0xc8] sm:$0xff] }
  0x24   : > { %484 = vst.msk [vmem:[#allocation2 + $0x61] sm:$0xff] %vm399_vm0, %v451_v44  ;;  %v472_v34 = vld [vmem:[%s5225_s18 + $0xd8] sm:$0xff] }
  0x25   : > { %489 = vst.msk [vmem:[#allocation2 + $0x99] sm:$0xff] %vm399_vm0, %v456_v46 }
  0x26   : > { %368 = vst.msk [vmem:[#allocation2 + $0x78] sm:$0x1] %vm362_vm3, %v7942_v31 }
  0x27   : > { %369 = vst.msk [vmem:[#allocation2 + $0x90] sm:$0x1] %vm362_vm3, %v7942_v31 }
  0x28   : > { %370 = vst.msk [vmem:[#allocation2 + $0xa8] sm:$0x1] %vm362_vm3, %v7942_v31 }
  0x29   : > { %594 = vrot.lane.b32.xlu1 %v520_v9, %s5089_s15  ;;  %592 = vrot.lane.b32.xlu0 %v519_v10, %s5089_s15  ;;  %371 = vst.msk [vmem:[#allocation2 + $0xc0] sm:$0x1] %vm362_vm3, %v7942_v31  ;;  %v468_v9 = vld [vmem:[%s5225_s18 + $0xb8] sm:$0xff] }
  0x2a   : > { %596 = vrot.lane.b32.xlu2 %v521_v11, %s5089_s15  ;;  %488 = vst.msk [vmem:[#allocation2 + $0x91] sm:$0xff] %vm399_vm0, %v455_v47 }
  0x2b   : > { %487 = vst.msk [vmem:[#allocation2 + $0x81] sm:$0xff] %vm399_vm0, %v454_v48 }
  0x2c   : > { %492 = vst.msk [vmem:[#allocation2 + $0xc1] sm:$0xff] %vm399_vm0, %v459_v50 }
  0x2d   : > { %372 = vst.msk [vmem:[#allocation2 + $0xd8] sm:$0x1] %vm362_vm3, %v7942_v31 }
  0x2e   : > { %373 = vst.msk [vmem:[#allocation2 + $0xf0] sm:$0x1] %vm362_vm3, %v7942_v31 }
  0x2f   : > { %374 = vst.msk [vmem:[#allocation2 + $0x108] sm:$0x1] %vm362_vm3, %v7942_v31 }
  0x30   : > { %375 = vst.msk [vmem:[#allocation2 + $0x120] sm:$0x1] %vm362_vm3, %v7942_v31 }
  0x31   : > { %600 = vrot.lane.b32.xlu1 %v523_v12, %s5089_s15  ;;  %598 = vrot.lane.b32.xlu0 %v522_v13, %s5089_s15  ;;  %491 = vst.msk [vmem:[#allocation2 + $0xb1] sm:$0xff] %vm399_vm0, %v458_v53 }
  0x32   : > { %602 = vrot.lane.b32.xlu2 %v524_v14, %s5089_s15  ;;  %490 = vst.msk [vmem:[#allocation2 + $0xa9] sm:$0xff] %vm399_vm0, %v457_v55 }
  0x33   : > { %495 = vst.msk [vmem:[#allocation2 + $0xe1] sm:$0xff] %vm399_vm0, %v462_v56  ;;  %v703_v56 = vld [vmem:[#allocation2] sm:$0xff] }
  0x34   : > { %376 = vst.msk [vmem:[#allocation2 + $0x138] sm:$0x1] %vm362_vm3, %v7942_v31 }
  0x35   : > { %377 = vst.msk [vmem:[#allocation2 + $0x150] sm:$0x1] %vm362_vm3, %v7942_v31 }
  0x36   : > { %494 = vst.msk [vmem:[#allocation2 + $0xd9] sm:$0xff] %vm399_vm0, %v461_v61 }
  0x37   : > { %493 = vst.msk [vmem:[#allocation2 + $0xc9] sm:$0xff] %vm399_vm0, %v460_v63 }
  0x38   : > { %498 = vst.msk [vmem:[#allocation2 + $0x109] sm:$0xff] %vm399_vm0, %v465_v0 }
  0x39   : > { %606 = vrot.lane.b32.xlu1 %v526_v15, %s5089_s15  ;;  %604 = vrot.lane.b32.xlu0 %v525_v16, %s5089_s15  ;;  %378 = vst.msk [vmem:[#allocation2 + $0x168] sm:$0x1] %vm362_vm3, %v7942_v31  ;;  %v467_v15 = vld [vmem:[%s5225_s18 + $0xb0] sm:$0xff] }
  0x3a   : > { %608 = vrot.lane.b32.xlu2 %v527_v17, %s5089_s15  ;;  %379 = vst.msk [vmem:[#allocation2 + $0x180] sm:$0x1] %vm362_vm3, %v7942_v31  ;;  %v466_v17 = vld [vmem:[%s5225_s18 + $0xa8] sm:$0xff] }
  0x3b   : > { %497 = vst.msk [vmem:[#allocation2 + $0xf9] sm:$0xff] %vm399_vm0, %v464_v6 }
  0x3c   : > { %496 = vst.msk [vmem:[#allocation2 + $0xf1] sm:$0xff] %vm399_vm0, %v463_v8 }
  0x3d   : > { %501 = vst.msk [vmem:[#allocation2 + $0x129] sm:$0xff] %vm399_vm0, %v468_v9 }
  0x3e   : > { %380 = vst.msk [vmem:[#allocation2 + $0x198] sm:$0x1] %vm362_vm3, %v7942_v31 }
  0x3f   : > { %382 = vst.msk [vmem:[#allocation2 + $0x29] sm:$0x1] %vm362_vm3, %v7942_v31 }
  0x40   : > { %500 = vst.msk [vmem:[#allocation2 + $0x121] sm:$0xff] %vm399_vm0, %v467_v15 }
  0x41   : > { %612 = vrot.lane.b32.xlu1 %v529_v18, %s5089_s15  ;;  %610 = vrot.lane.b32.xlu0 %v528_v19, %s5089_s15  ;;  %v471_v18 = vld [vmem:[%s5225_s18 + $0xd0] sm:$0xff]  ;;  %499 = vst.msk [vmem:[#allocation2 + $0x111] sm:$0xff] %vm399_vm0, %v466_v17 }
  0x42   : > { %614 = vrot.lane.b32.xlu2 %v530_v20, %s5089_s15  ;;  %504 = vst.msk [vmem:[#allocation2 + $0x151] sm:$0xff] %vm399_vm0, %v471_v18  ;;  %v476_v18 = vld [vmem:[%s5225_s18 + $0xf8] sm:$0xff] }
  0x43   : > { %383 = vst.msk [vmem:[#allocation2 + $0x41] sm:$0x1] %vm362_vm3, %v7942_v31 }
  0x44   : > { %384 = vst.msk [vmem:[#allocation2 + $0x59] sm:$0x1] %vm362_vm3, %v7942_v31 }
  0x45   : > { %503 = vst.msk [vmem:[#allocation2 + $0x141] sm:$0xff] %vm399_vm0, %v470_v24 }
  0x46   : > { %385 = vst.msk [vmem:[#allocation2 + $0x71] sm:$0x1] %vm362_vm3, %v7942_v31 }
  0x47   : > { %386 = vst.msk [vmem:[#allocation2 + $0x89] sm:$0x1] %vm362_vm3, %v7942_v31 }
  0x48   : > { %505 = vst.msk [vmem:[#allocation2 + $0x159] sm:$0xff] %vm399_vm0, %v472_v34 }
  0x49   : > { %618 = vrot.lane.b32.xlu1 %v532_v21, %s5089_s15  ;;  %616 = vrot.lane.b32.xlu0 %v531_v22, %s5089_s15  ;;  %387 = vst.msk [vmem:[#allocation2 + $0xa1] sm:$0x1] %vm362_vm3, %v7942_v31 }
  0x4a   : > { %620 = vrot.lane.b32.xlu2 %v533_v23, %s5089_s15  ;;  %388 = vst.msk [vmem:[#allocation2 + $0xb9] sm:$0x1] %vm362_vm3, %v7942_v31 }
  0x4b   : > { %389 = vst.msk [vmem:[#allocation2 + $0xd1] sm:$0x1] %vm362_vm3, %v7942_v31 }
  0x4c   : > { %390 = vst.msk [vmem:[#allocation2 + $0xe9] sm:$0x1] %vm362_vm3, %v7942_v31 }
  0x4d   : > { %391 = vst.msk [vmem:[#allocation2 + $0x101] sm:$0x1] %vm362_vm3, %v7942_v31 }
  0x4e   : > { %392 = vst.msk [vmem:[#allocation2 + $0x119] sm:$0x1] %vm362_vm3, %v7942_v31 }
  0x4f   : > { %393 = vst.msk [vmem:[#allocation2 + $0x131] sm:$0x1] %vm362_vm3, %v7942_v31 }
  0x50   : > { %394 = vst.msk [vmem:[#allocation2 + $0x149] sm:$0x1] %vm362_vm3, %v7942_v31 }
  0x51   : > { %624 = vrot.lane.b32.xlu1 %v535_v25, %s5089_s15  ;;  %622 = vrot.lane.b32.xlu0 %v534_v26, %s5089_s15  ;;  %v469_v26 = vld [vmem:[%s5225_s18 + $0xc0] sm:$0xff]  ;;  %395 = vst.msk [vmem:[#allocation2 + $0x161] sm:$0x1] %vm362_vm3, %v7942_v31 }
  0x52   : > { %626 = vrot.lane.b32.xlu2 %v536_v27, %s5089_s15  ;;  %v474_v27 = vld [vmem:[%s5225_s18 + $0xe8] sm:$0xff]  ;;  %502 = vst.msk [vmem:[#allocation2 + $0x139] sm:$0xff] %vm399_vm0, %v469_v26 }
  0x53   : > { %507 = vst.msk [vmem:[#allocation2 + $0x171] sm:$0xff] %vm399_vm0, %v474_v27 }
  0x54   : > { %396 = vst.msk [vmem:[#allocation2 + $0x179] sm:$0x1] %vm362_vm3, %v7942_v31 }
  0x55   : > { %397 = vst.msk [vmem:[#allocation2 + $0x191] sm:$0x1] %vm362_vm3, %v7942_v31 }
  0x56   : > { %398 = vst.msk [vmem:[#allocation2 + $0x1a9] sm:$0x1] %vm362_vm3, %v7942_v31  ;;  %vm3126_vm3 = vcmask 195712  }
  0x57   : > { %735 = vst.msk [vmem:[#allocation4] sm:$0xff] %vm353_vm1, %v703_v56 }
  0x58   : > { %509 = vst.msk [vmem:[#allocation2 + $0x189] sm:$0xff] %vm399_vm0, %v476_v18 }
  0x59   : > { %628 = vrot.lane.b32.xlu0 %v537_v28, %s5089_s15  ;;  %630 = vrot.lane.b32.xlu1 %v538_v29, %s5089_s15 }
  0x5a   : > { %632 = vrot.lane.b32.xlu2 %v539_v30, %s5089_s15 }
  0x61   : > { %634 = vrot.lane.b32.xlu0 %v540_v32, %s5089_s15  ;;  %636 = vrot.lane.b32.xlu1 %v541_v35, %s5089_s15 }
  0x62   : > { %831 = vrot.lane.b32.xlu2 %v767_v40, %s5091_s19 }
  0x69   : > { %833 = vrot.lane.b32.xlu0 %v768_v36, %s5091_s19  ;;  %v473_v36 = vld [vmem:[%s5225_s18 + $0xe0] sm:$0xff] }
  0x6a   : > { %506 = vst.msk [vmem:[#allocation2 + $0x169] sm:$0xff] %vm399_vm0, %v473_v36 }
  0x6c   : > { %v583_v41 = vpop.permute.xlu2 %582 }
  0x6d   : > { %675 = vst.msk [vmem:[#allocation2 + $0x49] sm:$0xff] %vm670_vm4, %v583_v41 }
  0x74   : > { %v585_v45 = vpop.permute.xlu2 %584  ;;  %v5368_v11 = vld [vmem:[#allocation2 + $0x49] sm:$0xff] }
  0x75   : > { %676 = vst.msk [vmem:[#allocation2 + $0x51] sm:$0xff] %vm670_vm4, %v585_v45 }
  0x7c   : > { %v591_v49 = vpop.permute.xlu2 %590  ;;  %v774_v1 = vld [vmem:[#allocation2 + $0x51] sm:$0xff] }
  0x7d   : > { %679 = vst.msk [vmem:[#allocation2 + $0x79] sm:$0xff] %vm670_vm4, %v591_v49  ;;  %v5492_v49 = vld [vmem:[#allocation2 + $0x48] sm:$0xff] }
  0x7e   : > { %741 = vst.msk [vmem:[#allocation4 + $0x30] sm:$0xff] %vm353_vm1, %v5492_v49 }
  0x83   : > { %v579_v51 = vpop.permute.xlu1 %578  ;;  %v575_v52 = vpop.permute.xlu0 %574 }
  0x84   : > { %673 = vst.msk [vmem:[#allocation2 + $0x31] sm:$0xff] %vm670_vm4, %v579_v51  ;;  %v597_v54 = vpop.permute.xlu2 %596  ;;  %v5365_v10 = vld [vmem:[#allocation2 + $0x79] sm:$0xff] }
  0x85   : > { %671 = vst.msk [vmem:[#allocation2 + $0x19] sm:$0xff] %vm670_vm4, %v575_v52  ;;  %v5549_v6 = vld [vmem:[#allocation2 + $0x78] sm:$0xff] }
  0x86   : > { %682 = vst.msk [vmem:[#allocation2 + $0x99] sm:$0xff] %vm670_vm4, %v597_v54 }
  0x87   : > { %745 = vst.msk [vmem:[#allocation4 + $0x50] sm:$0xff] %vm353_vm1, %v5549_v6 }
  0x8b   : > { %v581_v57 = vpop.permute.xlu1 %580  ;;  %v577_v58 = vpop.permute.xlu0 %576  ;;  %v771_v59 = vld [vmem:[#allocation2 + $0x31] sm:$0xff] }
  0x8c   : > { %674 = vst.msk [vmem:[#allocation2 + $0x39] sm:$0xff] %vm670_vm4, %v581_v57  ;;  %839 = vrot.lane.b32.xlu0 %v771_v59, %s5091_s19  ;;  %v769_v60 = vld [vmem:[#allocation2 + $0x19] sm:$0xff]  ;;  %v603_v62 = vpop.permute.xlu2 %602  ;;  %v5509_v55 = vld [vmem:[#allocation2 + $0x30] sm:$0xff] }
  0x8d   : > { %672 = vst.msk [vmem:[#allocation2 + $0x21] sm:$0xff] %vm670_vm4, %v577_v58  ;;  %835 = vrot.lane.b32.xlu1 %v769_v60, %s5091_s19  ;;  %v5390_v19 = vld [vmem:[#allocation2 + $0x99] sm:$0xff]  ;;  %v5524_v60 = vld [vmem:[#allocation2 + $0x50] sm:$0xff] }
  0x8e   : > { %685 = vst.msk [vmem:[#allocation2 + $0xc1] sm:$0xff] %vm670_vm4, %v603_v62  ;;  %v5521_v59 = vld [vmem:[#allocation2 + $0x18] sm:$0xff] }
  0x8f   : > { %739 = vst.msk [vmem:[#allocation4 + $0x20] sm:$0xff] %vm353_vm1, %v5509_v55 }
  0x90   : > { %737 = vst.msk [vmem:[#allocation4 + $0x10] sm:$0xff] %vm353_vm1, %v5521_v59 }
  0x91   : > { %742 = vst.msk [vmem:[#allocation4 + $0x38] sm:$0xff] %vm353_vm1, %v5524_v60 }
  0x93   : > { %v589_v2 = vpop.permute.xlu1 %588  ;;  %v587_v3 = vpop.permute.xlu0 %586  ;;  %v5346_v4 = vld [vmem:[#allocation2 + $0x39] sm:$0xff] }
  0x94   : > { %678 = vst.msk [vmem:[#allocation2 + $0x69] sm:$0xff] %vm670_vm4, %v589_v2  ;;  %845 = vrot.lane.b32.xlu0 %v774_v1, %s5091_s19  ;;  %v5352_v5 = vld [vmem:[#allocation2 + $0x21] sm:$0xff]  ;;  %v609_v7 = vpop.permute.xlu2 %608  ;;  %v5541_v2 = vld [vmem:[#allocation2 + $0x38] sm:$0xff] }
  0x95   : > { %677 = vst.msk [vmem:[#allocation2 + $0x61] sm:$0xff] %vm670_vm4, %v587_v3  ;;  %837 = vrot.lane.b32.xlu2 %v5352_v5, %s5091_s19  ;;  %841 = vrot.lane.b32.xlu1 %v5346_v4, %s5091_s19  ;;  %v5415_v28 = vld [vmem:[#allocation2 + $0xc1] sm:$0xff]  ;;  %v475_v3 = vld [vmem:[%s5225_s18 + $0xf0] sm:$0xff] }
  0x96   : > { %688 = vst.msk [vmem:[#allocation2 + $0xe1] sm:$0xff] %vm670_vm4, %v609_v7  ;;  %v5488_v48 = vld [vmem:[#allocation2 + $0x20] sm:$0xff] }
  0x97   : > { %738 = vst.msk [vmem:[#allocation4 + $0x18] sm:$0xff] %vm353_vm1, %v5488_v48  ;;  %v5603_v34 = vld [vmem:[#allocation2 + $0x1a] sm:$0xff] }
  0x98   : > { %508 = vst.msk [vmem:[#allocation2 + $0x181] sm:$0xff] %vm399_vm0, %v475_v3  ;;  %v5656_v3 = vld [vmem:[#allocation2 + $0x4a] sm:$0xff] }
  0x99   : > { %740 = vst.msk [vmem:[#allocation4 + $0x28] sm:$0xff] %vm353_vm1, %v5541_v2 }
  0x9a   : > { %8028 = vst [vmem:[#allocation6_spill] sm:$0xff] %v5603_v34 }
  0x9b   : > { %v595_v12 = vpop.permute.xlu1 %594  ;;  %v593_v13 = vpop.permute.xlu0 %592  ;;  %v5393_v20 = vld [vmem:[#allocation2 + $0x69] sm:$0xff]  ;;  %8033 = vst [vmem:[#allocation11_spill] sm:$0xff] %v5656_v3 }
  0x9c   : > { %681 = vst.msk [vmem:[#allocation2 + $0x91] sm:$0xff] %vm670_vm4, %v595_v12  ;;  %851 = vrot.lane.b32.xlu0 %v5365_v10, %s5091_s19  ;;  %v5377_v14 = vld [vmem:[#allocation2 + $0x61] sm:$0xff]  ;;  %v615_v16 = vpop.permute.xlu2 %614 }
  0x9d   : > { %680 = vst.msk [vmem:[#allocation2 + $0x81] sm:$0xff] %vm670_vm4, %v593_v13  ;;  %843 = vrot.lane.b32.xlu2 %v5368_v11, %s5091_s19  ;;  %847 = vrot.lane.b32.xlu1 %v5377_v14, %s5091_s19  ;;  %v5439_v37 = vld [vmem:[#allocation2 + $0xe1] sm:$0xff] }
  0x9e   : > { %691 = vst.msk [vmem:[#allocation2 + $0x109] sm:$0xff] %vm670_vm4, %v615_v16  ;;  %v5517_v57 = vld [vmem:[#allocation2 + $0x68] sm:$0xff]  ;;  %v5556_v8 = vld [vmem:[#allocation2 + $0x60] sm:$0xff] }
  0x9f   : > { %744 = vst.msk [vmem:[#allocation4 + $0x48] sm:$0xff] %vm353_vm1, %v5517_v57 }
  0xa0   : > { %743 = vst.msk [vmem:[#allocation4 + $0x40] sm:$0xff] %vm353_vm1, %v5556_v8 }
  0xa3   : > { %v601_v21 = vpop.permute.xlu1 %600  ;;  %v599_v22 = vpop.permute.xlu0 %598  ;;  %v5418_v29 = vld [vmem:[#allocation2 + $0x91] sm:$0xff] }
  0xa4   : > { %684 = vst.msk [vmem:[#allocation2 + $0xb1] sm:$0xff] %vm670_vm4, %v601_v21  ;;  %857 = vrot.lane.b32.xlu0 %v5390_v19, %s5091_s19  ;;  %v5402_v23 = vld [vmem:[#allocation2 + $0x81] sm:$0xff]  ;;  %v621_v25 = vpop.permute.xlu2 %620  ;;  %v5568_v13 = vld [vmem:[#allocation2 + $0x98] sm:$0xff] }
  0xa5   : > { %683 = vst.msk [vmem:[#allocation2 + $0xa9] sm:$0xff] %vm670_vm4, %v599_v22  ;;  %849 = vrot.lane.b32.xlu2 %v5393_v20, %s5091_s19  ;;  %853 = vrot.lane.b32.xlu1 %v5402_v23, %s5091_s19  ;;  %v5464_v43 = vld [vmem:[#allocation2 + $0x109] sm:$0xff]  ;;  %v5570_v15 = vld [vmem:[#allocation2 + $0x80] sm:$0xff] }
  0xa6   : > { %694 = vst.msk [vmem:[#allocation2 + $0x129] sm:$0xff] %vm670_vm4, %v621_v25  ;;  %v704_v21 = vld [vmem:[#allocation2 + $0x8] sm:$0xff]  ;;  %v5591_v25 = vld [vmem:[#allocation2 + $0xc0] sm:$0xff] }
  0xa7   : > { %748 = vst.msk [vmem:[#allocation4 + $0x68] sm:$0xff] %vm353_vm1, %v5568_v13 }
  0xa8   : > { %746 = vst.msk [vmem:[#allocation4 + $0x58] sm:$0xff] %vm353_vm1, %v5570_v15 }
  0xa9   : > { %736 = vst.msk [vmem:[#allocation4 + $0x8] sm:$0xff] %vm353_vm1, %v704_v21 }
  0xaa   : > { %751 = vst.msk [vmem:[#allocation4 + $0x80] sm:$0xff] %vm353_vm1, %v5591_v25 }
  0xab   : > { %v607_v30 = vpop.permute.xlu1 %606  ;;  %v605_v32 = vpop.permute.xlu0 %604  ;;  %v5443_v38 = vld [vmem:[#allocation2 + $0xb1] sm:$0xff] }
  0xac   : > { %687 = vst.msk [vmem:[#allocation2 + $0xd9] sm:$0xff] %vm670_vm4, %v607_v30  ;;  %863 = vrot.lane.b32.xlu0 %v5415_v28, %s5091_s19  ;;  %v5427_v33 = vld [vmem:[#allocation2 + $0xa9] sm:$0xff]  ;;  %v627_v35 = vpop.permute.xlu2 %626 }
  0xad   : > { %686 = vst.msk [vmem:[#allocation2 + $0xc9] sm:$0xff] %vm670_vm4, %v605_v32  ;;  %855 = vrot.lane.b32.xlu2 %v5418_v29, %s5091_s19  ;;  %859 = vrot.lane.b32.xlu1 %v5427_v33, %s5091_s19  ;;  %v5494_v50 = vld [vmem:[#allocation2 + $0x129] sm:$0xff] }
  0xae   : > { %697 = vst.msk [vmem:[#allocation2 + $0x151] sm:$0xff] %vm670_vm4, %v627_v35  ;;  %v5552_v7 = vld [vmem:[#allocation2 + $0xb0] sm:$0xff]  ;;  %v5587_v22 = vld [vmem:[#allocation2 + $0xa8] sm:$0xff] }
  0xaf   : > { %750 = vst.msk [vmem:[#allocation4 + $0x78] sm:$0xff] %vm353_vm1, %v5552_v7  ;;  %v960_v30 = vld [vmem:[#allocation2 + $0x2] sm:$0xff] }
  0xb0   : > { %749 = vst.msk [vmem:[#allocation4 + $0x70] sm:$0xff] %vm353_vm1, %v5587_v22 }
  0xb3   : > { %v613_v39 = vpop.permute.xlu1 %612  ;;  %v611_v40 = vpop.permute.xlu0 %610  ;;  %v5468_v44 = vld [vmem:[#allocation2 + $0xd9] sm:$0xff] }
  0xb4   : > { %690 = vst.msk [vmem:[#allocation2 + $0xf9] sm:$0xff] %vm670_vm4, %v613_v39  ;;  %869 = vrot.lane.b32.xlu0 %v5439_v37, %s5091_s19  ;;  %v5452_v41 = vld [vmem:[#allocation2 + $0xc9] sm:$0xff]  ;;  %v633_v42 = vpop.permute.xlu2 %632  ;;  %v5665_v18 = vld [vmem:[#allocation2 + $0xd8] sm:$0xff] }
  0xb5   : > { %689 = vst.msk [vmem:[#allocation2 + $0xf1] sm:$0xff] %vm670_vm4, %v611_v40  ;;  %861 = vrot.lane.b32.xlu2 %v5443_v38, %s5091_s19  ;;  %865 = vrot.lane.b32.xlu1 %v5452_v41, %s5091_s19  ;;  %v5526_v61 = vld [vmem:[#allocation2 + $0x151] sm:$0xff]  ;;  %v5601_v32 = vld [vmem:[#allocation2 + $0xc8] sm:$0xff] }
  0xb6   : > { %700 = vst.msk [vmem:[#allocation2 + $0x171] sm:$0xff] %vm670_vm4, %v633_v42  ;;  %v5619_v39 = vld [vmem:[#allocation2 + $0x90] sm:$0xff]  ;;  %v5623_v42 = vld [vmem:[#allocation2 + $0xe0] sm:$0xff] }
  0xb7   : > { %752 = vst.msk [vmem:[#allocation4 + $0x88] sm:$0xff] %vm353_vm1, %v5601_v32  ;;  %v961_v40 = vld [vmem:[#allocation2 + $0xa] sm:$0xff] }
  0xb8   : > { %747 = vst.msk [vmem:[#allocation4 + $0x60] sm:$0xff] %vm353_vm1, %v5619_v39  ;;  %v5690_v31 = vld [vmem:[#allocation2 + $0x150] sm:$0xff] }
  0xb9   : > { %754 = vst.msk [vmem:[#allocation4 + $0x98] sm:$0xff] %vm353_vm1, %v5623_v42 }
  0xba   : > { %753 = vst.msk [vmem:[#allocation4 + $0x90] sm:$0xff] %vm353_vm1, %v5665_v18 }
  0xbb   : > { %v619_v45 = vpop.permute.xlu1 %618  ;;  %v617_v46 = vpop.permute.xlu0 %616  ;;  %v5498_v51 = vld [vmem:[#allocation2 + $0xf9] sm:$0xff]  ;;  %763 = vst.msk [vmem:[#allocation4 + $0xe0] sm:$0xff] %vm353_vm1, %v5690_v31 }
  0xbc   : > { %693 = vst.msk [vmem:[#allocation2 + $0x121] sm:$0xff] %vm670_vm4, %v619_v45  ;;  %875 = vrot.lane.b32.xlu0 %v5464_v43, %s5091_s19  ;;  %v5477_v47 = vld [vmem:[#allocation2 + $0xf1] sm:$0xff]  ;;  %v832_v58 = vpop.permute.xlu2 %831  ;;  %v5625_v45 = vld [vmem:[#allocation2 + $0x3a] sm:$0xff] }
  0xbd   : > { %692 = vst.msk [vmem:[#allocation2 + $0x111] sm:$0xff] %vm670_vm4, %v617_v46  ;;  %867 = vrot.lane.b32.xlu2 %v5468_v44, %s5091_s19  ;;  %871 = vrot.lane.b32.xlu1 %v5477_v47, %s5091_s19  ;;  %v5560_v9 = vld [vmem:[#allocation2 + $0x171] sm:$0xff] }
  0xbe   : > { %928 = vst.msk [vmem:[#allocation4] sm:$0xff] %vm927_vm5, %v832_v58  ;;  %v5593_v26 = vld [vmem:[#allocation2 + $0xf8] sm:$0xff]  ;;  %v5607_v36 = vld [vmem:[#allocation2 + $0xf0] sm:$0xff] }
  0xbf   : > { %756 = vst.msk [vmem:[#allocation4 + $0xa8] sm:$0xff] %vm353_vm1, %v5593_v26 }
  0xc0   : > { %755 = vst.msk [vmem:[#allocation4 + $0xa0] sm:$0xff] %vm353_vm1, %v5607_v36 }
  0xc1   : > { %8029 = vst [vmem:[#allocation7_spill] sm:$0xff] %v5625_v45 }
  0xc3   : > { %v625_v52 = vpop.permute.xlu1 %624  ;;  %v623_v53 = vpop.permute.xlu0 %622  ;;  %v5530_v62 = vld [vmem:[#allocation2 + $0x121] sm:$0xff] }
  0xc4   : > { %696 = vst.msk [vmem:[#allocation2 + $0x141] sm:$0xff] %vm670_vm4, %v625_v52  ;;  %881 = vrot.lane.b32.xlu0 %v5494_v50, %s5091_s19  ;;  %v5507_v54 = vld [vmem:[#allocation2 + $0x111] sm:$0xff]  ;;  %v5633_v52 = vld [vmem:[#allocation2 + $0x22] sm:$0xff] }
  0xc5   : > { %695 = vst.msk [vmem:[#allocation2 + $0x139] sm:$0xff] %vm670_vm4, %v623_v53  ;;  %873 = vrot.lane.b32.xlu2 %v5498_v51, %s5091_s19  ;;  %877 = vrot.lane.b32.xlu1 %v5507_v54, %s5091_s19  ;;  %v5629_v46 = vld [vmem:[#allocation2 + $0x110] sm:$0xff]  ;;  %v5640_v53 = vld [vmem:[#allocation2 + $0x108] sm:$0xff] }
  0xc6   : > { %8030 = vst [vmem:[#allocation8_spill] sm:$0xff] %v5633_v52  ;;  %v5669_v21 = vld [vmem:[#allocation2 + $0x128] sm:$0xff] }
  0xc7   : > { %758 = vst.msk [vmem:[#allocation4 + $0xb8] sm:$0xff] %vm353_vm1, %v5629_v46 }
  0xc8   : > { %757 = vst.msk [vmem:[#allocation4 + $0xb0] sm:$0xff] %vm353_vm1, %v5640_v53 }
  0xc9   : > { %760 = vst.msk [vmem:[#allocation4 + $0xc8] sm:$0xff] %vm353_vm1, %v5669_v21 }
  0xcb   : > { %v629_v63 = vpop.permute.xlu0 %628  ;;  %v631_v0 = vpop.permute.xlu1 %630  ;;  %v5564_v12 = vld [vmem:[#allocation2 + $0x141] sm:$0xff] }
  0xcc   : > { %698 = vst.msk [vmem:[#allocation2 + $0x159] sm:$0xff] %vm670_vm4, %v629_v63  ;;  %887 = vrot.lane.b32.xlu0 %v5526_v61, %s5091_s19  ;;  %v5539_v1 = vld [vmem:[#allocation2 + $0x139] sm:$0xff]  ;;  %v5648_v63 = vld [vmem:[#allocation2 + $0x62] sm:$0xff] }
  0xcd   : > { %879 = vrot.lane.b32.xlu2 %v5530_v62, %s5091_s19  ;;  %883 = vrot.lane.b32.xlu1 %v5539_v1, %s5091_s19  ;;  %699 = vst.msk [vmem:[#allocation2 + $0x169] sm:$0xff] %vm670_vm4, %v631_v0  ;;  %v5642_v56 = vld [vmem:[#allocation2 + $0x140] sm:$0xff]  ;;  %v5646_v58 = vld [vmem:[#allocation2 + $0x138] sm:$0xff] }
  0xce   : > { %8031 = vst [vmem:[#allocation9_spill] sm:$0xff] %v5648_v63  ;;  %v5652_v0 = vld [vmem:[#allocation2 + $0x32] sm:$0xff] }
  0xcf   : > { %762 = vst.msk [vmem:[#allocation4 + $0xd8] sm:$0xff] %vm353_vm1, %v5642_v56 }
  0xd0   : > { %8032 = vst [vmem:[#allocation10_spill] sm:$0xff] %v5652_v0 }
  0xd1   : > { %761 = vst.msk [vmem:[#allocation4 + $0xd0] sm:$0xff] %vm353_vm1, %v5646_v58 }
  0xd3   : > { %v5572_v16 = vld [vmem:[#allocation2 + $0x159] sm:$0xff]  ;;  %v635_v17 = vpop.permute.xlu0 %634  ;;  %v637_v24 = vpop.permute.xlu1 %636 }
  0xd4   : > { %893 = vrot.lane.b32.xlu0 %v5560_v9, %s5091_s19  ;;  %701 = vst.msk [vmem:[#allocation2 + $0x181] sm:$0xff] %vm670_vm4, %v635_v17  ;;  %v5597_v27 = vld [vmem:[#allocation2 + $0x169] sm:$0xff] }
  0xd5   : > { %885 = vrot.lane.b32.xlu2 %v5564_v12, %s5091_s19  ;;  %889 = vrot.lane.b32.xlu1 %v5572_v16, %s5091_s19  ;;  %702 = vst.msk [vmem:[#allocation2 + $0x189] sm:$0xff] %vm670_vm4, %v637_v24  ;;  %v5671_v24 = vld [vmem:[#allocation2 + $0x82] sm:$0xff]  ;;  %vm3319_vm4 = vcmask 261312  }
  0xd6   : > { %8034 = vst [vmem:[#allocation12_spill] sm:$0xff] %v5671_v24 }
  0xdb   : > { %v834_v35 = vpop.permute.xlu0 %833 }
  0xdc   : > { %1028 = vrot.lane.b32.xlu0 %v5603_v34, %s5092_s20  ;;  %929 = vst.msk [vmem:[#allocation4 + $0x8] sm:$0xff] %vm927_vm5, %v834_v35  ;;  %v5677_v35 = vld [vmem:[#allocation2 + $0x52] sm:$0xff] }
  0xdd   : > { %891 = vrot.lane.b32.xlu2 %v5597_v27, %s5091_s19  ;;  %1024 = vrot.lane.b32.xlu1 %v960_v30, %s5092_s20  ;;  %v5675_v30 = vld [vmem:[#allocation2 + $0x158] sm:$0xff]  ;;  %8035 = vst [vmem:[#allocation13_spill] sm:$0xff] %v5677_v35 }
  0xde   : > { %764 = vst.msk [vmem:[#allocation4 + $0xe8] sm:$0xff] %vm353_vm1, %v5675_v30  ;;  %v5732_v34 = vld [vmem:[#allocation2 + $0xf2] sm:$0xff] }
  0xdf   : > { %8043 = vst [vmem:[#allocation21_spill] sm:$0xff] %v5732_v34 }
  0xe4   : > { %1034 = vrot.lane.b32.xlu0 %v5625_v45, %s5092_s20 }
  0xe5   : > { %1026 = vrot.lane.b32.xlu2 %v961_v40, %s5092_s20  ;;  %1030 = vrot.lane.b32.xlu1 %v5633_v52, %s5092_s20  ;;  %v5681_v40 = vld [vmem:[#allocation2 + $0x6a] sm:$0xff]  ;;  %v5709_v52 = vld [vmem:[#allocation2 + $0x120] sm:$0xff] }
  0xe6   : > { %8036 = vst [vmem:[#allocation14_spill] sm:$0xff] %v5681_v40 }
  0xe7   : > { %759 = vst.msk [vmem:[#allocation4 + $0xc0] sm:$0xff] %vm353_vm1, %v5709_v52 }
  0xec   : > { %1040 = vrot.lane.b32.xlu0 %v5648_v63, %s5092_s20  ;;  %v5696_v63 = vld [vmem:[#allocation2 + $0x7a] sm:$0xff] }
  0xed   : > { %1032 = vrot.lane.b32.xlu2 %v5652_v0, %s5092_s20  ;;  %1036 = vrot.lane.b32.xlu1 %v5656_v3, %s5092_s20  ;;  %8038 = vst [vmem:[#allocation16_spill] sm:$0xff] %v5696_v63  ;;  %v5700_v3 = vld [vmem:[#allocation2 + $0x92] sm:$0xff]  ;;  %v5766_v0 = vld [vmem:[#allocation2 + $0x13a] sm:$0xff] }
  0xee   : > { %8039 = vst [vmem:[#allocation17_spill] sm:$0xff] %v5700_v3 }
  0xef   : > { %v838_v17 = vpop.permute.xlu2 %837  ;;  %8049 = vst [vmem:[#allocation27_spill] sm:$0xff] %v5766_v0 }
  0xf0   : > { %931 = vst.msk [vmem:[#allocation4 + $0x18] sm:$0xff] %vm927_vm5, %v838_v17 }
  0xf4   : > { %1046 = vrot.lane.b32.xlu0 %v5671_v24, %s5092_s20  ;;  %v5694_v24 = vld [vmem:[#allocation2 + $0xaa] sm:$0xff] }
  0xf5   : > { %1038 = vrot.lane.b32.xlu2 %v5677_v35, %s5092_s20  ;;  %1042 = vrot.lane.b32.xlu1 %v5681_v40, %s5092_s20  ;;  %8037 = vst [vmem:[#allocation15_spill] sm:$0xff] %v5694_v24 }
  0xf7   : > { %v844_v17 = vpop.permute.xlu2 %843 }
  0xf8   : > { %934 = vst.msk [vmem:[#allocation4 + $0x30] sm:$0xff] %vm927_vm5, %v844_v17 }
  0xfc   : > { %1052 = vrot.lane.b32.xlu0 %v5694_v24, %s5092_s20  ;;  %v5713_v24 = vld [vmem:[#allocation2 + $0x170] sm:$0xff] }
  0xfd   : > { %1044 = vrot.lane.b32.xlu2 %v5696_v63, %s5092_s20  ;;  %1048 = vrot.lane.b32.xlu1 %v5700_v3, %s5092_s20  ;;  %v5715_v63 = vld [vmem:[#allocation2 + $0xca] sm:$0xff]  ;;  %766 = vst.msk [vmem:[#allocation4 + $0xf8] sm:$0xff] %vm353_vm1, %v5713_v24  ;;  %v5719_v3 = vld [vmem:[#allocation2 + $0x9a] sm:$0xff] }
  0xfe   : > { %v840_v17 = vpop.permute.xlu0 %839  ;;  %8040 = vst [vmem:[#allocation18_spill] sm:$0xff] %v5715_v63 }
  0xff   : > { %932 = vst.msk [vmem:[#allocation4 + $0x20] sm:$0xff] %vm927_vm5, %v840_v17  ;;  %v850_v40 = vpop.permute.xlu2 %849  ;;  %v836_v45 = vpop.permute.xlu1 %835 }
 0x100   : > { %937 = vst.msk [vmem:[#allocation4 + $0x48] sm:$0xff] %vm927_vm5, %v850_v40  ;;  %v5723_v40 = vld [vmem:[#allocation2 + $0xb2] sm:$0xff] }
 0x101   : > { %930 = vst.msk [vmem:[#allocation4 + $0x10] sm:$0xff] %vm927_vm5, %v836_v45 }
 0x102   : > { %8041 = vst [vmem:[#allocation19_spill] sm:$0xff] %v5719_v3 }
 0x103   : > { %8042 = vst [vmem:[#allocation20_spill] sm:$0xff] %v5723_v40 }
 0x104   : > { %1058 = vrot.lane.b32.xlu0 %v5715_v63, %s5092_s20  ;;  %v5734_v63 = vld [vmem:[#allocation2 + $0xc2] sm:$0xff] }
 0x105   : > { %1050 = vrot.lane.b32.xlu2 %v5719_v3, %s5092_s20  ;;  %1054 = vrot.lane.b32.xlu1 %v5723_v40, %s5092_s20  ;;  %8044 = vst [vmem:[#allocation22_spill] sm:$0xff] %v5734_v63  ;;  %v5738_v3 = vld [vmem:[#allocation2 + $0xda] sm:$0xff]  ;;  %v5747_v40 = vld [vmem:[#allocation2 + $0x168] sm:$0xff] }
 0x106   : > { %v846_v45 = vpop.permute.xlu0 %845  ;;  %8045 = vst [vmem:[#allocation23_spill] sm:$0xff] %v5738_v3 }
 0x107   : > { %935 = vst.msk [vmem:[#allocation4 + $0x38] sm:$0xff] %vm927_vm5, %v846_v45  ;;  %v856_v17 = vpop.permute.xlu2 %855  ;;  %v842_v35 = vpop.permute.xlu1 %841 }
 0x108   : > { %940 = vst.msk [vmem:[#allocation4 + $0x60] sm:$0xff] %vm927_vm5, %v856_v17 }
 0x109   : > { %933 = vst.msk [vmem:[#allocation4 + $0x28] sm:$0xff] %vm927_vm5, %v842_v35 }
 0x10a   : > { %765 = vst.msk [vmem:[#allocation4 + $0xf0] sm:$0xff] %vm353_vm1, %v5747_v40  ;;  %vm408_vm1 = vcmask 57344  }
 0x10c   : > { %1064 = vrot.lane.b32.xlu0 %v5732_v34, %s5092_s20  ;;  %v5751_v34 = vld [vmem:[#allocation2 + $0x112] sm:$0xff] }
 0x10d   : > { %1056 = vrot.lane.b32.xlu2 %v5734_v63, %s5092_s20  ;;  %1060 = vrot.lane.b32.xlu1 %v5738_v3, %s5092_s20  ;;  %8046 = vst [vmem:[#allocation24_spill] sm:$0xff] %v5751_v34  ;;  %v5753_v63 = vld [vmem:[#allocation2 + $0xe2] sm:$0xff]  ;;  %v5757_v3 = vld [vmem:[#allocation2 + $0xfa] sm:$0xff] }
 0x10e   : > { %v852_v45 = vpop.permute.xlu0 %851  ;;  %8047 = vst [vmem:[#allocation25_spill] sm:$0xff] %v5753_v63 }
 0x10f   : > { %938 = vst.msk [vmem:[#allocation4 + $0x50] sm:$0xff] %vm927_vm5, %v852_v45  ;;  %v862_v17 = vpop.permute.xlu2 %861  ;;  %v848_v35 = vpop.permute.xlu1 %847 }
 0x110   : > { %943 = vst.msk [vmem:[#allocation4 + $0x78] sm:$0xff] %vm927_vm5, %v862_v17 }
 0x111   : > { %936 = vst.msk [vmem:[#allocation4 + $0x40] sm:$0xff] %vm927_vm5, %v848_v35 }
 0x112   : > { %8048 = vst [vmem:[#allocation26_spill] sm:$0xff] %v5757_v3 }
 0x114   : > { %1070 = vrot.lane.b32.xlu0 %v5751_v34, %s5092_s20  ;;  %v5768_v34 = vld [vmem:[#allocation2 + $0x10a] sm:$0xff] }
 0x115   : > { %1062 = vrot.lane.b32.xlu2 %v5753_v63, %s5092_s20  ;;  %1066 = vrot.lane.b32.xlu1 %v5757_v3, %s5092_s20  ;;  %8050 = vst [vmem:[#allocation28_spill] sm:$0xff] %v5768_v34  ;;  %v5772_v63 = vld [vmem:[#allocation2 + $0x122] sm:$0xff]  ;;  %v5781_v3 = vld [vmem:[#allocation2 + $0x15a] sm:$0xff] }
 0x116   : > { %v858_v45 = vpop.permute.xlu0 %857  ;;  %8051 = vst [vmem:[#allocation29_spill] sm:$0xff] %v5772_v63 }
 0x117   : > { %941 = vst.msk [vmem:[#allocation4 + $0x68] sm:$0xff] %vm927_vm5, %v858_v45  ;;  %v868_v17 = vpop.permute.xlu2 %867  ;;  %v854_v35 = vpop.permute.xlu1 %853 }
 0x118   : > { %946 = vst.msk [vmem:[#allocation4 + $0x90] sm:$0xff] %vm927_vm5, %v868_v17 }
 0x119   : > { %939 = vst.msk [vmem:[#allocation4 + $0x58] sm:$0xff] %vm927_vm5, %v854_v35 }
 0x11a   : > { %8052 = vst [vmem:[#allocation30_spill] sm:$0xff] %v5781_v3 }
 0x11c   : > { %1076 = vrot.lane.b32.xlu0 %v5766_v0, %s5092_s20  ;;  %v5783_v0 = vld [vmem:[#allocation2 + $0x12a] sm:$0xff] }
 0x11d   : > { %1068 = vrot.lane.b32.xlu2 %v5768_v34, %s5092_s20  ;;  %1072 = vrot.lane.b32.xlu1 %v5772_v63, %s5092_s20  ;;  %v5787_v34 = vld [vmem:[#allocation2 + $0x142] sm:$0xff]  ;;  %v5796_v63 = vld [vmem:[#allocation2 + $0x152] sm:$0xff] }
 0x11e   : > { %v864_v45 = vpop.permute.xlu0 %863  ;;  %8053 = vst [vmem:[#allocation31_spill] sm:$0xff] %v5787_v34 }
 0x11f   : > { %944 = vst.msk [vmem:[#allocation4 + $0x80] sm:$0xff] %vm927_vm5, %v864_v45  ;;  %v874_v17 = vpop.permute.xlu2 %873  ;;  %v860_v35 = vpop.permute.xlu1 %859 }
 0x120   : > { %949 = vst.msk [vmem:[#allocation4 + $0xa8] sm:$0xff] %vm927_vm5, %v874_v17 }
 0x121   : > { %942 = vst.msk [vmem:[#allocation4 + $0x70] sm:$0xff] %vm927_vm5, %v860_v35 }
 0x124   : > { %1082 = vrot.lane.b32.xlu0 %v5781_v3, %s5092_s20  ;;  %v5800_v3 = vld [vmem:[#allocation2 + $0x16a] sm:$0xff] }
 0x125   : > { %1074 = vrot.lane.b32.xlu2 %v5783_v0, %s5092_s20  ;;  %1078 = vrot.lane.b32.xlu1 %v5787_v34, %s5092_s20  ;;  %8054 = vst [vmem:[#allocation32_spill] sm:$0xff] %v5800_v3 }
 0x126   : > { %v870_v45 = vpop.permute.xlu0 %869 }
 0x127   : > { %947 = vst.msk [vmem:[#allocation4 + $0x98] sm:$0xff] %vm927_vm5, %v870_v45  ;;  %v880_v17 = vpop.permute.xlu2 %879  ;;  %v866_v35 = vpop.permute.xlu1 %865 }
 0x128   : > { %952 = vst.msk [vmem:[#allocation4 + $0xc0] sm:$0xff] %vm927_vm5, %v880_v17 }
 0x129   : > { %945 = vst.msk [vmem:[#allocation4 + $0x88] sm:$0xff] %vm927_vm5, %v866_v35  ;;  %v5809_v35 = vld [vmem:[#allocation2 + $0x172] sm:$0xff] }
 0x12c   : > { %1217 = vrot.lane.b32.xlu0 %v5521_v59, %s5093_s21 }
 0x12d   : > { %1080 = vrot.lane.b32.xlu2 %v5796_v63, %s5092_s20  ;;  %1084 = vrot.lane.b32.xlu1 %v5800_v3, %s5092_s20 }
 0x12e   : > { %v876_v45 = vpop.permute.xlu0 %875 }
 0x12f   : > { %950 = vst.msk [vmem:[#allocation4 + $0xb0] sm:$0xff] %vm927_vm5, %v876_v45  ;;  %v886_v17 = vpop.permute.xlu2 %885  ;;  %v872_v34 = vpop.permute.xlu1 %871 }
 0x130   : > { %955 = vst.msk [vmem:[#allocation4 + $0xd8] sm:$0xff] %vm927_vm5, %v886_v17 }
 0x131   : > { %948 = vst.msk [vmem:[#allocation4 + $0xa0] sm:$0xff] %vm927_vm5, %v872_v34 }
 0x134   : > { %1223 = vrot.lane.b32.xlu0 %v5541_v2, %s5093_s21 }
 0x135   : > { %1086 = vrot.lane.b32.xlu2 %v5809_v35, %s5092_s20  ;;  %1219 = vrot.lane.b32.xlu1 %v5488_v48, %s5093_s21 }
 0x136   : > { %v882_v59 = vpop.permute.xlu0 %881 }
 0x137   : > { %953 = vst.msk [vmem:[#allocation4 + $0xc8] sm:$0xff] %vm927_vm5, %v882_v59  ;;  %v892_v45 = vpop.permute.xlu2 %891  ;;  %v878_v3 = vpop.permute.xlu1 %877 }
 0x138   : > { %958 = vst.msk [vmem:[#allocation4 + $0xf0] sm:$0xff] %vm927_vm5, %v892_v45 }
 0x139   : > { %951 = vst.msk [vmem:[#allocation4 + $0xb8] sm:$0xff] %vm927_vm5, %v878_v3 }
 0x13c   : > { %1229 = vrot.lane.b32.xlu0 %v5556_v8, %s5093_s21 }
 0x13d   : > { %1221 = vrot.lane.b32.xlu2 %v5509_v55, %s5093_s21  ;;  %1225 = vrot.lane.b32.xlu1 %v5492_v49, %s5093_s21 }
 0x13e   : > { %v888_v34 = vpop.permute.xlu0 %887 }
 0x13f   : > { %956 = vst.msk [vmem:[#allocation4 + $0xe0] sm:$0xff] %vm927_vm5, %v888_v34  ;;  %v1027_v48 = vpop.permute.xlu2 %1026  ;;  %v884_v17 = vpop.permute.xlu1 %883 }
 0x140   : > { %1122 = vst.msk [vmem:[#allocation4 + $0x8] sm:$0xff] %vm1120_vm6, %v1027_v48 }
 0x141   : > { %954 = vst.msk [vmem:[#allocation4 + $0xd0] sm:$0xff] %vm927_vm5, %v884_v17 }
 0x144   : > { %1235 = vrot.lane.b32.xlu0 %v5570_v15, %s5093_s21 }
 0x145   : > { %1227 = vrot.lane.b32.xlu2 %v5524_v60, %s5093_s21  ;;  %1231 = vrot.lane.b32.xlu1 %v5517_v57, %s5093_s21 }
 0x146   : > { %v894_v49 = vpop.permute.xlu0 %893 }
 0x147   : > { %959 = vst.msk [vmem:[#allocation4 + $0xf8] sm:$0xff] %vm927_vm5, %v894_v49  ;;  %v1033_v55 = vpop.permute.xlu2 %1032  ;;  %v890_v3 = vpop.permute.xlu1 %889 }
 0x148   : > { %1125 = vst.msk [vmem:[#allocation4 + $0x20] sm:$0xff] %vm1120_vm6, %v1033_v55 }
 0x149   : > { %957 = vst.msk [vmem:[#allocation4 + $0xe8] sm:$0xff] %vm927_vm5, %v890_v3  ;;  %vm3512_vm5 = vcmask 326912  }
 0x14c   : > { %1241 = vrot.lane.b32.xlu0 %v5587_v22, %s5093_s21 }
 0x14d   : > { %1233 = vrot.lane.b32.xlu2 %v5549_v6, %s5093_s21  ;;  %1237 = vrot.lane.b32.xlu1 %v5619_v39, %s5093_s21 }
 0x14e   : > { %v1029_v59 = vpop.permute.xlu0 %1028 }
 0x14f   : > { %v1039_v57 = vpop.permute.xlu2 %1038  ;;  %1123 = vst.msk [vmem:[#allocation4 + $0x10] sm:$0xff] %vm1120_vm6, %v1029_v59  ;;  %v1025_v45 = vpop.permute.xlu1 %1024 }
 0x150   : > { %1128 = vst.msk [vmem:[#allocation4 + $0x38] sm:$0xff] %vm1120_vm6, %v1039_v57 }
 0x151   : > { %1121 = vst.msk [vmem:[#allocation4] sm:$0xff] %vm1120_vm6, %v1025_v45 }
 0x154   : > { %1247 = vrot.lane.b32.xlu0 %v5601_v32, %s5093_s21 }
 0x155   : > { %1239 = vrot.lane.b32.xlu2 %v5568_v13, %s5093_s21  ;;  %1243 = vrot.lane.b32.xlu1 %v5552_v7, %s5093_s21 }
 0x156   : > { %v1035_v34 = vpop.permute.xlu0 %1034 }
 0x157   : > { %v1045_v39 = vpop.permute.xlu2 %1044  ;;  %1126 = vst.msk [vmem:[#allocation4 + $0x28] sm:$0xff] %vm1120_vm6, %v1035_v34  ;;  %v1031_v48 = vpop.permute.xlu1 %1030 }
 0x158   : > { %1131 = vst.msk [vmem:[#allocation4 + $0x50] sm:$0xff] %vm1120_vm6, %v1045_v39  ;;  %v5892_v39 = vld [vmem:[#allocation2 + $0x180] sm:$0xff] }
 0x159   : > { %1124 = vst.msk [vmem:[#allocation4 + $0x18] sm:$0xff] %vm1120_vm6, %v1031_v48 }
 0x15c   : > { %1253 = vrot.lane.b32.xlu0 %v5607_v36, %s5093_s21 }
 0x15d   : > { %1245 = vrot.lane.b32.xlu2 %v5591_v25, %s5093_s21  ;;  %1249 = vrot.lane.b32.xlu1 %v5665_v18, %s5093_s21 }
 0x15e   : > { %v1041_v17 = vpop.permute.xlu0 %1040 }
 0x15f   : > { %v1051_v7 = vpop.permute.xlu2 %1050  ;;  %1129 = vst.msk [vmem:[#allocation4 + $0x40] sm:$0xff] %vm1120_vm6, %v1041_v17  ;;  %v1037_v49 = vpop.permute.xlu1 %1036 }
 0x160   : > { %1134 = vst.msk [vmem:[#allocation4 + $0x68] sm:$0xff] %vm1120_vm6, %v1051_v7 }
 0x161   : > { %1127 = vst.msk [vmem:[#allocation4 + $0x30] sm:$0xff] %vm1120_vm6, %v1037_v49  ;;  %v5905_v49 = vld [vmem:[#allocation2 + $0x188] sm:$0xff] }
 0x164   : > { %1259 = vrot.lane.b32.xlu0 %v5629_v46, %s5093_s21 }
 0x165   : > { %1251 = vrot.lane.b32.xlu2 %v5623_v42, %s5093_s21  ;;  %1255 = vrot.lane.b32.xlu1 %v5593_v26, %s5093_s21 }
 0x166   : > { %v1047_v55 = vpop.permute.xlu0 %1046 }
 0x167   : > { %v1057_v18 = vpop.permute.xlu2 %1056  ;;  %1132 = vst.msk [vmem:[#allocation4 + $0x58] sm:$0xff] %vm1120_vm6, %v1047_v55  ;;  %v1043_v3 = vpop.permute.xlu1 %1042 }
 0x168   : > { %1137 = vst.msk [vmem:[#allocation4 + $0x80] sm:$0xff] %vm1120_vm6, %v1057_v18 }
 0x169   : > { %1130 = vst.msk [vmem:[#allocation4 + $0x48] sm:$0xff] %vm1120_vm6, %v1043_v3 }
 0x16c   : > { %1265 = vrot.lane.b32.xlu0 %v5646_v58, %s5093_s21 }
 0x16d   : > { %1257 = vrot.lane.b32.xlu2 %v5640_v53, %s5093_s21  ;;  %1261 = vrot.lane.b32.xlu1 %v5709_v52, %s5093_s21 }
 0x16e   : > { %v1053_v59 = vpop.permute.xlu0 %1052 }
 0x16f   : > { %v1063_v26 = vpop.permute.xlu2 %1062  ;;  %1135 = vst.msk [vmem:[#allocation4 + $0x70] sm:$0xff] %vm1120_vm6, %v1053_v59  ;;  %v1049_v57 = vpop.permute.xlu1 %1048  ;;  %v1346_v59 = vld [vmem:[#allocation2 + $0x19] sm:$0xff] }
 0x170   : > { %1140 = vst.msk [vmem:[#allocation4 + $0x98] sm:$0xff] %vm1120_vm6, %v1063_v26 }
 0x171   : > { %1133 = vst.msk [vmem:[#allocation4 + $0x60] sm:$0xff] %vm1120_vm6, %v1049_v57 }
 0x174   : > { %1271 = vrot.lane.b32.xlu0 %v5675_v30, %s5093_s21 }
 0x175   : > { %1263 = vrot.lane.b32.xlu2 %v5669_v21, %s5093_s21  ;;  %1267 = vrot.lane.b32.xlu1 %v5642_v56, %s5093_s21 }
 0x176   : > { %v1059_v45 = vpop.permute.xlu0 %1058 }
 0x177   : > { %v1069_v52 = vpop.permute.xlu2 %1068  ;;  %1138 = vst.msk [vmem:[#allocation4 + $0x88] sm:$0xff] %vm1120_vm6, %v1059_v45  ;;  %v1055_v34 = vpop.permute.xlu1 %1054 }
 0x178   : > { %1143 = vst.msk [vmem:[#allocation4 + $0xb0] sm:$0xff] %vm1120_vm6, %v1069_v52 }
 0x179   : > { %1136 = vst.msk [vmem:[#allocation4 + $0x78] sm:$0xff] %vm1120_vm6, %v1055_v34 }
 0x17c   : > { %1277 = vrot.lane.b32.xlu0 %v5892_v39, %s5093_s21 }
 0x17d   : > { %1269 = vrot.lane.b32.xlu2 %v5690_v31, %s5093_s21  ;;  %1273 = vrot.lane.b32.xlu1 %v5747_v40, %s5093_s21 }
 0x17e   : > { %v1065_v48 = vpop.permute.xlu0 %1064 }
 0x17f   : > { %v1075_v17 = vpop.permute.xlu2 %1074  ;;  %1141 = vst.msk [vmem:[#allocation4 + $0xa0] sm:$0xff] %vm1120_vm6, %v1065_v48  ;;  %v1061_v7 = vpop.permute.xlu1 %1060 }
 0x180   : > { %1146 = vst.msk [vmem:[#allocation4 + $0xc8] sm:$0xff] %vm1120_vm6, %v1075_v17 }
 0x181   : > { %1139 = vst.msk [vmem:[#allocation4 + $0x90] sm:$0xff] %vm1120_vm6, %v1061_v7  ;;  %v5998_v7 = vld [vmem:[#allocation2 + $0x189] sm:$0xff] }
 0x184   : > { %1412 = vrot.lane.b32.xlu0 %v5352_v5, %s5094_s22  ;;  %v5916_v5 = vld [vmem:[#allocation2 + $0x31] sm:$0xff] }
 0x185   : > { %1275 = vrot.lane.b32.xlu2 %v5713_v24, %s5093_s21  ;;  %1279 = vrot.lane.b32.xlu1 %v5905_v49, %s5093_s21 }
 0x186   : > { %v1071_v55 = vpop.permute.xlu0 %1070 }
 0x187   : > { %v1081_v18 = vpop.permute.xlu2 %1080  ;;  %1144 = vst.msk [vmem:[#allocation4 + $0xb8] sm:$0xff] %vm1120_vm6, %v1071_v55  ;;  %v1067_v3 = vpop.permute.xlu1 %1066  ;;  %v6009_v55 = vld [vmem:[#allocation2 + $0x181] sm:$0xff] }
 0x188   : > { %1149 = vst.msk [vmem:[#allocation4 + $0xe0] sm:$0xff] %vm1120_vm6, %v1081_v18  ;;  %v8055_v18 = vld [vmem:[#allocation10_spill] sm:$0xff] }
 0x189   : > { %1142 = vst.msk [vmem:[#allocation4 + $0xa8] sm:$0xff] %vm1120_vm6, %v1067_v3 }
 0x18c   : > { %1418 = vrot.lane.b32.xlu0 %v5368_v11, %s5094_s22  ;;  %v5926_v11 = vld [vmem:[#allocation2 + $0x51] sm:$0xff] }
 0x18d   : > { %1410 = vrot.lane.b32.xlu2 %v1346_v59, %s5094_s22  ;;  %1414 = vrot.lane.b32.xlu1 %v5916_v5, %s5094_s22 }
 0x18e   : > { %v1077_v26 = vpop.permute.xlu0 %1076 }
 0x18f   : > { %v1087_v57 = vpop.permute.xlu2 %1086  ;;  %1147 = vst.msk [vmem:[#allocation4 + $0xd0] sm:$0xff] %vm1120_vm6, %v1077_v26  ;;  %v1073_v45 = vpop.permute.xlu1 %1072  ;;  %v8057_v26 = vld [vmem:[#allocation13_spill] sm:$0xff] }
 0x190   : > { %1152 = vst.msk [vmem:[#allocation4 + $0xf8] sm:$0xff] %vm1120_vm6, %v1087_v57  ;;  %v8058_v57 = vld [vmem:[#allocation8_spill] sm:$0xff] }
 0x191   : > { %1145 = vst.msk [vmem:[#allocation4 + $0xc0] sm:$0xff] %vm1120_vm6, %v1073_v45  ;;  %v8059_v45 = vld [vmem:[#allocation7_spill] sm:$0xff] }
 0x194   : > { %1424 = vrot.lane.b32.xlu0 %v5393_v20, %s5094_s22 }
 0x195   : > { %1416 = vrot.lane.b32.xlu2 %v5346_v4, %s5094_s22  ;;  %1420 = vrot.lane.b32.xlu1 %v5926_v11, %s5094_s22 }
 0x196   : > { %v1083_v52 = vpop.permute.xlu0 %1082 }
 0x197   : > { %v1222_v34 = vpop.permute.xlu2 %1221  ;;  %1150 = vst.msk [vmem:[#allocation4 + $0xe8] sm:$0xff] %vm1120_vm6, %v1083_v52  ;;  %v1079_v48 = vpop.permute.xlu1 %1078 }
 0x198   : > { %1316 = vst.msk [vmem:[#allocation4 + $0x10] sm:$0xff] %vm1313_vm7, %v1222_v34 }
 0x199   : > { %1148 = vst.msk [vmem:[#allocation4 + $0xd8] sm:$0xff] %vm1120_vm6, %v1079_v48 }
 0x19c   : > { %1430 = vrot.lane.b32.xlu0 %v5418_v29, %s5094_s22 }
 0x19d   : > { %1422 = vrot.lane.b32.xlu2 %v5377_v14, %s5094_s22  ;;  %1426 = vrot.lane.b32.xlu1 %v5365_v10, %s5094_s22 }
 0x19e   : > { %v1218_v4 = vpop.permute.xlu0 %1217 }
 0x19f   : > { %v1228_v20 = vpop.permute.xlu2 %1227  ;;  %1314 = vst.msk [vmem:[#allocation4] sm:$0xff] %vm1313_vm7, %v1218_v4  ;;  %v1085_v17 = vpop.permute.xlu1 %1084  ;;  %v8060_v4 = vld [vmem:[#allocation16_spill] sm:$0xff] }
 0x1a0   : > { %1319 = vst.msk [vmem:[#allocation4 + $0x28] sm:$0xff] %vm1313_vm7, %v1228_v20  ;;  %v8061_v20 = vld [vmem:[#allocation11_spill] sm:$0xff] }
 0x1a1   : > { %1151 = vst.msk [vmem:[#allocation4 + $0xf0] sm:$0xff] %vm1120_vm6, %v1085_v17  ;;  %v8062_v17 = vld [vmem:[#allocation9_spill] sm:$0xff]  ;;  %vm3705_vm6 = vcmask 392512  }
 0x1a4   : > { %1436 = vrot.lane.b32.xlu0 %v5443_v38, %s5094_s22 }
 0x1a5   : > { %1428 = vrot.lane.b32.xlu2 %v5402_v23, %s5094_s22  ;;  %1432 = vrot.lane.b32.xlu1 %v5390_v19, %s5094_s22 }
 0x1a6   : > { %v1224_v14 = vpop.permute.xlu0 %1223 }
 0x1a7   : > { %v1234_v10 = vpop.permute.xlu2 %1233  ;;  %1317 = vst.msk [vmem:[#allocation4 + $0x18] sm:$0xff] %vm1313_vm7, %v1224_v14  ;;  %v1220_v29 = vpop.permute.xlu1 %1219 }
 0x1a8   : > { %1322 = vst.msk [vmem:[#allocation4 + $0x40] sm:$0xff] %vm1313_vm7, %v1234_v10 }
 0x1a9   : > { %1315 = vst.msk [vmem:[#allocation4 + $0x8] sm:$0xff] %vm1313_vm7, %v1220_v29 }
 0x1ac   : > { %1442 = vrot.lane.b32.xlu0 %v5468_v44, %s5094_s22 }
 0x1ad   : > { %1434 = vrot.lane.b32.xlu2 %v5427_v33, %s5094_s22  ;;  %1438 = vrot.lane.b32.xlu1 %v5415_v28, %s5094_s22 }
 0x1ae   : > { %v1230_v23 = vpop.permute.xlu0 %1229 }
 0x1af   : > { %v1240_v19 = vpop.permute.xlu2 %1239  ;;  %1320 = vst.msk [vmem:[#allocation4 + $0x30] sm:$0xff] %vm1313_vm7, %v1230_v23  ;;  %v1226_v38 = vpop.permute.xlu1 %1225  ;;  %v8063_v23 = vld [vmem:[#allocation19_spill] sm:$0xff] }
 0x1b0   : > { %1325 = vst.msk [vmem:[#allocation4 + $0x58] sm:$0xff] %vm1313_vm7, %v1240_v19  ;;  %v8064_v19 = vld [vmem:[#allocation14_spill] sm:$0xff] }
 0x1b1   : > { %1318 = vst.msk [vmem:[#allocation4 + $0x20] sm:$0xff] %vm1313_vm7, %v1226_v38  ;;  %v8065_v38 = vld [vmem:[#allocation12_spill] sm:$0xff] }
 0x1b4   : > { %1448 = vrot.lane.b32.xlu0 %v5498_v51, %s5094_s22 }
 0x1b5   : > { %1440 = vrot.lane.b32.xlu2 %v5452_v41, %s5094_s22  ;;  %1444 = vrot.lane.b32.xlu1 %v5439_v37, %s5094_s22 }
 0x1b6   : > { %v1236_v33 = vpop.permute.xlu0 %1235 }
 0x1b7   : > { %v1246_v28 = vpop.permute.xlu2 %1245  ;;  %1323 = vst.msk [vmem:[#allocation4 + $0x48] sm:$0xff] %vm1313_vm7, %v1236_v33  ;;  %v1232_v44 = vpop.permute.xlu1 %1231 }
 0x1b8   : > { %1328 = vst.msk [vmem:[#allocation4 + $0x70] sm:$0xff] %vm1313_vm7, %v1246_v28 }
 0x1b9   : > { %1321 = vst.msk [vmem:[#allocation4 + $0x38] sm:$0xff] %vm1313_vm7, %v1232_v44 }
 0x1bc   : > { %1454 = vrot.lane.b32.xlu0 %v5530_v62, %s5094_s22 }
 0x1bd   : > { %1446 = vrot.lane.b32.xlu2 %v5477_v47, %s5094_s22  ;;  %1450 = vrot.lane.b32.xlu1 %v5464_v43, %s5094_s22 }
 0x1be   : > { %v1242_v41 = vpop.permute.xlu0 %1241 }
 0x1bf   : > { %v1252_v37 = vpop.permute.xlu2 %1251  ;;  %1326 = vst.msk [vmem:[#allocation4 + $0x60] sm:$0xff] %vm1313_vm7, %v1242_v41  ;;  %v1238_v51 = vpop.permute.xlu1 %1237  ;;  %v8066_v41 = vld [vmem:[#allocation22_spill] sm:$0xff] }
 0x1c0   : > { %1331 = vst.msk [vmem:[#allocation4 + $0x88] sm:$0xff] %vm1313_vm7, %v1252_v37  ;;  %v8067_v37 = vld [vmem:[#allocation17_spill] sm:$0xff] }
 0x1c1   : > { %1324 = vst.msk [vmem:[#allocation4 + $0x50] sm:$0xff] %vm1313_vm7, %v1238_v51  ;;  %v8068_v51 = vld [vmem:[#allocation15_spill] sm:$0xff] }
 0x1c4   : > { %1460 = vrot.lane.b32.xlu0 %v5564_v12, %s5094_s22 }
 0x1c5   : > { %1452 = vrot.lane.b32.xlu2 %v5507_v54, %s5094_s22  ;;  %1456 = vrot.lane.b32.xlu1 %v5494_v50, %s5094_s22 }
 0x1c6   : > { %v1248_v47 = vpop.permute.xlu0 %1247 }
 0x1c7   : > { %v1258_v43 = vpop.permute.xlu2 %1257  ;;  %1329 = vst.msk [vmem:[#allocation4 + $0x78] sm:$0xff] %vm1313_vm7, %v1248_v47  ;;  %v1244_v62 = vpop.permute.xlu1 %1243 }
 0x1c8   : > { %1334 = vst.msk [vmem:[#allocation4 + $0xa0] sm:$0xff] %vm1313_vm7, %v1258_v43 }
 0x1c9   : > { %1327 = vst.msk [vmem:[#allocation4 + $0x68] sm:$0xff] %vm1313_vm7, %v1244_v62 }
 0x1cc   : > { %1466 = vrot.lane.b32.xlu0 %v5597_v27, %s5094_s22 }
 0x1cd   : > { %1458 = vrot.lane.b32.xlu2 %v5539_v1, %s5094_s22  ;;  %1462 = vrot.lane.b32.xlu1 %v5526_v61, %s5094_s22 }
 0x1ce   : > { %v1254_v54 = vpop.permute.xlu0 %1253 }
 0x1cf   : > { %v1264_v50 = vpop.permute.xlu2 %1263  ;;  %1332 = vst.msk [vmem:[#allocation4 + $0x90] sm:$0xff] %vm1313_vm7, %v1254_v54  ;;  %v1250_v12 = vpop.permute.xlu1 %1249  ;;  %v8069_v54 = vld [vmem:[#allocation25_spill] sm:$0xff] }
 0x1d0   : > { %1337 = vst.msk [vmem:[#allocation4 + $0xb8] sm:$0xff] %vm1313_vm7, %v1264_v50  ;;  %v8070_v50 = vld [vmem:[#allocation20_spill] sm:$0xff] }
 0x1d1   : > { %1330 = vst.msk [vmem:[#allocation4 + $0x80] sm:$0xff] %vm1313_vm7, %v1250_v12  ;;  %v8071_v12 = vld [vmem:[#allocation18_spill] sm:$0xff] }
 0x1d4   : > { %1472 = vrot.lane.b32.xlu0 %v5998_v7, %s5094_s22 }
 0x1d5   : > { %1464 = vrot.lane.b32.xlu2 %v5572_v16, %s5094_s22  ;;  %1468 = vrot.lane.b32.xlu1 %v5560_v9, %s5094_s22  ;;  %v8056_v9 = vld [vmem:[#allocation6_spill] sm:$0xff] }
 0x1d6   : > { %v1260_v61 = vpop.permute.xlu0 %1259 }
 0x1d7   : > { %v1270_v1 = vpop.permute.xlu2 %1269  ;;  %1335 = vst.msk [vmem:[#allocation4 + $0xa8] sm:$0xff] %vm1313_vm7, %v1260_v61  ;;  %v1256_v27 = vpop.permute.xlu1 %1255 }
 0x1d8   : > { %1340 = vst.msk [vmem:[#allocation4 + $0xd0] sm:$0xff] %vm1313_vm7, %v1270_v1 }
 0x1d9   : > { %1333 = vst.msk [vmem:[#allocation4 + $0x98] sm:$0xff] %vm1313_vm7, %v1256_v27 }
 0x1dc   : > { %1607 = vrot.lane.b32.xlu0 %v8055_v18, %s5095_s23  ;;  %v8072_v18 = vld [vmem:[#allocation28_spill] sm:$0xff] }
 0x1dd   : > { %1470 = vrot.lane.b32.xlu2 %v6009_v55, %s5094_s22  ;;  %1603 = vrot.lane.b32.xlu1 %v8056_v9, %s5095_s23  ;;  %v8073_v9 = vld [vmem:[#allocation23_spill] sm:$0xff] }
 0x1de   : > { %v1266_v16 = vpop.permute.xlu0 %1265 }
 0x1df   : > { %v1276_v3 = vpop.permute.xlu2 %1275  ;;  %1338 = vst.msk [vmem:[#allocation4 + $0xc0] sm:$0xff] %vm1313_vm7, %v1266_v16  ;;  %v1262_v59 = vpop.permute.xlu1 %1261  ;;  %v8074_v16 = vld [vmem:[#allocation21_spill] sm:$0xff] }
 0x1e0   : > { %1343 = vst.msk [vmem:[#allocation4 + $0xe8] sm:$0xff] %vm1313_vm7, %v1276_v3 }
 0x1e1   : > { %1336 = vst.msk [vmem:[#allocation4 + $0xb0] sm:$0xff] %vm1313_vm7, %v1262_v59 }
 0x1e4   : > { %1613 = vrot.lane.b32.xlu0 %v8057_v26, %s5095_s23 }
 0x1e5   : > { %1605 = vrot.lane.b32.xlu2 %v8058_v57, %s5095_s23  ;;  %1609 = vrot.lane.b32.xlu1 %v8059_v45, %s5095_s23  ;;  %v8075_v57 = vld [vmem:[#allocation26_spill] sm:$0xff]  ;;  %v8076_v45 = vld [vmem:[#allocation24_spill] sm:$0xff] }
 0x1e6   : > { %v1272_v52 = vpop.permute.xlu0 %1271 }
 0x1e7   : > { %v1411_v34 = vpop.permute.xlu2 %1410  ;;  %1341 = vst.msk [vmem:[#allocation4 + $0xd8] sm:$0xff] %vm1313_vm7, %v1272_v52  ;;  %v1268_v48 = vpop.permute.xlu1 %1267 }
 0x1e8   : > { %1507 = vst.msk [vmem:[#allocation4] sm:$0xff] %vm1506_vm8, %v1411_v34 }
 0x1e9   : > { %1339 = vst.msk [vmem:[#allocation4 + $0xc8] sm:$0xff] %vm1313_vm7, %v1268_v48 }
 0x1ec   : > { %1619 = vrot.lane.b32.xlu0 %v8060_v4, %s5095_s23  ;;  %v8078_v4 = vld [vmem:[#allocation27_spill] sm:$0xff] }
 0x1ed   : > { %1611 = vrot.lane.b32.xlu2 %v8061_v20, %s5095_s23  ;;  %1615 = vrot.lane.b32.xlu1 %v8062_v17, %s5095_s23 }
 0x1ee   : > { %v1278_v14 = vpop.permute.xlu0 %1277 }
 0x1ef   : > { %v1417_v10 = vpop.permute.xlu2 %1416  ;;  %1344 = vst.msk [vmem:[#allocation4 + $0xf0] sm:$0xff] %vm1313_vm7, %v1278_v14  ;;  %v1274_v29 = vpop.permute.xlu1 %1273 }
 0x1f0   : > { %1510 = vst.msk [vmem:[#allocation4 + $0x18] sm:$0xff] %vm1506_vm8, %v1417_v10  ;;  %v8080_v10 = vld [vmem:[#allocation30_spill] sm:$0xff] }
 0x1f1   : > { %1342 = vst.msk [vmem:[#allocation4 + $0xe0] sm:$0xff] %vm1313_vm7, %v1274_v29 }
 0x1f4   : > { %1625 = vrot.lane.b32.xlu0 %v8063_v23, %s5095_s23 }
 0x1f5   : > { %1617 = vrot.lane.b32.xlu2 %v8064_v19, %s5095_s23  ;;  %1621 = vrot.lane.b32.xlu1 %v8065_v38, %s5095_s23  ;;  %v1733_v38 = vld [vmem:[#allocation2 + $0x30] sm:$0xff] }
 0x1f6   : > { %v1413_v33 = vpop.permute.xlu0 %1412 }
 0x1f7   : > { %v1423_v28 = vpop.permute.xlu2 %1422  ;;  %1508 = vst.msk [vmem:[#allocation4 + $0x8] sm:$0xff] %vm1506_vm8, %v1413_v33  ;;  %v1280_v44 = vpop.permute.xlu1 %1279  ;;  %v8081_v33 = vld [vmem:[#allocation32_spill] sm:$0xff] }
 0x1f8   : > { %1513 = vst.msk [vmem:[#allocation4 + $0x30] sm:$0xff] %vm1506_vm8, %v1423_v28 }
 0x1f9   : > { %1345 = vst.msk [vmem:[#allocation4 + $0xf8] sm:$0xff] %vm1313_vm7, %v1280_v44  ;;  %vm3899_vm7 = vcmask 458112  }
 0x1fc   : > { %1631 = vrot.lane.b32.xlu0 %v8066_v41, %s5095_s23 }
 0x1fd   : > { %1623 = vrot.lane.b32.xlu2 %v8067_v37, %s5095_s23  ;;  %1627 = vrot.lane.b32.xlu1 %v8068_v51, %s5095_s23  ;;  %v6111_v37 = vld [vmem:[#allocation2 + $0x18a] sm:$0xff] }
 0x1fe   : > { %v1419_v47 = vpop.permute.xlu0 %1418 }
 0x1ff   : > { %v1429_v43 = vpop.permute.xlu2 %1428  ;;  %1511 = vst.msk [vmem:[#allocation4 + $0x20] sm:$0xff] %vm1506_vm8, %v1419_v47  ;;  %v1415_v62 = vpop.permute.xlu1 %1414 }
 0x200   : > { %1516 = vst.msk [vmem:[#allocation4 + $0x48] sm:$0xff] %vm1506_vm8, %v1429_v43 }
 0x201   : > { %1509 = vst.msk [vmem:[#allocation4 + $0x10] sm:$0xff] %vm1506_vm8, %v1415_v62  ;;  %v1735_v62 = vld [vmem:[#allocation2 + $0x48] sm:$0xff] }
 0x204   : > { %1637 = vrot.lane.b32.xlu0 %v8069_v54, %s5095_s23 }
 0x205   : > { %1629 = vrot.lane.b32.xlu2 %v8070_v50, %s5095_s23  ;;  %1633 = vrot.lane.b32.xlu1 %v8071_v12, %s5095_s23  ;;  %v1738_v50 = vld [vmem:[#allocation2 + $0x68] sm:$0xff] }
 0x206   : > { %v1425_v61 = vpop.permute.xlu0 %1424 }
 0x207   : > { %v1435_v1 = vpop.permute.xlu2 %1434  ;;  %1514 = vst.msk [vmem:[#allocation4 + $0x38] sm:$0xff] %vm1506_vm8, %v1425_v61  ;;  %v1421_v27 = vpop.permute.xlu1 %1420  ;;  %v1741_v61 = vld [vmem:[#allocation2 + $0x90] sm:$0xff] }
 0x208   : > { %1519 = vst.msk [vmem:[#allocation4 + $0x60] sm:$0xff] %vm1506_vm8, %v1435_v1 }
 0x209   : > { %1512 = vst.msk [vmem:[#allocation4 + $0x28] sm:$0xff] %vm1506_vm8, %v1421_v27  ;;  %v1744_v27 = vld [vmem:[#allocation2 + $0xb0] sm:$0xff] }
 0x20c   : > { %1643 = vrot.lane.b32.xlu0 %v8072_v18, %s5095_s23 }
 0x20d   : > { %1635 = vrot.lane.b32.xlu2 %v8073_v9, %s5095_s23  ;;  %1639 = vrot.lane.b32.xlu1 %v8074_v16, %s5095_s23  ;;  %v1747_v9 = vld [vmem:[#allocation2 + $0xd8] sm:$0xff] }
 0x20e   : > { %v1431_v3 = vpop.permute.xlu0 %1430 }
 0x20f   : > { %v1441_v59 = vpop.permute.xlu2 %1440  ;;  %1517 = vst.msk [vmem:[#allocation4 + $0x50] sm:$0xff] %vm1506_vm8, %v1431_v3  ;;  %v1427_v26 = vpop.permute.xlu1 %1426  ;;  %v1750_v3 = vld [vmem:[#allocation2 + $0xf8] sm:$0xff] }
 0x210   : > { %1522 = vst.msk [vmem:[#allocation4 + $0x78] sm:$0xff] %vm1506_vm8, %v1441_v59 }
 0x211   : > { %1515 = vst.msk [vmem:[#allocation4 + $0x40] sm:$0xff] %vm1506_vm8, %v1427_v26  ;;  %v1753_v26 = vld [vmem:[#allocation2 + $0x120] sm:$0xff] }
 0x214   : > { %1649 = vrot.lane.b32.xlu0 %v5783_v0, %s5095_s23  ;;  %v8077_v0 = vld [vmem:[#allocation29_spill] sm:$0xff] }
 0x215   : > { %1641 = vrot.lane.b32.xlu2 %v8075_v57, %s5095_s23  ;;  %1645 = vrot.lane.b32.xlu1 %v8076_v45, %s5095_s23 }
 0x216   : > { %v1437_v52 = vpop.permute.xlu0 %1436 }
 0x217   : > { %v1447_v34 = vpop.permute.xlu2 %1446  ;;  %1520 = vst.msk [vmem:[#allocation4 + $0x68] sm:$0xff] %vm1506_vm8, %v1437_v52  ;;  %v1433_v48 = vpop.permute.xlu1 %1432  ;;  %v1763_v52 = vld [vmem:[#allocation2 + $0x198] sm:$0xff] }
 0x218   : > { %1525 = vst.msk [vmem:[#allocation4 + $0x90] sm:$0xff] %vm1506_vm8, %v1447_v34  ;;  %v1764_v34 = vld [vmem:[#allocation2 + $0x1a0] sm:$0xff] }
 0x219   : > { %1518 = vst.msk [vmem:[#allocation4 + $0x58] sm:$0xff] %vm1506_vm8, %v1433_v48  ;;  %v1927_v48 = vld [vmem:[#allocation2 + $0x39] sm:$0xff] }
 0x21c   : > { %1655 = vrot.lane.b32.xlu0 %v5796_v63, %s5095_s23  ;;  %v8079_v63 = vld [vmem:[#allocation31_spill] sm:$0xff] }
 0x21d   : > { %1647 = vrot.lane.b32.xlu2 %v8077_v0, %s5095_s23  ;;  %1651 = vrot.lane.b32.xlu1 %v8078_v4, %s5095_s23  ;;  %v1930_v4 = vld [vmem:[#allocation2 + $0x61] sm:$0xff] }
 0x21e   : > { %v1443_v20 = vpop.permute.xlu0 %1442 }
 0x21f   : > { %v1453_v17 = vpop.permute.xlu2 %1452  ;;  %1523 = vst.msk [vmem:[#allocation4 + $0x80] sm:$0xff] %vm1506_vm8, %v1443_v20  ;;  %v1439_v14 = vpop.permute.xlu1 %1438  ;;  %v1928_v20 = vld [vmem:[#allocation2 + $0x49] sm:$0xff] }
 0x220   : > { %1528 = vst.msk [vmem:[#allocation4 + $0xa8] sm:$0xff] %vm1506_vm8, %v1453_v17 }
 0x221   : > { %1521 = vst.msk [vmem:[#allocation4 + $0x70] sm:$0xff] %vm1506_vm8, %v1439_v14 }
 0x224   : > { %1661 = vrot.lane.b32.xlu0 %v5809_v35, %s5095_s23  ;;  %v6102_v35 = vld [vmem:[#allocation2 + $0x182] sm:$0xff] }
 0x225   : > { %1653 = vrot.lane.b32.xlu2 %v8079_v63, %s5095_s23  ;;  %1657 = vrot.lane.b32.xlu1 %v8080_v10, %s5095_s23  ;;  %v1933_v63 = vld [vmem:[#allocation2 + $0x81] sm:$0xff]  ;;  %v1931_v10 = vld [vmem:[#allocation2 + $0x69] sm:$0xff] }
 0x226   : > { %v1449_v29 = vpop.permute.xlu0 %1448 }
 0x227   : > { %v1459_v23 = vpop.permute.xlu2 %1458  ;;  %1526 = vst.msk [vmem:[#allocation4 + $0x98] sm:$0xff] %vm1506_vm8, %v1449_v29  ;;  %v1445_v19 = vpop.permute.xlu1 %1444 }
 0x228   : > { %1531 = vst.msk [vmem:[#allocation4 + $0xc0] sm:$0xff] %vm1506_vm8, %v1459_v23 }
 0x229   : > { %1524 = vst.msk [vmem:[#allocation4 + $0x88] sm:$0xff] %vm1506_vm8, %v1445_v19  ;;  %v1936_v19 = vld [vmem:[#allocation2 + $0xa9] sm:$0xff] }
 0x22c   : > { %1797 = vrot.lane.b32.xlu0 %v1733_v38, %s5096_s24  ;;  %v1932_v38 = vld [vmem:[#allocation2 + $0x79] sm:$0xff] }
 0x22d   : > { %1659 = vrot.lane.b32.xlu2 %v8081_v33, %s5095_s23  ;;  %1663 = vrot.lane.b32.xlu1 %v6102_v35, %s5095_s23  ;;  %v1934_v33 = vld [vmem:[#allocation2 + $0x91] sm:$0xff] }
 0x22e   : > { %v1455_v28 = vpop.permute.xlu0 %1454 }
 0x22f   : > { %v1465_v44 = vpop.permute.xlu2 %1464  ;;  %1529 = vst.msk [vmem:[#allocation4 + $0xb0] sm:$0xff] %vm1506_vm8, %v1455_v28  ;;  %v1451_v41 = vpop.permute.xlu1 %1450 }
 0x230   : > { %1534 = vst.msk [vmem:[#allocation4 + $0xd8] sm:$0xff] %vm1506_vm8, %v1465_v44 }
 0x231   : > { %1527 = vst.msk [vmem:[#allocation4 + $0xa0] sm:$0xff] %vm1506_vm8, %v1451_v41  ;;  %v1939_v41 = vld [vmem:[#allocation2 + $0xc9] sm:$0xff] }
 0x234   : > { %1803 = vrot.lane.b32.xlu0 %v5524_v60, %s5096_s24 }
 0x235   : > { %1665 = vrot.lane.b32.xlu2 %v6111_v37, %s5095_s23  ;;  %1799 = vrot.lane.b32.xlu1 %v5541_v2, %s5096_s24 }
 0x236   : > { %v1461_v51 = vpop.permute.xlu0 %1460 }
 0x237   : > { %v1471_v47 = vpop.permute.xlu2 %1470  ;;  %1532 = vst.msk [vmem:[#allocation4 + $0xc8] sm:$0xff] %vm1506_vm8, %v1461_v51  ;;  %v1457_v43 = vpop.permute.xlu1 %1456  ;;  %v1935_v51 = vld [vmem:[#allocation2 + $0x99] sm:$0xff] }
 0x238   : > { %1537 = vst.msk [vmem:[#allocation4 + $0xf0] sm:$0xff] %vm1506_vm8, %v1471_v47  ;;  %v1937_v47 = vld [vmem:[#allocation2 + $0xb1] sm:$0xff] }
 0x239   : > { %1530 = vst.msk [vmem:[#allocation4 + $0xb8] sm:$0xff] %vm1506_vm8, %v1457_v43 }
 0x23c   : > { %1809 = vrot.lane.b32.xlu0 %v5549_v6, %s5096_s24 }
 0x23d   : > { %1801 = vrot.lane.b32.xlu2 %v1735_v62, %s5096_s24  ;;  %1805 = vrot.lane.b32.xlu1 %v5556_v8, %s5096_s24 }
 0x23e   : > { %v1467_v60 = vpop.permute.xlu0 %1466 }
 0x23f   : > { %v1606_v2 = vpop.permute.xlu2 %1605  ;;  %1535 = vst.msk [vmem:[#allocation4 + $0xe0] sm:$0xff] %vm1506_vm8, %v1467_v60  ;;  %v1463_v54 = vpop.permute.xlu1 %1462 }
 0x240   : > { %1701 = vst.msk [vmem:[#allocation4 + $0x8] sm:$0xff] %vm1699_vm9, %v1606_v2  ;;  %v1942_v2 = vld [vmem:[#allocation2 + $0xf1] sm:$0xff] }
 0x241   : > { %1533 = vst.msk [vmem:[#allocation4 + $0xd0] sm:$0xff] %vm1506_vm8, %v1463_v54  ;;  %v1938_v54 = vld [vmem:[#allocation2 + $0xc1] sm:$0xff] }
 0x244   : > { %1815 = vrot.lane.b32.xlu0 %v5568_v13, %s5096_s24 }
 0x245   : > { %1807 = vrot.lane.b32.xlu2 %v1738_v50, %s5096_s24  ;;  %1811 = vrot.lane.b32.xlu1 %v5570_v15, %s5096_s24  ;;  %v1940_v50 = vld [vmem:[#allocation2 + $0xd9] sm:$0xff] }
 0x246   : > { %v1473_v6 = vpop.permute.xlu0 %1472 }
 0x247   : > { %v1612_v8 = vpop.permute.xlu2 %1611  ;;  %1538 = vst.msk [vmem:[#allocation4 + $0xf8] sm:$0xff] %vm1506_vm8, %v1473_v6  ;;  %v1469_v12 = vpop.permute.xlu1 %1468 }
 0x248   : > { %1704 = vst.msk [vmem:[#allocation4 + $0x20] sm:$0xff] %vm1699_vm9, %v1612_v8 }
 0x249   : > { %1536 = vst.msk [vmem:[#allocation4 + $0xe8] sm:$0xff] %vm1506_vm8, %v1469_v12  ;;  %vm4092_vm8 = vcmask 523712  }
 0x24c   : > { %1821 = vrot.lane.b32.xlu0 %v5591_v25, %s5096_s24 }
 0x24d   : > { %1813 = vrot.lane.b32.xlu2 %v1741_v61, %s5096_s24  ;;  %1817 = vrot.lane.b32.xlu1 %v5587_v22, %s5096_s24  ;;  %v1945_v61 = vld [vmem:[#allocation2 + $0x111] sm:$0xff] }
 0x24e   : > { %v1608_v13 = vpop.permute.xlu0 %1607 }
 0x24f   : > { %v1618_v15 = vpop.permute.xlu2 %1617  ;;  %1702 = vst.msk [vmem:[#allocation4 + $0x10] sm:$0xff] %vm1699_vm9, %v1608_v13  ;;  %v1604_v1 = vpop.permute.xlu1 %1603  ;;  %v1941_v13 = vld [vmem:[#allocation2 + $0xe1] sm:$0xff] }
 0x250   : > { %1707 = vst.msk [vmem:[#allocation4 + $0x38] sm:$0xff] %vm1699_vm9, %v1618_v15  ;;  %v1943_v15 = vld [vmem:[#allocation2 + $0xf9] sm:$0xff] }
 0x251   : > { %1700 = vst.msk [vmem:[#allocation4] sm:$0xff] %vm1699_vm9, %v1604_v1 }
 0x254   : > { %1827 = vrot.lane.b32.xlu0 %v5623_v42, %s5096_s24 }
 0x255   : > { %1819 = vrot.lane.b32.xlu2 %v1744_v27, %s5096_s24  ;;  %1823 = vrot.lane.b32.xlu1 %v5601_v32, %s5096_s24 }
 0x256   : > { %v1614_v25 = vpop.permute.xlu0 %1613 }
 0x257   : > { %v1624_v22 = vpop.permute.xlu2 %1623  ;;  %1705 = vst.msk [vmem:[#allocation4 + $0x28] sm:$0xff] %vm1699_vm9, %v1614_v25  ;;  %v1610_v18 = vpop.permute.xlu1 %1609 }
 0x258   : > { %1710 = vst.msk [vmem:[#allocation4 + $0x50] sm:$0xff] %vm1699_vm9, %v1624_v22  ;;  %v1948_v22 = vld [vmem:[#allocation2 + $0x139] sm:$0xff] }
 0x259   : > { %1703 = vst.msk [vmem:[#allocation4 + $0x18] sm:$0xff] %vm1699_vm9, %v1610_v18  ;;  %v1944_v18 = vld [vmem:[#allocation2 + $0x109] sm:$0xff] }
 0x25c   : > { %1833 = vrot.lane.b32.xlu0 %v5640_v53, %s5096_s24 }
 0x25d   : > { %1825 = vrot.lane.b32.xlu2 %v1747_v9, %s5096_s24  ;;  %1829 = vrot.lane.b32.xlu1 %v5607_v36, %s5096_s24  ;;  %v1946_v9 = vld [vmem:[#allocation2 + $0x121] sm:$0xff] }
 0x25e   : > { %v1620_v42 = vpop.permute.xlu0 %1619 }
 0x25f   : > { %v1630_v32 = vpop.permute.xlu2 %1629  ;;  %1708 = vst.msk [vmem:[#allocation4 + $0x40] sm:$0xff] %vm1699_vm9, %v1620_v42  ;;  %v1616_v16 = vpop.permute.xlu1 %1615 }
 0x260   : > { %1713 = vst.msk [vmem:[#allocation4 + $0x68] sm:$0xff] %vm1699_vm9, %v1630_v32 }
 0x261   : > { %1706 = vst.msk [vmem:[#allocation4 + $0x30] sm:$0xff] %vm1699_vm9, %v1616_v16 }
 0x264   : > { %1839 = vrot.lane.b32.xlu0 %v5669_v21, %s5096_s24 }
 0x265   : > { %1831 = vrot.lane.b32.xlu2 %v1750_v3, %s5096_s24  ;;  %1835 = vrot.lane.b32.xlu1 %v5629_v46, %s5096_s24  ;;  %v1951_v3 = vld [vmem:[#allocation2 + $0x159] sm:$0xff] }
 0x266   : > { %v1626_v53 = vpop.permute.xlu0 %1625 }
 0x267   : > { %v1636_v36 = vpop.permute.xlu2 %1635  ;;  %1711 = vst.msk [vmem:[#allocation4 + $0x58] sm:$0xff] %vm1699_vm9, %v1626_v53  ;;  %v1622_v59 = vpop.permute.xlu1 %1621  ;;  %v1947_v53 = vld [vmem:[#allocation2 + $0x129] sm:$0xff] }
 0x268   : > { %1716 = vst.msk [vmem:[#allocation4 + $0x80] sm:$0xff] %vm1699_vm9, %v1636_v36  ;;  %v1949_v36 = vld [vmem:[#allocation2 + $0x141] sm:$0xff] }
 0x269   : > { %1709 = vst.msk [vmem:[#allocation4 + $0x48] sm:$0xff] %vm1699_vm9, %v1622_v59 }
 0x26c   : > { %1845 = vrot.lane.b32.xlu0 %v5690_v31, %s5096_s24 }
 0x26d   : > { %1837 = vrot.lane.b32.xlu2 %v1753_v26, %s5096_s24  ;;  %1841 = vrot.lane.b32.xlu1 %v5646_v58, %s5096_s24 }
 0x26e   : > { %v1632_v21 = vpop.permute.xlu0 %1631 }
 0x26f   : > { %v1642_v46 = vpop.permute.xlu2 %1641  ;;  %1714 = vst.msk [vmem:[#allocation4 + $0x70] sm:$0xff] %vm1699_vm9, %v1632_v21  ;;  %v1628_v57 = vpop.permute.xlu1 %1627 }
 0x270   : > { %1719 = vst.msk [vmem:[#allocation4 + $0x98] sm:$0xff] %vm1699_vm9, %v1642_v46  ;;  %v1950_v46 = vld [vmem:[#allocation2 + $0x151] sm:$0xff] }
 0x271   : > { %1712 = vst.msk [vmem:[#allocation4 + $0x60] sm:$0xff] %vm1699_vm9, %v1628_v57  ;;  %v1952_v57 = vld [vmem:[#allocation2 + $0x169] sm:$0xff] }
 0x274   : > { %1851 = vrot.lane.b32.xlu0 %v5713_v24, %s5096_s24 }
 0x275   : > { %1843 = vrot.lane.b32.xlu2 %v5642_v56, %s5096_s24  ;;  %1847 = vrot.lane.b32.xlu1 %v5675_v30, %s5096_s24 }
 0x276   : > { %v1638_v31 = vpop.permute.xlu0 %1637 }
 0x277   : > { %v1648_v58 = vpop.permute.xlu2 %1647  ;;  %1717 = vst.msk [vmem:[#allocation4 + $0x88] sm:$0xff] %vm1699_vm9, %v1638_v31  ;;  %v1634_v45 = vpop.permute.xlu1 %1633 }
 0x278   : > { %1722 = vst.msk [vmem:[#allocation4 + $0xb0] sm:$0xff] %vm1699_vm9, %v1648_v58 }
 0x279   : > { %1715 = vst.msk [vmem:[#allocation4 + $0x78] sm:$0xff] %vm1699_vm9, %v1634_v45 }
 0x27c   : > { %1857 = vrot.lane.b32.xlu0 %v1763_v52, %s5096_s24  ;;  %v1957_v52 = vld [vmem:[#allocation2 + $0x1a1] sm:$0xff] }
 0x27d   : > { %1849 = vrot.lane.b32.xlu2 %v5747_v40, %s5096_s24  ;;  %1853 = vrot.lane.b32.xlu1 %v5892_v39, %s5096_s24 }
 0x27e   : > { %v1644_v56 = vpop.permute.xlu0 %1643 }
 0x27f   : > { %v1654_v24 = vpop.permute.xlu2 %1653  ;;  %1720 = vst.msk [vmem:[#allocation4 + $0xa0] sm:$0xff] %vm1699_vm9, %v1644_v56  ;;  %v1640_v30 = vpop.permute.xlu1 %1639  ;;  %v1953_v56 = vld [vmem:[#allocation2 + $0x171] sm:$0xff] }
 0x280   : > { %1725 = vst.msk [vmem:[#allocation4 + $0xc8] sm:$0xff] %vm1699_vm9, %v1654_v24 }
 0x281   : > { %1718 = vst.msk [vmem:[#allocation4 + $0x90] sm:$0xff] %vm1699_vm9, %v1640_v30 }
 0x284   : > { %1992 = vrot.lane.b32.xlu0 %v1927_v48, %s5097_s25  ;;  %v2121_v48 = vld [vmem:[#allocation2 + $0x4a] sm:$0xff] }
 0x285   : > { %1855 = vrot.lane.b32.xlu2 %v5905_v49, %s5096_s24  ;;  %1859 = vrot.lane.b32.xlu1 %v1764_v34, %s5096_s24  ;;  %v1956_v34 = vld [vmem:[#allocation2 + $0x199] sm:$0xff] }
 0x286   : > { %v1650_v40 = vpop.permute.xlu0 %1649 }
 0x287   : > { %v1660_v39 = vpop.permute.xlu2 %1659  ;;  %1723 = vst.msk [vmem:[#allocation4 + $0xb8] sm:$0xff] %vm1699_vm9, %v1650_v40  ;;  %v1646_v0 = vpop.permute.xlu1 %1645  ;;  %v2119_v40 = vld [vmem:[#allocation2 + $0x32] sm:$0xff] }
 0x288   : > { %1728 = vst.msk [vmem:[#allocation4 + $0xe0] sm:$0xff] %vm1699_vm9, %v1660_v39 }
 0x289   : > { %1721 = vst.msk [vmem:[#allocation4 + $0xa8] sm:$0xff] %vm1699_vm9, %v1646_v0 }
 0x28c   : > { %1998 = vrot.lane.b32.xlu0 %v1930_v4, %s5097_s25  ;;  %v2124_v4 = vld [vmem:[#allocation2 + $0x6a] sm:$0xff] }
 0x28d   : > { %1990 = vrot.lane.b32.xlu2 %v5916_v5, %s5097_s25  ;;  %1994 = vrot.lane.b32.xlu1 %v1928_v20, %s5097_s25  ;;  %v2120_v20 = vld [vmem:[#allocation2 + $0x3a] sm:$0xff] }
 0x28e   : > { %v1656_v49 = vpop.permute.xlu0 %1655 }
 0x28f   : > { %v1666_v17 = vpop.permute.xlu2 %1665  ;;  %1726 = vst.msk [vmem:[#allocation4 + $0xd0] sm:$0xff] %vm1699_vm9, %v1656_v49  ;;  %v1652_v14 = vpop.permute.xlu1 %1651  ;;  %v2122_v49 = vld [vmem:[#allocation2 + $0x52] sm:$0xff] }
 0x290   : > { %1731 = vst.msk [vmem:[#allocation4 + $0xf8] sm:$0xff] %vm1699_vm9, %v1666_v17 }
 0x291   : > { %1724 = vst.msk [vmem:[#allocation4 + $0xc0] sm:$0xff] %vm1699_vm9, %v1652_v14 }
 0x294   : > { %2004 = vrot.lane.b32.xlu0 %v1933_v63, %s5097_s25 }
 0x295   : > { %1996 = vrot.lane.b32.xlu2 %v5926_v11, %s5097_s25  ;;  %2000 = vrot.lane.b32.xlu1 %v1931_v10, %s5097_s25  ;;  %v2127_v10 = vld [vmem:[#allocation2 + $0x92] sm:$0xff] }
 0x296   : > { %v1662_v5 = vpop.permute.xlu0 %1661 }
 0x297   : > { %v1802_v29 = vpop.permute.xlu2 %1801  ;;  %1729 = vst.msk [vmem:[#allocation4 + $0xe8] sm:$0xff] %vm1699_vm9, %v1662_v5  ;;  %v1658_v23 = vpop.permute.xlu1 %1657  ;;  %v2123_v5 = vld [vmem:[#allocation2 + $0x62] sm:$0xff] }
 0x298   : > { %1896 = vst.msk [vmem:[#allocation4 + $0x10] sm:$0xff] %vm1893_vm10, %v1802_v29  ;;  %v2125_v29 = vld [vmem:[#allocation2 + $0x7a] sm:$0xff] }
 0x299   : > { %1727 = vst.msk [vmem:[#allocation4 + $0xd8] sm:$0xff] %vm1699_vm9, %v1658_v23 }
 0x29c   : > { %2010 = vrot.lane.b32.xlu0 %v1936_v19, %s5097_s25 }
 0x29d   : > { %2002 = vrot.lane.b32.xlu2 %v1932_v38, %s5097_s25  ;;  %2006 = vrot.lane.b32.xlu1 %v1934_v33, %s5097_s25  ;;  %v2130_v33 = vld [vmem:[#allocation2 + $0xb2] sm:$0xff] }
 0x29e   : > { %v1798_v11 = vpop.permute.xlu0 %1797 }
 0x29f   : > { %v1808_v28 = vpop.permute.xlu2 %1807  ;;  %1894 = vst.msk [vmem:[#allocation4] sm:$0xff] %vm1893_vm10, %v1798_v11  ;;  %v1664_v44 = vpop.permute.xlu1 %1663  ;;  %v2126_v11 = vld [vmem:[#allocation2 + $0x82] sm:$0xff] }
 0x2a0   : > { %1899 = vst.msk [vmem:[#allocation4 + $0x28] sm:$0xff] %vm1893_vm10, %v1808_v28  ;;  %v2128_v28 = vld [vmem:[#allocation2 + $0x9a] sm:$0xff] }
 0x2a1   : > { %1730 = vst.msk [vmem:[#allocation4 + $0xf0] sm:$0xff] %vm1699_vm9, %v1664_v44  ;;  %vm4285_vm9 = vcmask 589312  }
 0x2a4   : > { %2016 = vrot.lane.b32.xlu0 %v1939_v41, %s5097_s25 }
 0x2a5   : > { %2008 = vrot.lane.b32.xlu2 %v1935_v51, %s5097_s25  ;;  %2012 = vrot.lane.b32.xlu1 %v1937_v47, %s5097_s25  ;;  %v2133_v47 = vld [vmem:[#allocation2 + $0xda] sm:$0xff] }
 0x2a6   : > { %v1804_v43 = vpop.permute.xlu0 %1803 }
 0x2a7   : > { %v1814_v62 = vpop.permute.xlu2 %1813  ;;  %1897 = vst.msk [vmem:[#allocation4 + $0x18] sm:$0xff] %vm1893_vm10, %v1804_v43  ;;  %v1800_v60 = vpop.permute.xlu1 %1799  ;;  %v2129_v43 = vld [vmem:[#allocation2 + $0xaa] sm:$0xff] }
 0x2a8   : > { %1902 = vst.msk [vmem:[#allocation4 + $0x40] sm:$0xff] %vm1893_vm10, %v1814_v62  ;;  %v2131_v62 = vld [vmem:[#allocation2 + $0xc2] sm:$0xff] }
 0x2a9   : > { %1895 = vst.msk [vmem:[#allocation4 + $0x8] sm:$0xff] %vm1893_vm10, %v1800_v60 }
 0x2ac   : > { %2022 = vrot.lane.b32.xlu0 %v1942_v2, %s5097_s25 }
 0x2ad   : > { %2014 = vrot.lane.b32.xlu2 %v1938_v54, %s5097_s25  ;;  %2018 = vrot.lane.b32.xlu1 %v1940_v50, %s5097_s25  ;;  %v2136_v50 = vld [vmem:[#allocation2 + $0xfa] sm:$0xff] }
 0x2ae   : > { %v1810_v6 = vpop.permute.xlu0 %1809 }
 0x2af   : > { %v1820_v8 = vpop.permute.xlu2 %1819  ;;  %1900 = vst.msk [vmem:[#allocation4 + $0x30] sm:$0xff] %vm1893_vm10, %v1810_v6  ;;  %v1806_v12 = vpop.permute.xlu1 %1805  ;;  %v2132_v6 = vld [vmem:[#allocation2 + $0xca] sm:$0xff] }
 0x2b0   : > { %1905 = vst.msk [vmem:[#allocation4 + $0x58] sm:$0xff] %vm1893_vm10, %v1820_v8  ;;  %v2134_v8 = vld [vmem:[#allocation2 + $0xe2] sm:$0xff] }
 0x2b1   : > { %1898 = vst.msk [vmem:[#allocation4 + $0x20] sm:$0xff] %vm1893_vm10, %v1806_v12 }
 0x2b4   : > { %2028 = vrot.lane.b32.xlu0 %v1945_v61, %s5097_s25 }
 0x2b5   : > { %2020 = vrot.lane.b32.xlu2 %v1941_v13, %s5097_s25  ;;  %2024 = vrot.lane.b32.xlu1 %v1943_v15, %s5097_s25  ;;  %v2139_v15 = vld [vmem:[#allocation2 + $0x122] sm:$0xff] }
 0x2b6   : > { %v1816_v1 = vpop.permute.xlu0 %1815 }
 0x2b7   : > { %v1826_v27 = vpop.permute.xlu2 %1825  ;;  %1903 = vst.msk [vmem:[#allocation4 + $0x48] sm:$0xff] %vm1893_vm10, %v1816_v1  ;;  %v1812_v25 = vpop.permute.xlu1 %1811  ;;  %v2135_v1 = vld [vmem:[#allocation2 + $0xf2] sm:$0xff] }
 0x2b8   : > { %1908 = vst.msk [vmem:[#allocation4 + $0x70] sm:$0xff] %vm1893_vm10, %v1826_v27  ;;  %v2137_v27 = vld [vmem:[#allocation2 + $0x10a] sm:$0xff] }
 0x2b9   : > { %1901 = vst.msk [vmem:[#allocation4 + $0x38] sm:$0xff] %vm1893_vm10, %v1812_v25 }
 0x2bc   : > { %2034 = vrot.lane.b32.xlu0 %v1948_v22, %s5097_s25 }
 0x2bd   : > { %2026 = vrot.lane.b32.xlu2 %v1944_v18, %s5097_s25  ;;  %2030 = vrot.lane.b32.xlu1 %v1946_v9, %s5097_s25  ;;  %v2142_v9 = vld [vmem:[#allocation2 + $0x142] sm:$0xff] }
 0x2be   : > { %v1822_v42 = vpop.permute.xlu0 %1821 }
 0x2bf   : > { %v1832_v32 = vpop.permute.xlu2 %1831  ;;  %1906 = vst.msk [vmem:[#allocation4 + $0x60] sm:$0xff] %vm1893_vm10, %v1822_v42  ;;  %v1818_v16 = vpop.permute.xlu1 %1817  ;;  %v2138_v42 = vld [vmem:[#allocation2 + $0x112] sm:$0xff] }
 0x2c0   : > { %1911 = vst.msk [vmem:[#allocation4 + $0x88] sm:$0xff] %vm1893_vm10, %v1832_v32  ;;  %v2140_v32 = vld [vmem:[#allocation2 + $0x12a] sm:$0xff] }
 0x2c1   : > { %1904 = vst.msk [vmem:[#allocation4 + $0x50] sm:$0xff] %vm1893_vm10, %v1818_v16 }
 0x2c4   : > { %2040 = vrot.lane.b32.xlu0 %v1951_v3, %s5097_s25 }
 0x2c5   : > { %2032 = vrot.lane.b32.xlu2 %v1947_v53, %s5097_s25  ;;  %2036 = vrot.lane.b32.xlu1 %v1949_v36, %s5097_s25  ;;  %v2357_v36 = vld [vmem:[%s7935_s3 + $0x68] sm:$0xf] }
 0x2c6   : > { %v1828_v59 = vpop.permute.xlu0 %1827  ;;  %4925 = vmatpush.msk.msra.mxu0 %vm2455_vm12, %v2357_v36  ;;  %5029 = vmatpush.msk.msra.mxu2 %vm2455_vm12, %v2357_v36 }
 0x2c7   : > { %v1838_v26 = vpop.permute.xlu2 %1837  ;;  %1909 = vst.msk [vmem:[#allocation4 + $0x78] sm:$0xff] %vm1893_vm10, %v1828_v59  ;;  %v1824_v21 = vpop.permute.xlu1 %1823  ;;  %v2356_v59 = vld [vmem:[%s7935_s3 + $0x60] sm:$0xff] }
 0x2c8   : > { %1914 = vst.msk [vmem:[#allocation4 + $0xa0] sm:$0xff] %vm1893_vm10, %v1838_v26  ;;  %v2145_v26 = vld [vmem:[#allocation2 + $0x16a] sm:$0xff]  ;;  %2462 = vmatpush.msra.mxu0 %v2356_v59  ;;  %5030 = vmatpush.msra.mxu2 %v2356_v59 }
 0x2c9   : > { %1907 = vst.msk [vmem:[#allocation4 + $0x68] sm:$0xff] %vm1893_vm10, %v1824_v21  ;;  %v2141_v21 = vld [vmem:[#allocation2 + $0x13a] sm:$0xff] }
 0x2cc   : > { %2046 = vrot.lane.b32.xlu0 %v6009_v55, %s5097_s25 }
 0x2cd   : > { %2038 = vrot.lane.b32.xlu2 %v1950_v46, %s5097_s25  ;;  %2042 = vrot.lane.b32.xlu1 %v1952_v57, %s5097_s25  ;;  %v2143_v46 = vld [vmem:[#allocation2 + $0x152] sm:$0xff] }
 0x2ce   : > { %v1834_v31 = vpop.permute.xlu0 %1833 }
 0x2cf   : > { %v1844_v58 = vpop.permute.xlu2 %1843  ;;  %1912 = vst.msk [vmem:[#allocation4 + $0x90] sm:$0xff] %vm1893_vm10, %v1834_v31  ;;  %v1830_v45 = vpop.permute.xlu1 %1829 }
 0x2d0   : > { %1917 = vst.msk [vmem:[#allocation4 + $0xb8] sm:$0xff] %vm1893_vm10, %v1844_v58 }
 0x2d1   : > { %1910 = vst.msk [vmem:[#allocation4 + $0x80] sm:$0xff] %vm1893_vm10, %v1830_v45  ;;  %v2355_v45 = vld [vmem:[%s7935_s3 + $0x58] sm:$0xff] }
 0x2d2   : > { %2463 = vmatpush.msra.mxu0 %v2355_v45  ;;  %5031 = vmatpush.msra.mxu2 %v2355_v45 }
 0x2d4   : > { %2052 = vrot.lane.b32.xlu0 %v1957_v52, %s5097_s25  ;;  %v2354_v52 = vld [vmem:[%s7935_s3 + $0x50] sm:$0xff] }
 0x2d5   : > { %2044 = vrot.lane.b32.xlu2 %v1953_v56, %s5097_s25  ;;  %2048 = vrot.lane.b32.xlu1 %v5998_v7, %s5097_s25  ;;  %v2353_v56 = vld [vmem:[%s7935_s3 + $0x48] sm:$0xff] }
 0x2d6   : > { %v1840_v55 = vpop.permute.xlu0 %1839  ;;  %2464 = vmatpush.msra.mxu0 %v2354_v52  ;;  %5032 = vmatpush.msra.mxu2 %v2354_v52 }
 0x2d7   : > { %v1850_v24 = vpop.permute.xlu2 %1849  ;;  %1915 = vst.msk [vmem:[#allocation4 + $0xa8] sm:$0xff] %vm1893_vm10, %v1840_v55  ;;  %v1836_v30 = vpop.permute.xlu1 %1835  ;;  %v2144_v55 = vld [vmem:[#allocation2 + $0x15a] sm:$0xff] }
 0x2d8   : > { %1920 = vst.msk [vmem:[#allocation4 + $0xd0] sm:$0xff] %vm1893_vm10, %v1850_v24  ;;  %v2146_v24 = vld [vmem:[#allocation2 + $0x172] sm:$0xff]  ;;  %2465 = vmatpush.msra.mxu0 %v2353_v56  ;;  %5033 = vmatpush.msra.mxu2 %v2353_v56 }
 0x2d9   : > { %1913 = vst.msk [vmem:[#allocation4 + $0x98] sm:$0xff] %vm1893_vm10, %v1836_v30  ;;  %v2352_v30 = vld [vmem:[%s7935_s3 + $0x40] sm:$0xff] }
 0x2da   : > { %2466 = vmatpush.msra.mxu0 %v2352_v30  ;;  %5034 = vmatpush.msra.mxu2 %v2352_v30 }
 0x2dc   : > { %2187 = vrot.lane.b32.xlu0 %v2121_v48, %s5098_s26 }
 0x2dd   : > { %2050 = vrot.lane.b32.xlu2 %v1956_v34, %s5097_s25  ;;  %2183 = vrot.lane.b32.xlu1 %v2119_v40, %s5098_s26  ;;  %s5028_s25 = sshll.u32 %s8168_s10, 4 }
 0x2de   : > { %v1846_v7 = vpop.permute.xlu0 %1845 }
 0x2df   : > { %v1856_v39 = vpop.permute.xlu2 %1855  ;;  %1918 = vst.msk [vmem:[#allocation4 + $0xc0] sm:$0xff] %vm1893_vm10, %v1846_v7  ;;  %v1842_v0 = vpop.permute.xlu1 %1841  ;;  %v2350_v7 = vld [vmem:[%s7935_s3 + $0x30] sm:$0xff] }
 0x2e0   : > { %1923 = vst.msk [vmem:[#allocation4 + $0xe8] sm:$0xff] %vm1893_vm10, %v1856_v39  ;;  %v2349_v39 = vld [vmem:[%s7935_s3 + $0x28] sm:$0xff] }
 0x2e1   : > { %1916 = vst.msk [vmem:[#allocation4 + $0xb0] sm:$0xff] %vm1893_vm10, %v1842_v0  ;;  %v2348_v0 = vld [vmem:[%s7935_s3 + $0x20] sm:$0xff] }
 0x2e4   : > { %2193 = vrot.lane.b32.xlu0 %v2124_v4, %s5098_s26 }
 0x2e5   : > { %2185 = vrot.lane.b32.xlu2 %v2120_v20, %s5098_s26  ;;  %2189 = vrot.lane.b32.xlu1 %v2122_v49, %s5098_s26 }
 0x2e6   : > { %v1852_v17 = vpop.permute.xlu0 %1851 }
 0x2e7   : > { %v1991_v14 = vpop.permute.xlu2 %1990  ;;  %1921 = vst.msk [vmem:[#allocation4 + $0xd8] sm:$0xff] %vm1893_vm10, %v1852_v17  ;;  %v1848_v63 = vpop.permute.xlu1 %1847  ;;  %v2346_v17 = vld [vmem:[%s7935_s3 + $0x10] sm:$0xff] }
 0x2e8   : > { %2087 = vst.msk [vmem:[#allocation4] sm:$0xff] %vm2086_vm11, %v1991_v14  ;;  %v2345_v14 = vld [vmem:[%s7935_s3 + $0x8] sm:$0xff] }
 0x2e9   : > { %1919 = vst.msk [vmem:[#allocation4 + $0xc8] sm:$0xff] %vm1893_vm10, %v1848_v63  ;;  %v2344_v63 = vld [vmem:[%s7935_s3] sm:$0xff] }
 0x2ec   : > { %2199 = vrot.lane.b32.xlu0 %v2127_v10, %s5098_s26 }
 0x2ed   : > { %2191 = vrot.lane.b32.xlu2 %v2123_v5, %s5098_s26  ;;  %2195 = vrot.lane.b32.xlu1 %v2125_v29, %s5098_s26 }
 0x2ee   : > { %v1858_v23 = vpop.permute.xlu0 %1857 }
 0x2ef   : > { %v1997_v19 = vpop.permute.xlu2 %1996  ;;  %1924 = vst.msk [vmem:[#allocation4 + $0xf0] sm:$0xff] %vm1893_vm10, %v1858_v23  ;;  %v1854_v38 = vpop.permute.xlu1 %1853 }
 0x2f0   : > { %2090 = vst.msk [vmem:[#allocation4 + $0x18] sm:$0xff] %vm2086_vm11, %v1997_v19 }
 0x2f1   : > { %1922 = vst.msk [vmem:[#allocation4 + $0xe0] sm:$0xff] %vm1893_vm10, %v1854_v38 }
 0x2f4   : > { %2205 = vrot.lane.b32.xlu0 %v2130_v33, %s5098_s26 }
 0x2f5   : > { %2197 = vrot.lane.b32.xlu2 %v2126_v11, %s5098_s26  ;;  %2201 = vrot.lane.b32.xlu1 %v2128_v28, %s5098_s26 }
 0x2f6   : > { %v1993_v44 = vpop.permute.xlu0 %1992 }
 0x2f7   : > { %v2003_v41 = vpop.permute.xlu2 %2002  ;;  %2088 = vst.msk [vmem:[#allocation4 + $0x8] sm:$0xff] %vm2086_vm11, %v1993_v44  ;;  %v1860_v51 = vpop.permute.xlu1 %1859 }
 0x2f8   : > { %2093 = vst.msk [vmem:[#allocation4 + $0x30] sm:$0xff] %vm2086_vm11, %v2003_v41 }
 0x2f9   : > { %1925 = vst.msk [vmem:[#allocation4 + $0xf8] sm:$0xff] %vm1893_vm10, %v1860_v51  ;;  %vm4359_vm10 = vcmask 588800  }
 0x2fc   : > { %2211 = vrot.lane.b32.xlu0 %v2133_v47, %s5098_s26 }
 0x2fd   : > { %2203 = vrot.lane.b32.xlu2 %v2129_v43, %s5098_s26  ;;  %2207 = vrot.lane.b32.xlu1 %v2131_v62, %s5098_s26 }
 0x2fe   : > { %v1999_v60 = vpop.permute.xlu0 %1998 }
 0x2ff   : > { %v2009_v2 = vpop.permute.xlu2 %2008  ;;  %2091 = vst.msk [vmem:[#allocation4 + $0x20] sm:$0xff] %vm2086_vm11, %v1999_v60  ;;  %v1995_v54 = vpop.permute.xlu1 %1994 }
 0x300   : > { %2096 = vst.msk [vmem:[#allocation4 + $0x48] sm:$0xff] %vm2086_vm11, %v2009_v2 }
 0x301   : > { %2089 = vst.msk [vmem:[#allocation4 + $0x10] sm:$0xff] %vm2086_vm11, %v1995_v54 }
 0x304   : > { %2217 = vrot.lane.b32.xlu0 %v2136_v50, %s5098_s26 }
 0x305   : > { %2209 = vrot.lane.b32.xlu2 %v2132_v6, %s5098_s26  ;;  %2213 = vrot.lane.b32.xlu1 %v2134_v8, %s5098_s26 }
 0x306   : > { %v2005_v12 = vpop.permute.xlu0 %2004 }
 0x307   : > { %v2015_v61 = vpop.permute.xlu2 %2014  ;;  %2094 = vst.msk [vmem:[#allocation4 + $0x38] sm:$0xff] %vm2086_vm11, %v2005_v12  ;;  %v2001_v13 = vpop.permute.xlu1 %2000 }
 0x308   : > { %2099 = vst.msk [vmem:[#allocation4 + $0x60] sm:$0xff] %vm2086_vm11, %v2015_v61 }
 0x309   : > { %2092 = vst.msk [vmem:[#allocation4 + $0x28] sm:$0xff] %vm2086_vm11, %v2001_v13 }
 0x30c   : > { %2223 = vrot.lane.b32.xlu0 %v2139_v15, %s5098_s26 }
 0x30d   : > { %2215 = vrot.lane.b32.xlu2 %v2135_v1, %s5098_s26  ;;  %2219 = vrot.lane.b32.xlu1 %v2137_v27, %s5098_s26 }
 0x30e   : > { %v2011_v25 = vpop.permute.xlu0 %2010 }
 0x30f   : > { %v2021_v22 = vpop.permute.xlu2 %2020  ;;  %2097 = vst.msk [vmem:[#allocation4 + $0x50] sm:$0xff] %vm2086_vm11, %v2011_v25  ;;  %v2007_v18 = vpop.permute.xlu1 %2006 }
 0x310   : > { %2102 = vst.msk [vmem:[#allocation4 + $0x78] sm:$0xff] %vm2086_vm11, %v2021_v22 }
 0x311   : > { %2095 = vst.msk [vmem:[#allocation4 + $0x40] sm:$0xff] %vm2086_vm11, %v2007_v18 }
 0x314   : > { %2229 = vrot.lane.b32.xlu0 %v2142_v9, %s5098_s26 }
 0x315   : > { %2221 = vrot.lane.b32.xlu2 %v2138_v42, %s5098_s26  ;;  %2225 = vrot.lane.b32.xlu1 %v2140_v32, %s5098_s26 }
 0x316   : > { %v2017_v16 = vpop.permute.xlu0 %2016 }
 0x317   : > { %v2027_v3 = vpop.permute.xlu2 %2026  ;;  %2100 = vst.msk [vmem:[#allocation4 + $0x68] sm:$0xff] %vm2086_vm11, %v2017_v16  ;;  %v2013_v53 = vpop.permute.xlu1 %2012 }
 0x318   : > { %2105 = vst.msk [vmem:[#allocation4 + $0x90] sm:$0xff] %vm2086_vm11, %v2027_v3 }
 0x319   : > { %2098 = vst.msk [vmem:[#allocation4 + $0x58] sm:$0xff] %vm2086_vm11, %v2013_v53 }
 0x31c   : > { %2235 = vrot.lane.b32.xlu0 %v2145_v26, %s5098_s26 }
 0x31d   : > { %2227 = vrot.lane.b32.xlu2 %v2141_v21, %s5098_s26  ;;  %2231 = vrot.lane.b32.xlu1 %v2143_v46, %s5098_s26 }
 0x31e   : > { %v2023_v57 = vpop.permute.xlu0 %2022 }
 0x31f   : > { %v2033_v31 = vpop.permute.xlu2 %2032  ;;  %2103 = vst.msk [vmem:[#allocation4 + $0x80] sm:$0xff] %vm2086_vm11, %v2023_v57  ;;  %v2019_v58 = vpop.permute.xlu1 %2018 }
 0x320   : > { %2108 = vst.msk [vmem:[#allocation4 + $0xa8] sm:$0xff] %vm2086_vm11, %v2033_v31 }
 0x321   : > { %2101 = vst.msk [vmem:[#allocation4 + $0x70] sm:$0xff] %vm2086_vm11, %v2019_v58 }
 0x324   : > { %2241 = vrot.lane.b32.xlu0 %v6111_v37, %s5098_s26  ;;  %v2351_v37 = vld [vmem:[%s7935_s3 + $0x38] sm:$0xff] }
 0x325   : > { %2233 = vrot.lane.b32.xlu2 %v2144_v55, %s5098_s26  ;;  %2237 = vrot.lane.b32.xlu1 %v2146_v24, %s5098_s26 }
 0x326   : > { %v2029_v34 = vpop.permute.xlu0 %2028  ;;  %2467 = vmatpush.msra.mxu0 %v2351_v37  ;;  %5035 = vmatpush.msra.mxu2 %v2351_v37 }
 0x327   : > { %v2039_v48 = vpop.permute.xlu2 %2038  ;;  %2106 = vst.msk [vmem:[#allocation4 + $0x98] sm:$0xff] %vm2086_vm11, %v2029_v34  ;;  %v2025_v40 = vpop.permute.xlu1 %2024 }
 0x328   : > { %2111 = vst.msk [vmem:[#allocation4 + $0xc0] sm:$0xff] %vm2086_vm11, %v2039_v48  ;;  %2468 = vmatpush.msra.mxu0 %v2350_v7  ;;  %5036 = vmatpush.msra.mxu2 %v2350_v7 }
 0x329   : > { %2104 = vst.msk [vmem:[#allocation4 + $0x88] sm:$0xff] %vm2086_vm11, %v2025_v40 }
 0x32a   : > { %2469 = vmatpush.msra.mxu0 %v2349_v39  ;;  %5037 = vmatpush.msra.mxu2 %v2349_v39 }
 0x32c   : > { %2470 = vmatpush.msra.mxu0 %v2348_v0  ;;  %5038 = vmatpush.msra.mxu2 %v2348_v0 }
 0x32d   : > { %2239 = vrot.lane.b32.xlu2 %v6102_v35, %s5098_s26  ;;  %v2347_v35 = vld [vmem:[%s7935_s3 + $0x18] sm:$0xff] }
 0x32e   : > { %v2035_v4 = vpop.permute.xlu0 %2034  ;;  %2471 = vmatpush.msra.mxu0 %v2347_v35  ;;  %5039 = vmatpush.msra.mxu2 %v2347_v35  ;;  %v2773_v35 = vld [vmem:[#allocation3 + $0x1] sm:$0xff] }
 0x32f   : > { %v2045_v20 = vpop.permute.xlu2 %2044  ;;  %2109 = vst.msk [vmem:[#allocation4 + $0xb0] sm:$0xff] %vm2086_vm11, %v2035_v4  ;;  %v2031_v49 = vpop.permute.xlu1 %2030  ;;  %v2150_v4 = vld [vmem:[#allocation2 + $0x1a2] sm:$0xff]  ;;  %2837 = vrot.lane.b32.xlu0 %v2773_v35, %s5089_s15 }
 0x330   : > { %2114 = vst.msk [vmem:[#allocation4 + $0xd8] sm:$0xff] %vm2086_vm11, %v2045_v20  ;;  %2472 = vmatpush.msra.mxu0 %v2346_v17  ;;  %5040 = vmatpush.msra.mxu2 %v2346_v17  ;;  %v2149_v17 = vld [vmem:[#allocation2 + $0x19a] sm:$0xff] }
 0x331   : > { %2107 = vst.msk [vmem:[#allocation4 + $0xa0] sm:$0xff] %vm2086_vm11, %v2031_v49  ;;  %2243 = vrot.lane.b32.xlu1 %v2149_v17, %s5098_s26 }
 0x332   : > { %2473 = vmatpush.msra.mxu0 %v2345_v14  ;;  %5041 = vmatpush.msra.mxu2 %v2345_v14 }
 0x334   : > { %2474 = vmatpush.msra.mxu0 %v2344_v63  ;;  %5042 = vmatpush.msra.mxu2 %v2344_v63 }
 0x335   : > { %2245 = vrot.lane.b32.xlu2 %v2150_v4, %s5098_s26 }
 0x336   : > { %v2041_v10 = vpop.permute.xlu0 %2040 }
 0x337   : > { %v2051_v5 = vpop.permute.xlu2 %2050  ;;  %2112 = vst.msk [vmem:[#allocation4 + $0xc8] sm:$0xff] %vm2086_vm11, %v2041_v10  ;;  %v2037_v29 = vpop.permute.xlu1 %2036  ;;  %v8082_v10 = vmov 0.0  }
 0x338   : > { %2117 = vst.msk [vmem:[#allocation4 + $0xf0] sm:$0xff] %vm2086_vm11, %v2051_v5 }
 0x339   : > { %2110 = vst.msk [vmem:[#allocation4 + $0xb8] sm:$0xff] %vm2086_vm11, %v2037_v29 }
 0x33a   : > { %403 = vst.msk [vmem:[#allocation3 + $0x10] sm:$0x3] %vm402_vm15, %v8082_v10 }
 0x33b   : > { %407 = vst.msk [vmem:[#allocation3 + $0x1a8] sm:$0x3] %vm402_vm15, %v8082_v10 }
 0x33c   : > { %410 = vst.msk [vmem:[#allocation3 + $0x18] sm:$0x1] %vm408_vm1, %v8082_v10 }
 0x33d   : > { %409 = vst.msk [vmem:[#allocation3] sm:$0x1] %vm408_vm1, %v8082_v10 }
 0x33e   : > { %v2047_v23 = vpop.permute.xlu0 %2046  ;;  %411 = vst.msk [vmem:[#allocation3 + $0x30] sm:$0x1] %vm408_vm1, %v8082_v10 }
 0x33f   : > { %v2186_v19 = vpop.permute.xlu2 %2185  ;;  %2115 = vst.msk [vmem:[#allocation4 + $0xe0] sm:$0xff] %vm2086_vm11, %v2047_v23  ;;  %v2043_v38 = vpop.permute.xlu1 %2042  ;;  %v6445_v23 = vld [vmem:[%s7937_s5] ss:$0 sm:$0xff] }
 0x340   : > { %2281 = vst.msk [vmem:[#allocation4 + $0x8] sm:$0xff] %vm2279_vm13, %v2186_v19  ;;  %v6450_v19 = vld [vmem:[%s7938_s6] ss:$0 sm:$0xff] }
 0x341   : > { %2113 = vst.msk [vmem:[#allocation4 + $0xd0] sm:$0xff] %vm2086_vm11, %v2043_v38  ;;  %v2774_v38 = vld [vmem:[#allocation3 + $0x9] sm:$0xff] }
 0x342   : > { %2839 = vrot.lane.b32.xlu1 %v2774_v38, %s5089_s15  ;;  %412 = vst.msk [vmem:[#allocation3 + $0x48] sm:$0x1] %vm408_vm1, %v8082_v10 }
 0x343   : > { %413 = vst.msk [vmem:[#allocation3 + $0x60] sm:$0x1] %vm408_vm1, %v8082_v10 }
 0x344   : > { %414 = vst.msk [vmem:[#allocation3 + $0x78] sm:$0x1] %vm408_vm1, %v8082_v10 }
 0x345   : > { %415 = vst.msk [vmem:[#allocation3 + $0x90] sm:$0x1] %vm408_vm1, %v8082_v10 }
 0x346   : > { %v2053_v33 = vpop.permute.xlu0 %2052  ;;  %416 = vst.msk [vmem:[#allocation3 + $0xa8] sm:$0x1] %vm408_vm1, %v8082_v10 }
 0x347   : > { %v2192_v11 = vpop.permute.xlu2 %2191  ;;  %2118 = vst.msk [vmem:[#allocation4 + $0xf8] sm:$0xff] %vm2086_vm11, %v2053_v33  ;;  %v2049_v28 = vpop.permute.xlu1 %2048  ;;  %v2313_v6 = vld [vmem:[#allocation4 + $0x8] sm:$0xff] }
 0x348   : > { %2284 = vst.msk [vmem:[#allocation4 + $0x20] sm:$0xff] %vm2279_vm13, %v2192_v11 }
 0x349   : > { %2116 = vst.msk [vmem:[#allocation4 + $0xe8] sm:$0xff] %vm2086_vm11, %v2049_v28 }
 0x34a   : > { %417 = vst.msk [vmem:[#allocation3 + $0xc0] sm:$0x1] %vm408_vm1, %v8082_v10 }
 0x34b   : > { %418 = vst.msk [vmem:[#allocation3 + $0xd8] sm:$0x1] %vm408_vm1, %v8082_v10 }
 0x34c   : > { %419 = vst.msk [vmem:[#allocation3 + $0xf0] sm:$0x1] %vm408_vm1, %v8082_v10 }
 0x34d   : > { %420 = vst.msk [vmem:[#allocation3 + $0x108] sm:$0x1] %vm408_vm1, %v8082_v10 }
 0x34e   : > { %v2188_v44 = vpop.permute.xlu0 %2187  ;;  %421 = vst.msk [vmem:[#allocation3 + $0x120] sm:$0x1] %vm408_vm1, %v8082_v10 }
 0x34f   : > { %v2198_v41 = vpop.permute.xlu2 %2197  ;;  %2282 = vst.msk [vmem:[#allocation4 + $0x10] sm:$0xff] %vm2279_vm13, %v2188_v44  ;;  %v2184_v51 = vpop.permute.xlu1 %2183  ;;  %v2316_v42 = vld [vmem:[#allocation4 + $0x20] sm:$0xff] }
 0x350   : > { %2287 = vst.msk [vmem:[#allocation4 + $0x38] sm:$0xff] %vm2279_vm13, %v2198_v41 }
 0x351   : > { %2280 = vst.msk [vmem:[#allocation4] sm:$0xff] %vm2279_vm13, %v2184_v51 }
 0x352   : > { %422 = vst.msk [vmem:[#allocation3 + $0x138] sm:$0x1] %vm408_vm1, %v8082_v10 }
 0x353   : > { %423 = vst.msk [vmem:[#allocation3 + $0x150] sm:$0x1] %vm408_vm1, %v8082_v10 }
 0x354   : > { %424 = vst.msk [vmem:[#allocation3 + $0x168] sm:$0x1] %vm408_vm1, %v8082_v10 }
 0x355   : > { %425 = vst.msk [vmem:[#allocation3 + $0x180] sm:$0x1] %vm408_vm1, %v8082_v10 }
 0x356   : > { %v2194_v47 = vpop.permute.xlu0 %2193  ;;  %v2314_v13 = vld [vmem:[#allocation4 + $0x10] sm:$0xff]  ;;  %426 = vst.msk [vmem:[#allocation3 + $0x198] sm:$0x1] %vm408_vm1, %v8082_v10 }
 0x357   : > { %v2204_v43 = vpop.permute.xlu2 %2203  ;;  %2285 = vst.msk [vmem:[#allocation4 + $0x28] sm:$0xff] %vm2279_vm13, %v2194_v47  ;;  %v2190_v62 = vpop.permute.xlu1 %2189  ;;  %v2319_v58 = vld [vmem:[#allocation4 + $0x38] sm:$0xff] }
 0x358   : > { %2290 = vst.msk [vmem:[#allocation4 + $0x50] sm:$0xff] %vm2279_vm13, %v2204_v43  ;;  %v2312_v60 = vld [vmem:[#allocation4] sm:$0xff] }
 0x359   : > { %2283 = vst.msk [vmem:[#allocation4 + $0x18] sm:$0xff] %vm2279_vm13, %v2190_v62  ;;  %4926 = vmatmul.msk.f32.vlgmr.msra.gmra.mxu0 %vm2358_vm14, %v2312_v60 }
 0x35a   : > { %427 = vst.msk [vmem:[#allocation3 + $0x11] sm:$0x1] %vm408_vm1, %v8082_v10 }
 0x35b   : > { %428 = vst.msk [vmem:[#allocation3 + $0x29] sm:$0x1] %vm408_vm1, %v8082_v10 }
 0x35c   : > { %429 = vst.msk [vmem:[#allocation3 + $0x41] sm:$0x1] %vm408_vm1, %v8082_v10 }
 0x35d   : > { %430 = vst.msk [vmem:[#allocation3 + $0x59] sm:$0x1] %vm408_vm1, %v8082_v10 }
 0x35e   : > { %v2200_v2 = vpop.permute.xlu0 %2199  ;;  %v2317_v53 = vld [vmem:[#allocation4 + $0x28] sm:$0xff]  ;;  %431 = vst.msk [vmem:[#allocation3 + $0x71] sm:$0x1] %vm408_vm1, %v8082_v10 }
 0x35f   : > { %v2210_v54 = vpop.permute.xlu2 %2209  ;;  %2288 = vst.msk [vmem:[#allocation4 + $0x40] sm:$0xff] %vm2279_vm13, %v2200_v2  ;;  %v2196_v50 = vpop.permute.xlu1 %2195  ;;  %v2322_v48 = vld [vmem:[#allocation4 + $0x50] sm:$0xff] }
 0x360   : > { %2293 = vst.msk [vmem:[#allocation4 + $0x68] sm:$0xff] %vm2279_vm13, %v2210_v54  ;;  %v2315_v25 = vld [vmem:[#allocation4 + $0x18] sm:$0xff] }
 0x361   : > { %2286 = vst.msk [vmem:[#allocation4 + $0x30] sm:$0xff] %vm2279_vm13, %v2196_v50  ;;  %4927 = vmatmul.msk.f32.gmra.mxu0 %vm2358_vm14, %v2313_v6 }
 0x362   : > { %432 = vst.msk [vmem:[#allocation3 + $0x89] sm:$0x1] %vm408_vm1, %v8082_v10 }
 0x363   : > { %433 = vst.msk [vmem:[#allocation3 + $0xa1] sm:$0x1] %vm408_vm1, %v8082_v10 }
 0x364   : > { %434 = vst.msk [vmem:[#allocation3 + $0xb9] sm:$0x1] %vm408_vm1, %v8082_v10 }
 0x365   : > { %435 = vst.msk [vmem:[#allocation3 + $0xd1] sm:$0x1] %vm408_vm1, %v8082_v10 }
 0x366   : > { %v2206_v8 = vpop.permute.xlu0 %2205  ;;  %v2320_v55 = vld [vmem:[#allocation4 + $0x40] sm:$0xff]  ;;  %436 = vst.msk [vmem:[#allocation3 + $0xe9] sm:$0x1] %vm408_vm1, %v8082_v10 }
 0x367   : > { %v2216_v12 = vpop.permute.xlu2 %2215  ;;  %2291 = vst.msk [vmem:[#allocation4 + $0x58] sm:$0xff] %vm2279_vm13, %v2206_v8  ;;  %v2202_v61 = vpop.permute.xlu1 %2201  ;;  %v2325_v20 = vld [vmem:[#allocation4 + $0x68] sm:$0xff] }
 0x368   : > { %2296 = vst.msk [vmem:[#allocation4 + $0x80] sm:$0xff] %vm2279_vm13, %v2216_v12  ;;  %v2318_v21 = vld [vmem:[#allocation4 + $0x30] sm:$0xff] }
 0x369   : > { %2289 = vst.msk [vmem:[#allocation4 + $0x48] sm:$0xff] %vm2279_vm13, %v2202_v61  ;;  %4928 = vmatmul.msk.f32.gmra.mxu0 %vm2358_vm14, %v2314_v13 }
 0x36a   : > { %437 = vst.msk [vmem:[#allocation3 + $0x101] sm:$0x1] %vm408_vm1, %v8082_v10 }
 0x36b   : > { %438 = vst.msk [vmem:[#allocation3 + $0x119] sm:$0x1] %vm408_vm1, %v8082_v10 }
 0x36c   : > { %439 = vst.msk [vmem:[#allocation3 + $0x131] sm:$0x1] %vm408_vm1, %v8082_v10 }
 0x36d   : > { %440 = vst.msk [vmem:[#allocation3 + $0x149] sm:$0x1] %vm408_vm1, %v8082_v10 }
 0x36e   : > { %v2212_v15 = vpop.permute.xlu0 %2211  ;;  %v2323_v37 = vld [vmem:[#allocation4 + $0x58] sm:$0xff]  ;;  %441 = vst.msk [vmem:[#allocation3 + $0x161] sm:$0x1] %vm408_vm1, %v8082_v10 }
 0x36f   : > { %v2222_v1 = vpop.permute.xlu2 %2221  ;;  %2294 = vst.msk [vmem:[#allocation4 + $0x70] sm:$0xff] %vm2279_vm13, %v2212_v15  ;;  %v2208_v27 = vpop.permute.xlu1 %2207  ;;  %v2328_v28 = vld [vmem:[#allocation4 + $0x80] sm:$0xff] }
 0x370   : > { %2299 = vst.msk [vmem:[#allocation4 + $0x98] sm:$0xff] %vm2279_vm13, %v2222_v1  ;;  %v2321_v30 = vld [vmem:[#allocation4 + $0x48] sm:$0xff] }
 0x371   : > { %2292 = vst.msk [vmem:[#allocation4 + $0x60] sm:$0xff] %vm2279_vm13, %v2208_v27  ;;  %4929 = vmatmul.msk.f32.gmra.mxu0 %vm2358_vm14, %v2315_v25 }
 0x372   : > { %442 = vst.msk [vmem:[#allocation3 + $0x179] sm:$0x1] %vm408_vm1, %v8082_v10 }
 0x373   : > { %443 = vst.msk [vmem:[#allocation3 + $0x191] sm:$0x1] %vm408_vm1, %v8082_v10 }
 0x374   : > { %444 = vst.msk [vmem:[#allocation3 + $0x1a9] sm:$0x1] %vm408_vm1, %v8082_v10 }
 0x376   : > { %v2218_v22 = vpop.permute.xlu0 %2217  ;;  %v2326_v14 = vld [vmem:[#allocation4 + $0x70] sm:$0xff] }
 0x377   : > { %v2228_v18 = vpop.permute.xlu2 %2227  ;;  %2297 = vst.msk [vmem:[#allocation4 + $0x88] sm:$0xff] %vm2279_vm13, %v2218_v22  ;;  %v2214_v9 = vpop.permute.xlu1 %2213  ;;  %v2331_v45 = vld [vmem:[#allocation4 + $0x98] sm:$0xff] }
 0x378   : > { %2302 = vst.msk [vmem:[#allocation4 + $0xb0] sm:$0xff] %vm2279_vm13, %v2228_v18  ;;  %v2324_v39 = vld [vmem:[#allocation4 + $0x60] sm:$0xff] }
 0x379   : > { %2295 = vst.msk [vmem:[#allocation4 + $0x78] sm:$0xff] %vm2279_vm13, %v2214_v9  ;;  %4930 = vmatmul.msk.f32.gmra.mxu0 %vm2358_vm14, %v2316_v42 }
 0x37e   : > { %v2224_v32 = vpop.permute.xlu0 %2223  ;;  %v2329_v62 = vld [vmem:[#allocation4 + $0x88] sm:$0xff] }
 0x37f   : > { %v2234_v16 = vpop.permute.xlu2 %2233  ;;  %2300 = vst.msk [vmem:[#allocation4 + $0xa0] sm:$0xff] %vm2279_vm13, %v2224_v32  ;;  %v2220_v3 = vpop.permute.xlu1 %2219  ;;  %v2334_v40 = vld [vmem:[#allocation4 + $0xb0] sm:$0xff] }
 0x380   : > { %2305 = vst.msk [vmem:[#allocation4 + $0xc8] sm:$0xff] %vm2279_vm13, %v2234_v16  ;;  %v2327_v5 = vld [vmem:[#allocation4 + $0x78] sm:$0xff] }
 0x381   : > { %2298 = vst.msk [vmem:[#allocation4 + $0x90] sm:$0xff] %vm2279_vm13, %v2220_v3  ;;  %4931 = vmatmul.msk.f32.gmra.mxu0 %vm2358_vm14, %v2317_v53 }
 0x386   : > { %v2230_v36 = vpop.permute.xlu0 %2229  ;;  %v2332_v24 = vld [vmem:[#allocation4 + $0xa0] sm:$0xff] }
 0x387   : > { %v2240_v59 = vpop.permute.xlu2 %2239  ;;  %2303 = vst.msk [vmem:[#allocation4 + $0xb8] sm:$0xff] %vm2279_vm13, %v2230_v36  ;;  %v2226_v26 = vpop.permute.xlu1 %2225  ;;  %v2337_v49 = vld [vmem:[#allocation4 + $0xc8] sm:$0xff] }
 0x388   : > { %2308 = vst.msk [vmem:[#allocation4 + $0xe0] sm:$0xff] %vm2279_vm13, %v2240_v59  ;;  %v2330_v46 = vld [vmem:[#allocation4 + $0x90] sm:$0xff] }
 0x389   : > { %2301 = vst.msk [vmem:[#allocation4 + $0xa8] sm:$0xff] %vm2279_vm13, %v2226_v26  ;;  %4932 = vmatmul.msk.f32.gmra.mxu0 %vm2358_vm14, %v2318_v21  ;;  %4944 = vmatmul.msk.f32.vlgmr.msra.gmra.mxu2 %vm2358_vm14, %v2330_v46 }
 0x38e   : > { %v2236_v57 = vpop.permute.xlu0 %2235  ;;  %v2335_v7 = vld [vmem:[#allocation4 + $0xb8] sm:$0xff] }
 0x38f   : > { %2306 = vst.msk [vmem:[#allocation4 + $0xd0] sm:$0xff] %vm2279_vm13, %v2236_v57  ;;  %v2232_v31 = vpop.permute.xlu1 %2231  ;;  %v2340_v44 = vld [vmem:[#allocation4 + $0xe0] sm:$0xff] }
 0x390   : > { %2304 = vst.msk [vmem:[#allocation4 + $0xc0] sm:$0xff] %vm2279_vm13, %v2232_v31  ;;  %v2333_v34 = vld [vmem:[#allocation4 + $0xa8] sm:$0xff] }
 0x391   : > { %4933 = vmatmul.msk.f32.gmra.mxu0 %vm2358_vm14, %v2319_v58  ;;  %4945 = vmatmul.msk.f32.gmra.mxu2 %vm2358_vm14, %v2331_v45 }
 0x396   : > { %v2242_v52 = vpop.permute.xlu0 %2241  ;;  %v2338_v63 = vld [vmem:[#allocation4 + $0xd0] sm:$0xff] }
 0x397   : > { %2309 = vst.msk [vmem:[#allocation4 + $0xe8] sm:$0xff] %vm2279_vm13, %v2242_v52  ;;  %v2238_v56 = vpop.permute.xlu1 %2237  ;;  %v2336_v0 = vld [vmem:[#allocation4 + $0xc0] sm:$0xff] }
 0x398   : > { %2307 = vst.msk [vmem:[#allocation4 + $0xd8] sm:$0xff] %vm2279_vm13, %v2238_v56 }
 0x399   : > { %4934 = vmatmul.msk.f32.gmra.mxu0 %vm2358_vm14, %v2320_v55  ;;  %4946 = vmatmul.msk.f32.gmra.mxu2 %vm2358_vm14, %v2332_v24 }
 0x39e   : > { %v2341_v60 = vld [vmem:[#allocation4 + $0xe8] sm:$0xff] }
 0x39f   : > { %v2339_v29 = vld [vmem:[#allocation4 + $0xd8] sm:$0xff] }
 0x3a1   : > { %4935 = vmatmul.msk.f32.gmra.mxu0 %vm2358_vm14, %v2321_v30  ;;  %4947 = vmatmul.msk.f32.gmra.mxu2 %vm2358_vm14, %v2333_v34 }
 0x3a9   : > { %4936 = vmatmul.msk.f32.gmra.mxu0 %vm2358_vm14, %v2322_v48  ;;  %4948 = vmatmul.msk.f32.gmra.mxu2 %vm2358_vm14, %v2334_v40 }
 0x3b1   : > { %4937 = vmatmul.msk.f32.gmra.mxu0 %vm2358_vm14, %v2323_v37  ;;  %4949 = vmatmul.msk.f32.gmra.mxu2 %vm2358_vm14, %v2335_v7 }
 0x3b9   : > { %4938 = vmatmul.msk.f32.gmra.mxu0 %vm2358_vm14, %v2324_v39  ;;  %4950 = vmatmul.msk.f32.gmra.mxu2 %vm2358_vm14, %v2336_v0 }
 0x3c1   : > { %4939 = vmatmul.msk.f32.gmra.mxu0 %vm2358_vm14, %v2325_v20  ;;  %4951 = vmatmul.msk.f32.gmra.mxu2 %vm2358_vm14, %v2337_v49 }
 0x3c9   : > { %4940 = vmatmul.msk.f32.gmra.mxu0 %vm2358_vm14, %v2326_v14  ;;  %4952 = vmatmul.msk.f32.gmra.mxu2 %vm2358_vm14, %v2338_v63 }
 0x3d1   : > { %4941 = vmatmul.msk.f32.gmra.mxu0 %vm2358_vm14, %v2327_v5  ;;  %4953 = vmatmul.msk.f32.gmra.mxu2 %vm2358_vm14, %v2339_v29  ;;  %v2246_v29 = vpop.permute.xlu2 %2245 }
 0x3d2   : > { %2311 = vst.msk [vmem:[#allocation4 + $0xf8] sm:$0xff] %vm2279_vm13, %v2246_v29 }
 0x3d6   : > { %v2476_v33 = vpop.f32.mrf.mxu0 }
 0x3d7   : > { %v2576_v11 = vmul.f32 %v6445_v23, %v2476_v33 }
 0x3d9   : > { %v6455_v41 = vadd.f32 %v6450_v19, %v2576_v11  ;;  %4942 = vmatmul.msk.f32.gmra.mxu0 %vm2358_vm14, %v2328_v28  ;;  %4954 = vmatmul.msk.f32.gmra.mxu2 %vm2358_vm14, %v2340_v44 }
 0x3db   : > { %8083 = vst [vmem:[#allocation10_spill] sm:$0xff] %v6455_v41  ;;  %v7971_v51 = vmax.f32 %v6455_v41, 0.0 }
 0x3dd   : > { %2677 = vst.msk [vmem:[#allocation3 + $0x19] sm:$0xff] %vm399_vm0, %v7971_v51 }
 0x3de   : > { %v2479_v47 = vpop.f32.mrf.mxu0 }
 0x3df   : > { %v2577_v43 = vmul.f32 %v6445_v23, %v2479_v47 }
 0x3e1   : > { %v6465_v2 = vadd.f32 %v6450_v19, %v2577_v43  ;;  %4943 = vmatmul.msk.f32.gmra.mxu0 %vm2358_vm14, %v2329_v62  ;;  %4955 = vmatmul.msk.f32.gmra.mxu2 %vm2358_vm14, %v2341_v60 }
 0x3e3   : > { %8084 = vst [vmem:[#allocation6_spill] sm:$0xff] %v6465_v2  ;;  %v7972_v54 = vmax.f32 %v6465_v2, 0.0 }
 0x3e4   : > { %v2775_v50 = vld [vmem:[#allocation3 + $0x19] sm:$0xff] }
 0x3e5   : > { %2678 = vst.msk [vmem:[#allocation3 + $0x21] sm:$0xff] %vm399_vm0, %v7972_v54  ;;  %2841 = vrot.lane.b32.xlu2 %v2775_v50, %s5089_s15  ;;  %v6514_v36 = vld [vmem:[#allocation3 + $0x18] sm:$0xff] }
 0x3e6   : > { %v2482_v6 = vpop.f32.mrf.mxu0  ;;  %2743 = vst.msk [vmem:[#allocation5 + $0x10] sm:$0xff] %vm399_vm0, %v6514_v36 }
 0x3e7   : > { %v2578_v8 = vmul.f32 %v6445_v23, %v2482_v6 }
 0x3e9   : > { %v6476_v12 = vadd.f32 %v6450_v19, %v2578_v8 }
 0x3eb   : > { %8085 = vst [vmem:[#allocation13_spill] sm:$0xff] %v6476_v12  ;;  %v7973_v61 = vmax.f32 %v6476_v12, 0.0 }
 0x3ec   : > { %v2776_v13 = vld [vmem:[#allocation3 + $0x21] sm:$0xff] }
 0x3ed   : > { %2679 = vst.msk [vmem:[#allocation3 + $0x31] sm:$0xff] %vm399_vm0, %v7973_v61  ;;  %2843 = vrot.lane.b32.xlu0 %v2776_v13, %s5089_s15  ;;  %v6648_v8 = vld [vmem:[#allocation3 + $0x20] sm:$0xff] }
 0x3ee   : > { %v2485_v15 = vpop.f32.mrf.mxu0  ;;  %2744 = vst.msk [vmem:[#allocation5 + $0x18] sm:$0xff] %vm399_vm0, %v6648_v8 }
 0x3ef   : > { %v2579_v1 = vmul.f32 %v6445_v23, %v2485_v15 }
 0x3f1   : > { %v6485_v27 = vadd.f32 %v6450_v19, %v2579_v1 }
 0x3f3   : > { %8086 = vst [vmem:[#allocation8_spill] sm:$0xff] %v6485_v27  ;;  %v7974_v25 = vmax.f32 %v6485_v27, 0.0 }
 0x3f4   : > { %v2777_v22 = vld [vmem:[#allocation3 + $0x31] sm:$0xff] }
 0x3f5   : > { %2680 = vst.msk [vmem:[#allocation3 + $0x39] sm:$0xff] %vm399_vm0, %v7974_v25  ;;  %2845 = vrot.lane.b32.xlu1 %v2777_v22, %s5089_s15  ;;  %v6656_v1 = vld [vmem:[#allocation3 + $0x30] sm:$0xff] }
 0x3f6   : > { %v2488_v18 = vpop.f32.mrf.mxu0  ;;  %2745 = vst.msk [vmem:[#allocation5 + $0x20] sm:$0xff] %vm399_vm0, %v6656_v1 }
 0x3f7   : > { %v2580_v9 = vmul.f32 %v6445_v23, %v2488_v18 }
 0x3f9   : > { %v6494_v42 = vadd.f32 %v6450_v19, %v2580_v9 }
 0x3fb   : > { %8087 = vst [vmem:[#allocation7_spill] sm:$0xff] %v6494_v42  ;;  %v7975_v32 = vmax.f32 %v6494_v42, 0.0 }
 0x3fc   : > { %v2778_v16 = vld [vmem:[#allocation3 + $0x39] sm:$0xff] }
 0x3fd   : > { %2681 = vst.msk [vmem:[#allocation3 + $0x49] sm:$0xff] %vm399_vm0, %v7975_v32  ;;  %2847 = vrot.lane.b32.xlu2 %v2778_v16, %s5089_s15  ;;  %v6644_v50 = vld [vmem:[#allocation3 + $0x38] sm:$0xff] }
 0x3fe   : > { %v2491_v3 = vpop.f32.mrf.mxu0  ;;  %2746 = vst.msk [vmem:[#allocation5 + $0x28] sm:$0xff] %vm399_vm0, %v6644_v50 }
 0x3ff   : > { %v2581_v53 = vmul.f32 %v6445_v23, %v2491_v3 }
 0x401   : > { %v6519_v59 = vadd.f32 %v6450_v19, %v2581_v53 }
 0x403   : > { %8088 = vst [vmem:[#allocation16_spill] sm:$0xff] %v6519_v59  ;;  %v7976_v26 = vmax.f32 %v6519_v59, 0.0  ;;  %v2967_v59 = vld [vmem:[#allocation3 + $0xa] sm:$0xff] }
 0x404   : > { %v2779_v21 = vld [vmem:[#allocation3 + $0x49] sm:$0xff] }
 0x405   : > { %2682 = vst.msk [vmem:[#allocation3 + $0x51] sm:$0xff] %vm399_vm0, %v7976_v26  ;;  %2849 = vrot.lane.b32.xlu0 %v2779_v21, %s5089_s15  ;;  %v6666_v9 = vld [vmem:[#allocation3 + $0x48] sm:$0xff] }
 0x406   : > { %v2494_v46 = vpop.f32.mrf.mxu0  ;;  %2747 = vst.msk [vmem:[#allocation5 + $0x30] sm:$0xff] %vm399_vm0, %v6666_v9 }
 0x407   : > { %v2582_v57 = vmul.f32 %v6445_v23, %v2494_v46 }
 0x409   : > { %v6542_v31 = vadd.f32 %v6450_v19, %v2582_v57 }
 0x40b   : > { %8089 = vst [vmem:[#allocation11_spill] sm:$0xff] %v6542_v31  ;;  %v7978_v58 = vmax.f32 %v6542_v31, 0.0  ;;  %v6956_v31 = vld [vmem:[#allocation3 + $0x32] sm:$0xff] }
 0x40c   : > { %v2530_v45 = vpop.f32.mrf.mxu2  ;;  %v2780_v52 = vld [vmem:[#allocation3 + $0x51] sm:$0xff] }
 0x40d   : > { %2683 = vst.msk [vmem:[#allocation3 + $0x61] sm:$0xff] %vm399_vm0, %v7978_v58  ;;  %v2594_v56 = vmul.f32 %v6445_v23, %v2530_v45  ;;  %2851 = vrot.lane.b32.xlu1 %v2780_v52, %s5089_s15  ;;  %v6674_v16 = vld [vmem:[#allocation3 + $0x50] sm:$0xff] }
 0x40e   : > { %v2497_v55 = vpop.f32.mrf.mxu0  ;;  %2748 = vst.msk [vmem:[#allocation5 + $0x38] sm:$0xff] %vm399_vm0, %v6674_v16 }
 0x40f   : > { %v6561_v24 = vadd.f32 %v6450_v19, %v2594_v56  ;;  %v2583_v30 = vmul.f32 %v6445_v23, %v2497_v55 }
 0x411   : > { %8090 = vst [vmem:[#allocation9_spill] sm:$0xff] %v6561_v24  ;;  %v7977_v34 = vmax.f32 %v6561_v24, 0.0  ;;  %v6570_v48 = vadd.f32 %v6450_v19, %v2583_v30  ;;  %v6954_v24 = vld [vmem:[#allocation3 + $0x4a] sm:$0xff] }
 0x413   : > { %8091 = vst [vmem:[#allocation19_spill] sm:$0xff] %v6570_v48  ;;  %v7980_v40 = vmax.f32 %v6570_v48, 0.0 }
 0x414   : > { %2695 = vst.msk [vmem:[#allocation3 + $0xf1] sm:$0xff] %vm399_vm0, %v7977_v34  ;;  %v2533_v37 = vpop.f32.mrf.mxu2  ;;  %v2781_v7 = vld [vmem:[#allocation3 + $0x61] sm:$0xff] }
 0x415   : > { %2684 = vst.msk [vmem:[#allocation3 + $0x69] sm:$0xff] %vm399_vm0, %v7980_v40  ;;  %v2595_v39 = vmul.f32 %v6445_v23, %v2533_v37  ;;  %2853 = vrot.lane.b32.xlu2 %v2781_v7, %s5089_s15  ;;  %v6689_v52 = vld [vmem:[#allocation3 + $0x60] sm:$0xff] }
 0x416   : > { %v2500_v0 = vpop.f32.mrf.mxu0  ;;  %2749 = vst.msk [vmem:[#allocation5 + $0x40] sm:$0xff] %vm399_vm0, %v6689_v52 }
 0x417   : > { %v6590_v4 = vadd.f32 %v6450_v19, %v2595_v39  ;;  %v2584_v20 = vmul.f32 %v6445_v23, %v2500_v0 }
 0x419   : > { %8092 = vst [vmem:[#allocation14_spill] sm:$0xff] %v6590_v4  ;;  %v7979_v49 = vmax.f32 %v6590_v4, 0.0  ;;  %v6599_v35 = vadd.f32 %v6450_v19, %v2584_v20 }
 0x41b   : > { %8093 = vst [vmem:[#allocation12_spill] sm:$0xff] %v6599_v35  ;;  %v7982_v17 = vmax.f32 %v6599_v35, 0.0  ;;  %v6706_v20 = vld [vmem:[#allocation3 + $0xf0] sm:$0xff] }
 0x41c   : > { %2696 = vst.msk [vmem:[#allocation3 + $0xf9] sm:$0xff] %vm399_vm0, %v7979_v49  ;;  %v2536_v14 = vpop.f32.mrf.mxu2  ;;  %v2782_v63 = vld [vmem:[#allocation3 + $0x69] sm:$0xff] }
 0x41d   : > { %2685 = vst.msk [vmem:[#allocation3 + $0x79] sm:$0xff] %vm399_vm0, %v7982_v17  ;;  %v2596_v5 = vmul.f32 %v6445_v23, %v2536_v14  ;;  %2855 = vrot.lane.b32.xlu0 %v2782_v63, %s5089_s15 }
 0x41e   : > { %v2503_v38 = vpop.f32.mrf.mxu0  ;;  %2761 = vst.msk [vmem:[#allocation5 + $0xa0] sm:$0xff] %vm399_vm0, %v6706_v20 }
 0x41f   : > { %v6618_v33 = vadd.f32 %v6450_v19, %v2596_v5  ;;  %v2585_v11 = vmul.f32 %v6445_v23, %v2503_v38  ;;  %v6714_v5 = vld [vmem:[#allocation3 + $0x68] sm:$0xff] }
 0x420   : > { %2750 = vst.msk [vmem:[#allocation5 + $0x48] sm:$0xff] %vm399_vm0, %v6714_v5 }
 0x421   : > { %8094 = vst [vmem:[#allocation22_spill] sm:$0xff] %v6618_v33  ;;  %v7981_v28 = vmax.f32 %v6618_v33, 0.0  ;;  %v6627_v44 = vadd.f32 %v6450_v19, %v2585_v11  ;;  %v6985_v33 = vld [vmem:[#allocation3 + $0x62] sm:$0xff] }
 0x423   : > { %8095 = vst [vmem:[#allocation17_spill] sm:$0xff] %v6627_v44  ;;  %v7984_v47 = vmax.f32 %v6627_v44, 0.0 }
 0x424   : > { %2697 = vst.msk [vmem:[#allocation3 + $0x109] sm:$0xff] %vm399_vm0, %v7981_v28  ;;  %v2539_v43 = vpop.f32.mrf.mxu2  ;;  %v2783_v62 = vld [vmem:[#allocation3 + $0x79] sm:$0xff] }
 0x425   : > { %2686 = vst.msk [vmem:[#allocation3 + $0x81] sm:$0xff] %vm399_vm0, %v7984_v47  ;;  %v2597_v60 = vmul.f32 %v6445_v23, %v2539_v43  ;;  %2857 = vrot.lane.b32.xlu1 %v2783_v62, %s5089_s15 }
 0x426   : > { %v2506_v6 = vpop.f32.mrf.mxu0 }
 0x427   : > { %v6651_v13 = vadd.f32 %v6450_v19, %v2597_v60  ;;  %v2586_v15 = vmul.f32 %v6445_v23, %v2506_v6  ;;  %v2709_v6 = vld [vmem:[#allocation3] sm:$0xff] }
 0x428   : > { %2741 = vst.msk [vmem:[#allocation5] sm:$0xff] %vm399_vm0, %v2709_v6  ;;  %v2710_v6 = vld [vmem:[#allocation3 + $0x8] sm:$0xff] }
 0x429   : > { %8096 = vst [vmem:[#allocation15_spill] sm:$0xff] %v6651_v13  ;;  %v7983_v22 = vmax.f32 %v6651_v13, 0.0  ;;  %v6662_v18 = vadd.f32 %v6450_v19, %v2586_v15  ;;  %v2838_v15 = vpop.permute.xlu0 %2837 }
 0x42a   : > { %2934 = vst.msk [vmem:[#allocation5] sm:$0xff] %vm2933_vm2, %v2838_v15 }
 0x42b   : > { %8097 = vst [vmem:[#allocation25_spill] sm:$0xff] %v6662_v18  ;;  %v7986_v10 = vmax.f32 %v6662_v18, 0.0 }
 0x42c   : > { %2698 = vst.msk [vmem:[#allocation3 + $0x111] sm:$0xff] %vm399_vm0, %v7983_v22  ;;  %v2542_v3 = vpop.f32.mrf.mxu2  ;;  %v2784_v53 = vld [vmem:[#allocation3 + $0x81] sm:$0xff] }
 0x42d   : > { %2687 = vst.msk [vmem:[#allocation3 + $0x91] sm:$0xff] %vm399_vm0, %v7986_v10  ;;  %v2598_v21 = vmul.f32 %v6445_v23, %v2542_v3  ;;  %2859 = vrot.lane.b32.xlu2 %v2784_v53, %s5089_s15  ;;  %v2244_v53 = vpop.permute.xlu1 %2243  ;;  %v6769_v51 = vld [vmem:[#allocation3 + $0x80] sm:$0xff] }
 0x42e   : > { %v2509_v46 = vpop.f32.mrf.mxu0  ;;  %2310 = vst.msk [vmem:[#allocation4 + $0xf0] sm:$0xff] %vm2279_vm13, %v2244_v53 }
 0x42f   : > { %v6686_v57 = vadd.f32 %v6450_v19, %v2598_v21  ;;  %v2587_v45 = vmul.f32 %v6445_v23, %v2509_v46  ;;  %2742 = vst.msk [vmem:[#allocation5 + $0x8] sm:$0xff] %vm399_vm0, %v2710_v6 }
 0x430   : > { %2752 = vst.msk [vmem:[#allocation5 + $0x58] sm:$0xff] %vm399_vm0, %v6769_v51 }
 0x431   : > { %8098 = vst [vmem:[#allocation20_spill] sm:$0xff] %v6686_v57  ;;  %v7985_v56 = vmax.f32 %v6686_v57, 0.0  ;;  %v6693_v55 = vadd.f32 %v6450_v19, %v2587_v45 }
 0x433   : > { %8099 = vst [vmem:[#allocation18_spill] sm:$0xff] %v6693_v55  ;;  %v7988_v30 = vmax.f32 %v6693_v55, 0.0  ;;  %v6787_v54 = vld [vmem:[#allocation3 + $0x110] sm:$0xff] }
 0x434   : > { %2699 = vst.msk [vmem:[#allocation3 + $0x121] sm:$0xff] %vm399_vm0, %v7985_v56  ;;  %v2545_v37 = vpop.f32.mrf.mxu2  ;;  %v2785_v7 = vld [vmem:[#allocation3 + $0x91] sm:$0xff] }
 0x435   : > { %2688 = vst.msk [vmem:[#allocation3 + $0x99] sm:$0xff] %vm399_vm0, %v7988_v30  ;;  %v2599_v39 = vmul.f32 %v6445_v23, %v2545_v37  ;;  %2861 = vrot.lane.b32.xlu0 %v2785_v7, %s5089_s15  ;;  %v6738_v37 = vld [vmem:[#allocation3 + $0x78] sm:$0xff]  ;;  %v6795_v32 = vld [vmem:[#allocation3 + $0x90] sm:$0xff] }
 0x436   : > { %v2512_v0 = vpop.f32.mrf.mxu0  ;;  %2751 = vst.msk [vmem:[#allocation5 + $0x50] sm:$0xff] %vm399_vm0, %v6738_v37  ;;  %v7028_v55 = vld [vmem:[#allocation3 + $0x112] sm:$0xff] }
 0x437   : > { %v6709_v14 = vadd.f32 %v6450_v19, %v2599_v39  ;;  %v2588_v63 = vmul.f32 %v6445_v23, %v2512_v0  ;;  %v6745_v0 = vld [vmem:[#allocation3 + $0xf8] sm:$0xff]  ;;  %2764 = vst.msk [vmem:[#allocation5 + $0xb8] sm:$0xff] %vm399_vm0, %v6787_v54 }
 0x438   : > { %2762 = vst.msk [vmem:[#allocation5 + $0xa8] sm:$0xff] %vm399_vm0, %v6745_v0 }
 0x439   : > { %8100 = vst [vmem:[#allocation28_spill] sm:$0xff] %v6709_v14  ;;  %v7987_v29 = vmax.f32 %v6709_v14, 0.0  ;;  %v6718_v38 = vadd.f32 %v6450_v19, %v2588_v63 }
 0x43a   : > { %2753 = vst.msk [vmem:[#allocation5 + $0x60] sm:$0xff] %vm399_vm0, %v6795_v32 }
 0x43b   : > { %8101 = vst [vmem:[#allocation23_spill] sm:$0xff] %v6718_v38  ;;  %v7991_v11 = vmax.f32 %v6718_v38, 0.0  ;;  %v6812_v58 = vld [vmem:[#allocation3 + $0x120] sm:$0xff] }
 0x43c   : > { %2700 = vst.msk [vmem:[#allocation3 + $0x129] sm:$0xff] %vm399_vm0, %v7987_v29  ;;  %v2548_v43 = vpop.f32.mrf.mxu2  ;;  %v2786_v62 = vld [vmem:[#allocation3 + $0x99] sm:$0xff] }
 0x43d   : > { %2689 = vst.msk [vmem:[#allocation3 + $0xa9] sm:$0xff] %vm399_vm0, %v7991_v11  ;;  %v2600_v60 = vmul.f32 %v6445_v23, %v2548_v43  ;;  %2863 = vrot.lane.b32.xlu1 %v2786_v62, %s5089_s15  ;;  %v6821_v17 = vld [vmem:[#allocation3 + $0x98] sm:$0xff] }
 0x43e   : > { %v2515_v3 = vpop.f32.mrf.mxu0  ;;  %2765 = vst.msk [vmem:[#allocation5 + $0xc0] sm:$0xff] %vm399_vm0, %v6812_v58  ;;  %v2978_v48 = vld [vmem:[#allocation3 + $0x92] sm:$0xff]  ;;  %v2979_v44 = vld [vmem:[#allocation3 + $0x9a] sm:$0xff] }
 0x43f   : > { %v6733_v21 = vadd.f32 %v6450_v19, %v2600_v60  ;;  %v2589_v46 = vmul.f32 %v6445_v23, %v2515_v3  ;;  %v2842_v45 = vpop.permute.xlu2 %2841  ;;  %v6761_v3 = vld [vmem:[#allocation3 + $0x108] sm:$0xff]  ;;  %2754 = vst.msk [vmem:[#allocation5 + $0x68] sm:$0xff] %vm399_vm0, %v6821_v17 }
 0x440   : > { %2936 = vst.msk [vmem:[#allocation5 + $0x10] sm:$0xff] %vm2933_vm2, %v2842_v45  ;;  %v2840_v45 = vpop.permute.xlu1 %2839 }
 0x441   : > { %8102 = vst [vmem:[#allocation21_spill] sm:$0xff] %v6733_v21  ;;  %v7990_v7 = vmax.f32 %v6733_v21, 0.0  ;;  %v6742_v39 = vadd.f32 %v6450_v19, %v2589_v46 }
 0x442   : > { %2763 = vst.msk [vmem:[#allocation5 + $0xb0] sm:$0xff] %vm399_vm0, %v6761_v3 }
 0x443   : > { %8103 = vst [vmem:[#allocation26_spill] sm:$0xff] %v6742_v39  ;;  %v7993_v63 = vmax.f32 %v6742_v39, 0.0  ;;  %v6838_v47 = vld [vmem:[#allocation3 + $0x128] sm:$0xff] }
 0x444   : > { %2701 = vst.msk [vmem:[#allocation3 + $0x139] sm:$0xff] %vm399_vm0, %v7990_v7  ;;  %v2551_v43 = vpop.f32.mrf.mxu2  ;;  %v2787_v62 = vld [vmem:[#allocation3 + $0xa9] sm:$0xff] }
 0x445   : > { %2690 = vst.msk [vmem:[#allocation3 + $0xb1] sm:$0xff] %vm399_vm0, %v7993_v63  ;;  %v2601_v60 = vmul.f32 %v6445_v23, %v2551_v43  ;;  %2865 = vrot.lane.b32.xlu2 %v2787_v62, %s5089_s15  ;;  %v6847_v30 = vld [vmem:[#allocation3 + $0xa8] sm:$0xff] }
 0x446   : > { %v2518_v15 = vpop.f32.mrf.mxu0  ;;  %2935 = vst.msk [vmem:[#allocation5 + $0x8] sm:$0xff] %vm2933_vm2, %v2840_v45  ;;  %v6922_v2 = vld [vmem:[#allocation3 + $0x129] sm:$0xff] }
 0x447   : > { %v6764_v53 = vadd.f32 %v6450_v19, %v2601_v60  ;;  %v2590_v46 = vmul.f32 %v6445_v23, %v2518_v15  ;;  %2766 = vst.msk [vmem:[#allocation5 + $0xc8] sm:$0xff] %vm399_vm0, %v6838_v47 }
 0x448   : > { %2755 = vst.msk [vmem:[#allocation5 + $0x70] sm:$0xff] %vm399_vm0, %v6847_v30 }
 0x449   : > { %8104 = vst [vmem:[#allocation24_spill] sm:$0xff] %v6764_v53  ;;  %v7992_v43 = vmax.f32 %v6764_v53, 0.0  ;;  %v6773_v62 = vadd.f32 %v6450_v19, %v2590_v46 }
 0x44b   : > { %8105 = vst [vmem:[#allocation29_spill] sm:$0xff] %v6773_v62  ;;  %v7996_v60 = vmax.f32 %v6773_v62, 0.0  ;;  %v6868_v7 = vld [vmem:[#allocation3 + $0x138] sm:$0xff] }
 0x44c   : > { %2702 = vst.msk [vmem:[#allocation3 + $0x141] sm:$0xff] %vm399_vm0, %v7992_v43  ;;  %v2554_v6 = vpop.f32.mrf.mxu2  ;;  %v2788_v15 = vld [vmem:[#allocation3 + $0xb1] sm:$0xff] }
 0x44d   : > { %2691 = vst.msk [vmem:[#allocation3 + $0xc1] sm:$0xff] %vm399_vm0, %v7996_v60  ;;  %v2602_v46 = vmul.f32 %v6445_v23, %v2554_v6  ;;  %2867 = vrot.lane.b32.xlu0 %v2788_v15, %s5089_s15  ;;  %v6876_v63 = vld [vmem:[#allocation3 + $0xb0] sm:$0xff] }
 0x44e   : > { %v2521_v45 = vpop.f32.mrf.mxu0  ;;  %2767 = vst.msk [vmem:[#allocation5 + $0xd0] sm:$0xff] %vm399_vm0, %v6868_v7  ;;  %v2981_v13 = vld [vmem:[#allocation3 + $0xb2] sm:$0xff]  ;;  %v2980_v14 = vld [vmem:[#allocation3 + $0xaa] sm:$0xff] }
 0x44f   : > { %v6790_v61 = vadd.f32 %v6450_v19, %v2602_v46  ;;  %v2591_v25 = vmul.f32 %v6445_v23, %v2521_v45  ;;  %2756 = vst.msk [vmem:[#allocation5 + $0x78] sm:$0xff] %vm399_vm0, %v6876_v63 }
 0x451   : > { %8106 = vst [vmem:[#allocation27_spill] sm:$0xff] %v6790_v61  ;;  %v7995_v26 = vmax.f32 %v6790_v61, 0.0  ;;  %v6799_v34 = vadd.f32 %v6450_v19, %v2591_v25 }
 0x453   : > { %2703 = vst.msk [vmem:[#allocation3 + $0x151] sm:$0xff] %vm399_vm0, %v7995_v26  ;;  %v7998_v6 = vmax.f32 %v6799_v34, 0.0  ;;  %v2800_v41 = vld [vmem:[#allocation3 + $0x141] sm:$0xff] }
 0x454   : > { %v2557_v15 = vpop.f32.mrf.mxu2  ;;  %v2789_v46 = vld [vmem:[#allocation3 + $0xc1] sm:$0xff] }
 0x455   : > { %2692 = vst.msk [vmem:[#allocation3 + $0xc9] sm:$0xff] %vm399_vm0, %v7998_v6  ;;  %v2603_v45 = vmul.f32 %v6445_v23, %v2557_v15  ;;  %2869 = vrot.lane.b32.xlu1 %v2789_v46, %s5089_s15  ;;  %v6898_v60 = vld [vmem:[#allocation3 + $0xc0] sm:$0xff] }
 0x456   : > { %v2524_v25 = vpop.f32.mrf.mxu0  ;;  %2757 = vst.msk [vmem:[#allocation5 + $0x80] sm:$0xff] %vm399_vm0, %v6898_v60  ;;  %v6902_v6 = vld [vmem:[#allocation3 + $0x121] sm:$0xff] }
 0x457   : > { %v6815_v49 = vadd.f32 %v6450_v19, %v2603_v45  ;;  %v2592_v40 = vmul.f32 %v6445_v23, %v2524_v25  ;;  %v2848_v28 = vpop.permute.xlu2 %2847  ;;  %v7038_v38 = vld [vmem:[#allocation3 + $0x13a] sm:$0xff] }
 0x458   : > { %2939 = vst.msk [vmem:[#allocation5 + $0x28] sm:$0xff] %vm2933_vm2, %v2848_v28 }
 0x459   : > { %8107 = vst [vmem:[#allocation31_spill] sm:$0xff] %v6815_v49  ;;  %v7997_v15 = vmax.f32 %v6815_v49, 0.0  ;;  %v6825_v46 = vadd.f32 %v6450_v19, %v2592_v40 }
 0x45b   : > { %8108 = vst [vmem:[#allocation30_spill] sm:$0xff] %v6825_v46  ;;  %v7989_v45 = vmax.f32 %v6825_v46, 0.0  ;;  %v2966_v46 = vld [vmem:[#allocation3 + $0x2] sm:$0xff] }
 0x45c   : > { %2704 = vst.msk [vmem:[#allocation3 + $0x159] sm:$0xff] %vm399_vm0, %v7997_v15  ;;  %v2560_v25 = vpop.f32.mrf.mxu2  ;;  %v2790_v22 = vld [vmem:[#allocation3 + $0xc9] sm:$0xff]  ;;  %v2799_v15 = vld [vmem:[#allocation3 + $0x139] sm:$0xff] }
 0x45d   : > { %2693 = vst.msk [vmem:[#allocation3 + $0xd9] sm:$0xff] %vm399_vm0, %v7989_v45  ;;  %v2604_v28 = vmul.f32 %v6445_v23, %v2560_v25  ;;  %2871 = vrot.lane.b32.xlu2 %v2790_v22, %s5089_s15  ;;  %v6859_v45 = vld [vmem:[#allocation3 + $0xf1] sm:$0xff]  ;;  %v2982_v57 = vld [vmem:[#allocation3 + $0xc2] sm:$0xff] }
 0x45e   : > { %v2527_v40 = vpop.f32.mrf.mxu0 }
 0x45f   : > { %v6841_v56 = vadd.f32 %v6450_v19, %v2604_v28  ;;  %v2593_v10 = vmul.f32 %v6445_v23, %v2527_v40  ;;  %v2844_v29 = vpop.permute.xlu0 %2843 }
 0x460   : > { %2937 = vst.msk [vmem:[#allocation5 + $0x18] sm:$0xff] %vm2933_vm2, %v2844_v29 }
 0x461   : > { %v7999_v25 = vmax.f32 %v6841_v56, 0.0  ;;  %v6851_v22 = vadd.f32 %v6450_v19, %v2593_v10 }
 0x463   : > { %8109 = vst [vmem:[#allocation32_spill] sm:$0xff] %v6851_v22  ;;  %v7994_v28 = vmax.f32 %v6851_v22, 0.0  ;;  %v2738_v12 = vld [vmem:[#allocation3 + $0x158] sm:$0xff] }
 0x464   : > { %2705 = vst.msk [vmem:[#allocation3 + $0x169] sm:$0xff] %vm399_vm0, %v7999_v25  ;;  %v2563_v40 = vpop.f32.mrf.mxu2  ;;  %v2791_v29 = vld [vmem:[#allocation3 + $0xd9] sm:$0xff]  ;;  %v6911_v25 = vld [vmem:[#allocation3 + $0x150] sm:$0xff] }
 0x465   : > { %2694 = vst.msk [vmem:[#allocation3 + $0xe1] sm:$0xff] %vm399_vm0, %v7994_v28  ;;  %v2605_v10 = vmul.f32 %v6445_v23, %v2563_v40  ;;  %2877 = vrot.lane.b32.xlu2 %v6859_v45, %s5089_s15  ;;  %2873 = vrot.lane.b32.xlu0 %v2791_v29, %s5089_s15  ;;  %v6884_v29 = vld [vmem:[#allocation3 + $0x111] sm:$0xff]  ;;  %v2995_v61 = vld [vmem:[#allocation3 + $0x15a] sm:$0xff] }
 0x466   : > { %2769 = vst.msk [vmem:[#allocation5 + $0xe0] sm:$0xff] %vm399_vm0, %v6911_v25 }
 0x467   : > { %v6871_v11 = vadd.f32 %v6450_v19, %v2605_v10  ;;  %v2846_v43 = vpop.permute.xlu1 %2845  ;;  %v6886_v10 = vld [vmem:[#allocation3 + $0xf9] sm:$0xff]  ;;  %2770 = vst.msk [vmem:[#allocation5 + $0xe8] sm:$0xff] %vm399_vm0, %v2738_v12 }
 0x468   : > { %2938 = vst.msk [vmem:[#allocation5 + $0x20] sm:$0xff] %vm2933_vm2, %v2846_v43  ;;  %v6893_v43 = vld [vmem:[#allocation3 + $0x140] sm:$0xff] }
 0x469   : > { %v8000_v40 = vmax.f32 %v6871_v11, 0.0  ;;  %2768 = vst.msk [vmem:[#allocation5 + $0xd8] sm:$0xff] %vm399_vm0, %v6893_v43 }
 0x46b   : > { %2706 = vst.msk [vmem:[#allocation3 + $0x171] sm:$0xff] %vm399_vm0, %v8000_v40  ;;  %v6916_v40 = vld [vmem:[#allocation3 + $0xc8] sm:$0xff] }
 0x46c   : > { %v2792_v28 = vld [vmem:[#allocation3 + $0xe1] sm:$0xff]  ;;  %2758 = vst.msk [vmem:[#allocation5 + $0x88] sm:$0xff] %vm399_vm0, %v6916_v40 }
 0x46d   : > { %2883 = vrot.lane.b32.xlu2 %v6884_v29, %s5089_s15  ;;  %2879 = vrot.lane.b32.xlu0 %v6886_v10, %s5089_s15  ;;  %v6935_v42 = vld [vmem:[#allocation3 + $0x168] sm:$0xff]  ;;  %v6941_v22 = vld [vmem:[#allocation3 + $0xe0] sm:$0xff] }
 0x46e   : > { %2875 = vrot.lane.b32.xlu1 %v2792_v28, %s5089_s15  ;;  %v6907_v28 = vld [vmem:[#allocation3 + $0x109] sm:$0xff]  ;;  %2771 = vst.msk [vmem:[#allocation5 + $0xf0] sm:$0xff] %vm399_vm0, %v6935_v42  ;;  %v2984_v18 = vld [vmem:[#allocation3 + $0xda] sm:$0xff] }
 0x46f   : > { %v2854_v26 = vpop.permute.xlu2 %2853  ;;  %2760 = vst.msk [vmem:[#allocation5 + $0x98] sm:$0xff] %vm399_vm0, %v6941_v22 }
 0x470   : > { %2942 = vst.msk [vmem:[#allocation5 + $0x40] sm:$0xff] %vm2933_vm2, %v2854_v26 }
 0x475   : > { %2889 = vrot.lane.b32.xlu2 %v2799_v15, %s5089_s15  ;;  %2885 = vrot.lane.b32.xlu0 %v6902_v6, %s5089_s15  ;;  %v2802_v15 = vld [vmem:[#allocation3 + $0x159] sm:$0xff] }
 0x476   : > { %2881 = vrot.lane.b32.xlu1 %v6907_v28, %s5089_s15 }
 0x477   : > { %v2850_v26 = vpop.permute.xlu0 %2849 }
 0x478   : > { %2940 = vst.msk [vmem:[#allocation5 + $0x30] sm:$0xff] %vm2933_vm2, %v2850_v26  ;;  %v6928_v26 = vld [vmem:[#allocation3 + $0xd8] sm:$0xff] }
 0x479   : > { %2759 = vst.msk [vmem:[#allocation5 + $0x90] sm:$0xff] %vm399_vm0, %v6928_v26 }
 0x47d   : > { %2895 = vrot.lane.b32.xlu2 %v2802_v15, %s5089_s15  ;;  %2891 = vrot.lane.b32.xlu0 %v2800_v41, %s5089_s15  ;;  %v2803_v15 = vld [vmem:[#allocation3 + $0x169] sm:$0xff]  ;;  %v2801_v41 = vld [vmem:[#allocation3 + $0x151] sm:$0xff] }
 0x47e   : > { %2887 = vrot.lane.b32.xlu1 %v6922_v2, %s5089_s15 }
 0x47f   : > { %v2852_v27 = vpop.permute.xlu1 %2851 }
 0x480   : > { %2941 = vst.msk [vmem:[#allocation5 + $0x38] sm:$0xff] %vm2933_vm2, %v2852_v27  ;;  %v2342_v27 = vld [vmem:[#allocation4 + $0xf0] sm:$0xff] }
 0x481   : > { %4956 = vmatmul.msk.f32.gmra.mxu2 %vm2358_vm14, %v2342_v27  ;;  %v2343_v27 = vld [vmem:[#allocation4 + $0xf8] sm:$0xff] }
 0x485   : > { %3030 = vrot.lane.b32.xlu2 %v2966_v46, %s5099_s28  ;;  %2897 = vrot.lane.b32.xlu0 %v2803_v15, %s5089_s15  ;;  %v6945_v46 = vld [vmem:[#allocation3 + $0x22] sm:$0xff]  ;;  %v2804_v15 = vld [vmem:[#allocation3 + $0x171] sm:$0xff] }
 0x486   : > { %2893 = vrot.lane.b32.xlu1 %v2801_v41, %s5089_s15  ;;  %v2740_v41 = vld [vmem:[#allocation3 + $0x170] sm:$0xff] }
 0x487   : > { %v2860_v12 = vpop.permute.xlu2 %2859  ;;  %2772 = vst.msk [vmem:[#allocation5 + $0xf8] sm:$0xff] %vm399_vm0, %v2740_v41  ;;  %v6967_v41 = vld [vmem:[#allocation3 + $0x6a] sm:$0xff] }
 0x488   : > { %2945 = vst.msk [vmem:[#allocation5 + $0x58] sm:$0xff] %vm2933_vm2, %v2860_v12 }
 0x489   : > { %4957 = vmatmul.msk.f32.gmra.mxu2 %vm2358_vm14, %v2343_v27  ;;  %v6975_v27 = vld [vmem:[#allocation3 + $0x3a] sm:$0xff] }
 0x48d   : > { %3036 = vrot.lane.b32.xlu2 %v6945_v46, %s5099_s28  ;;  %3032 = vrot.lane.b32.xlu0 %v2967_v59, %s5099_s28  ;;  %v6962_v59 = vld [vmem:[#allocation3 + $0x1a] sm:$0xff] }
 0x48e   : > { %2899 = vrot.lane.b32.xlu1 %v2804_v15, %s5089_s15 }
 0x48f   : > { %v2856_v12 = vpop.permute.xlu0 %2855 }
 0x490   : > { %2943 = vst.msk [vmem:[#allocation5 + $0x48] sm:$0xff] %vm2933_vm2, %v2856_v12  ;;  %v6969_v12 = vld [vmem:[#allocation3 + $0x52] sm:$0xff] }
 0x495   : > { %3042 = vrot.lane.b32.xlu2 %v6954_v24, %s5099_s28  ;;  %3038 = vrot.lane.b32.xlu0 %v6956_v31, %s5099_s28 }
 0x496   : > { %3034 = vrot.lane.b32.xlu1 %v6962_v59, %s5099_s28 }
 0x497   : > { %v2858_v15 = vpop.permute.xlu1 %2857 }
 0x498   : > { %2944 = vst.msk [vmem:[#allocation5 + $0x50] sm:$0xff] %vm2933_vm2, %v2858_v15  ;;  %v6980_v15 = vld [vmem:[#allocation3 + $0x7a] sm:$0xff] }
 0x49d   : > { %3048 = vrot.lane.b32.xlu2 %v6967_v41, %s5099_s28  ;;  %3044 = vrot.lane.b32.xlu0 %v6969_v12, %s5099_s28 }
 0x49e   : > { %3040 = vrot.lane.b32.xlu1 %v6975_v27, %s5099_s28 }
 0x49f   : > { %v2866_v4 = vpop.permute.xlu2 %2865 }
 0x4a0   : > { %2948 = vst.msk [vmem:[#allocation5 + $0x70] sm:$0xff] %vm2933_vm2, %v2866_v4  ;;  %v2977_v4 = vld [vmem:[#allocation3 + $0x82] sm:$0xff] }
 0x4a5   : > { %3054 = vrot.lane.b32.xlu2 %v2978_v48, %s5099_s28  ;;  %3050 = vrot.lane.b32.xlu0 %v6980_v15, %s5099_s28 }
 0x4a6   : > { %3046 = vrot.lane.b32.xlu1 %v6985_v33, %s5099_s28 }
 0x4a7   : > { %v2862_v35 = vpop.permute.xlu0 %2861 }
 0x4a8   : > { %2946 = vst.msk [vmem:[#allocation5 + $0x60] sm:$0xff] %vm2933_vm2, %v2862_v35 }
 0x4ad   : > { %3060 = vrot.lane.b32.xlu2 %v2981_v13, %s5099_s28  ;;  %3056 = vrot.lane.b32.xlu0 %v2979_v44, %s5099_s28  ;;  %v2985_v13 = vld [vmem:[#allocation3 + $0xe2] sm:$0xff]  ;;  %v6998_v44 = vld [vmem:[#allocation3 + $0xfa] sm:$0xff] }
 0x4ae   : > { %3052 = vrot.lane.b32.xlu1 %v2977_v4, %s5099_s28  ;;  %v2983_v4 = vld [vmem:[#allocation3 + $0xca] sm:$0xff] }
 0x4af   : > { %v2864_v48 = vpop.permute.xlu1 %2863 }
 0x4b0   : > { %2947 = vst.msk [vmem:[#allocation5 + $0x68] sm:$0xff] %vm2933_vm2, %v2864_v48 }
 0x4b5   : > { %3062 = vrot.lane.b32.xlu0 %v2982_v57, %s5099_s28  ;;  %3066 = vrot.lane.b32.xlu2 %v2984_v18, %s5099_s28  ;;  %v7006_v18 = vld [vmem:[#allocation3 + $0x10a] sm:$0xff] }
 0x4b6   : > { %3058 = vrot.lane.b32.xlu1 %v2980_v14, %s5099_s28  ;;  %v7008_v14 = vld [vmem:[#allocation3 + $0x122] sm:$0xff] }
 0x4b7   : > { %v2872_v35 = vpop.permute.xlu2 %2871 }
 0x4b8   : > { %2951 = vst.msk [vmem:[#allocation5 + $0x88] sm:$0xff] %vm2933_vm2, %v2872_v35  ;;  %v7014_v35 = vld [vmem:[#allocation3 + $0xf2] sm:$0xff] }
 0x4bd   : > { %3068 = vrot.lane.b32.xlu0 %v2985_v13, %s5099_s28  ;;  %3072 = vrot.lane.b32.xlu2 %v6998_v44, %s5099_s28 }
 0x4be   : > { %3064 = vrot.lane.b32.xlu1 %v2983_v4, %s5099_s28 }
 0x4bf   : > { %v2868_v57 = vpop.permute.xlu0 %2867  ;;  %v2878_v48 = vpop.permute.xlu2 %2877 }
 0x4c0   : > { %2949 = vst.msk [vmem:[#allocation5 + $0x78] sm:$0xff] %vm2933_vm2, %v2868_v57  ;;  %v7020_v57 = vld [vmem:[#allocation3 + $0x12a] sm:$0xff] }
 0x4c1   : > { %2954 = vst.msk [vmem:[#allocation5 + $0xa0] sm:$0xff] %vm2933_vm2, %v2878_v48  ;;  %v7022_v48 = vld [vmem:[#allocation3 + $0x142] sm:$0xff] }
 0x4c5   : > { %3074 = vrot.lane.b32.xlu0 %v7006_v18, %s5099_s28  ;;  %3078 = vrot.lane.b32.xlu2 %v7008_v14, %s5099_s28 }
 0x4c6   : > { %3070 = vrot.lane.b32.xlu1 %v7014_v35, %s5099_s28 }
 0x4c7   : > { %v2870_v13 = vpop.permute.xlu1 %2869  ;;  %v2884_v4 = vpop.permute.xlu2 %2883 }
 0x4c8   : > { %2950 = vst.msk [vmem:[#allocation5 + $0x80] sm:$0xff] %vm2933_vm2, %v2870_v13  ;;  %v7033_v13 = vld [vmem:[#allocation3 + $0x152] sm:$0xff] }
 0x4c9   : > { %2957 = vst.msk [vmem:[#allocation5 + $0xb8] sm:$0xff] %vm2933_vm2, %v2884_v4  ;;  %v2996_v4 = vld [vmem:[#allocation3 + $0x16a] sm:$0xff] }
 0x4cd   : > { %3080 = vrot.lane.b32.xlu0 %v7020_v57, %s5099_s28  ;;  %3084 = vrot.lane.b32.xlu2 %v7022_v48, %s5099_s28 }
 0x4ce   : > { %3076 = vrot.lane.b32.xlu1 %v7028_v55, %s5099_s28 }
 0x4cf   : > { %v2890_v21 = vpop.permute.xlu2 %2889 }
 0x4d0   : > { %2960 = vst.msk [vmem:[#allocation5 + $0xd0] sm:$0xff] %vm2933_vm2, %v2890_v21  ;;  %v2997_v21 = vld [vmem:[#allocation3 + $0x172] sm:$0xff] }
 0x4d5   : > { %3086 = vrot.lane.b32.xlu0 %v7033_v13, %s5099_s28  ;;  %3090 = vrot.lane.b32.xlu2 %v2996_v4, %s5099_s28 }
 0x4d6   : > { %3082 = vrot.lane.b32.xlu1 %v7038_v38, %s5099_s28 }
 0x4d7   : > { %v2896_v53 = vpop.permute.xlu2 %2895  ;;  %v2874_v39 = vpop.permute.xlu0 %2873 }
 0x4d8   : > { %2963 = vst.msk [vmem:[#allocation5 + $0xe8] sm:$0xff] %vm2933_vm2, %v2896_v53 }
 0x4d9   : > { %2952 = vst.msk [vmem:[#allocation5 + $0x90] sm:$0xff] %vm2933_vm2, %v2874_v39 }
 0x4dd   : > { %3092 = vrot.lane.b32.xlu0 %v2997_v21, %s5099_s28  ;;  %3225 = vrot.lane.b32.xlu2 %v6648_v8, %s5092_s20 }
 0x4de   : > { %3088 = vrot.lane.b32.xlu1 %v2995_v61, %s5099_s28  ;;  %s352_s28 = scalar_lea.vmem %s7941_s9, %s5028_s25 }
 0x4df   : > { %v3031_v4 = vpop.permute.xlu2 %3030  ;;  %v2880_v62 = vpop.permute.xlu0 %2879 }
 0x4e0   : > { %3127 = vst.msk [vmem:[#allocation5] sm:$0xff] %vm3126_vm3, %v3031_v4  ;;  %v2876_v49 = vpop.permute.xlu1 %2875 }
 0x4e1   : > { %2955 = vst.msk [vmem:[#allocation5 + $0xa8] sm:$0xff] %vm2933_vm2, %v2880_v62 }
 0x4e2   : > { %2953 = vst.msk [vmem:[#allocation5 + $0x98] sm:$0xff] %vm2933_vm2, %v2876_v49 }
 0x4e5   : > { %3227 = vrot.lane.b32.xlu0 %v6656_v1, %s5092_s20  ;;  %3231 = vrot.lane.b32.xlu2 %v6666_v9, %s5092_s20 }
 0x4e6   : > { %3223 = vrot.lane.b32.xlu1 %v6514_v36, %s5092_s20 }
 0x4e7   : > { %v3037_v61 = vpop.permute.xlu2 %3036  ;;  %v2886_v8 = vpop.permute.xlu0 %2885 }
 0x4e8   : > { %3130 = vst.msk [vmem:[#allocation5 + $0x18] sm:$0xff] %vm3126_vm3, %v3037_v61  ;;  %v2882_v39 = vpop.permute.xlu1 %2881 }
 0x4e9   : > { %2958 = vst.msk [vmem:[#allocation5 + $0xc0] sm:$0xff] %vm2933_vm2, %v2886_v8 }
 0x4ea   : > { %2956 = vst.msk [vmem:[#allocation5 + $0xb0] sm:$0xff] %vm2933_vm2, %v2882_v39 }
 0x4ed   : > { %3233 = vrot.lane.b32.xlu0 %v6674_v16, %s5092_s20  ;;  %3237 = vrot.lane.b32.xlu2 %v6714_v5, %s5092_s20 }
 0x4ee   : > { %3229 = vrot.lane.b32.xlu1 %v6644_v50, %s5092_s20 }
 0x4ef   : > { %v3043_v49 = vpop.permute.xlu2 %3042  ;;  %v2892_v36 = vpop.permute.xlu0 %2891 }
 0x4f0   : > { %3133 = vst.msk [vmem:[#allocation5 + $0x30] sm:$0xff] %vm3126_vm3, %v3043_v49  ;;  %v2888_v53 = vpop.permute.xlu1 %2887 }
 0x4f1   : > { %2961 = vst.msk [vmem:[#allocation5 + $0xd8] sm:$0xff] %vm2933_vm2, %v2892_v36 }
 0x4f2   : > { %2959 = vst.msk [vmem:[#allocation5 + $0xc8] sm:$0xff] %vm2933_vm2, %v2888_v53  ;;  %v5080_v53 = vld [vmem:[%s7938_s6] ss:$0 sm:$0xff] }
 0x4f5   : > { %3239 = vrot.lane.b32.xlu0 %v6738_v37, %s5092_s20  ;;  %3243 = vrot.lane.b32.xlu2 %v6795_v32, %s5092_s20 }
 0x4f6   : > { %3235 = vrot.lane.b32.xlu1 %v6689_v52, %s5092_s20 }
 0x4f7   : > { %v3049_v62 = vpop.permute.xlu2 %3048  ;;  %v2898_v21 = vpop.permute.xlu0 %2897 }
 0x4f8   : > { %3136 = vst.msk [vmem:[#allocation5 + $0x48] sm:$0xff] %vm3126_vm3, %v3049_v62  ;;  %v2894_v4 = vpop.permute.xlu1 %2893 }
 0x4f9   : > { %2964 = vst.msk [vmem:[#allocation5 + $0xf0] sm:$0xff] %vm2933_vm2, %v2898_v21 }
 0x4fa   : > { %2962 = vst.msk [vmem:[#allocation5 + $0xe0] sm:$0xff] %vm2933_vm2, %v2894_v4 }
 0x4fd   : > { %3245 = vrot.lane.b32.xlu0 %v6821_v17, %s5092_s20  ;;  %3249 = vrot.lane.b32.xlu2 %v6876_v63, %s5092_s20 }
 0x4fe   : > { %3241 = vrot.lane.b32.xlu1 %v6769_v51, %s5092_s20 }
 0x4ff   : > { %v3055_v32 = vpop.permute.xlu2 %3054  ;;  %v3033_v37 = vpop.permute.xlu0 %3032 }
 0x500   : > { %3139 = vst.msk [vmem:[#allocation5 + $0x60] sm:$0xff] %vm3126_vm3, %v3055_v32  ;;  %v2900_v61 = vpop.permute.xlu1 %2899 }
 0x501   : > { %3128 = vst.msk [vmem:[#allocation5 + $0x8] sm:$0xff] %vm3126_vm3, %v3033_v37 }
 0x502   : > { %2965 = vst.msk [vmem:[#allocation5 + $0xf8] sm:$0xff] %vm2933_vm2, %v2900_v61  ;;  %v3352_v61 = vld [vmem:[#allocation3 + $0x19] sm:$0xff] }
 0x504   : > { %v2566_v8 = vpop.f32.mrf.mxu2 }
 0x505   : > { %3251 = vrot.lane.b32.xlu0 %v6898_v60, %s5092_s20  ;;  %3255 = vrot.lane.b32.xlu2 %v6928_v26, %s5092_s20  ;;  %v2606_v60 = vmul.f32 %v6445_v23, %v2566_v8  ;;  %v3932_v8 = vld [vmem:[#allocation3 + $0x31] sm:$0xff] }
 0x506   : > { %3247 = vrot.lane.b32.xlu1 %v6847_v30, %s5092_s20 }
 0x507   : > { %v3061_v17 = vpop.permute.xlu2 %3060  ;;  %v3039_v51 = vpop.permute.xlu0 %3038  ;;  %v7104_v39 = vadd.f32 %v6450_v19, %v2606_v60  ;;  %v5079_v19 = vld [vmem:[%s7937_s5] ss:$0 sm:$0xff]  ;;  %v3353_v60 = vld [vmem:[#allocation3 + $0x21] sm:$0xff] }
 0x508   : > { %3142 = vst.msk [vmem:[#allocation5 + $0x78] sm:$0xff] %vm3126_vm3, %v3061_v17  ;;  %v3035_v63 = vpop.permute.xlu1 %3034 }
 0x509   : > { %3131 = vst.msk [vmem:[#allocation5 + $0x20] sm:$0xff] %vm3126_vm3, %v3039_v51 }
 0x50a   : > { %3129 = vst.msk [vmem:[#allocation5 + $0x10] sm:$0xff] %vm3126_vm3, %v3035_v63 }
 0x50c   : > { %v2569_v23 = vpop.f32.mrf.mxu2 }
 0x50d   : > { %3257 = vrot.lane.b32.xlu0 %v6941_v22, %s5092_s20  ;;  %3261 = vrot.lane.b32.xlu2 %v6745_v0, %s5092_s20  ;;  %v2674_v22 = vmax.f32 %v7104_v39, 0.0  ;;  %v2607_v0 = vmul.f32 %v5079_v19, %v2569_v23 }
 0x50e   : > { %3253 = vrot.lane.b32.xlu1 %v6916_v40, %s5092_s20 }
 0x50f   : > { %v3045_v30 = vpop.permute.xlu0 %3044  ;;  %v3067_v26 = vpop.permute.xlu2 %3066  ;;  %2707 = vst.msk [vmem:[#allocation3 + $0x181] sm:$0xff] %vm399_vm0, %v2674_v22  ;;  %v7125_v62 = vadd.f32 %v5080_v53, %v2607_v0 }
 0x510   : > { %3134 = vst.msk [vmem:[#allocation5 + $0x38] sm:$0xff] %vm3126_vm3, %v3045_v30  ;;  %v3041_v49 = vpop.permute.xlu1 %3040 }
 0x511   : > { %3145 = vst.msk [vmem:[#allocation5 + $0x90] sm:$0xff] %vm3126_vm3, %v3067_v26  ;;  %v2675_v4 = vmax.f32 %v7125_v62, 0.0 }
 0x512   : > { %3132 = vst.msk [vmem:[#allocation5 + $0x28] sm:$0xff] %vm3126_vm3, %v3041_v49 }
 0x513   : > { %2708 = vst.msk [vmem:[#allocation3 + $0x189] sm:$0xff] %vm399_vm0, %v2675_v4 }
 0x515   : > { %3263 = vrot.lane.b32.xlu0 %v6761_v3, %s5092_s20  ;;  %3267 = vrot.lane.b32.xlu2 %v6812_v58, %s5092_s20 }
 0x516   : > { %3259 = vrot.lane.b32.xlu1 %v6706_v20, %s5092_s20 }
 0x517   : > { %v3051_v40 = vpop.permute.xlu0 %3050  ;;  %v3073_v36 = vpop.permute.xlu2 %3072 }
 0x518   : > { %3137 = vst.msk [vmem:[#allocation5 + $0x50] sm:$0xff] %vm3126_vm3, %v3051_v40  ;;  %v3047_v21 = vpop.permute.xlu1 %3046 }
 0x519   : > { %3148 = vst.msk [vmem:[#allocation5 + $0xa8] sm:$0xff] %vm3126_vm3, %v3073_v36 }
 0x51a   : > { %3135 = vst.msk [vmem:[#allocation5 + $0x40] sm:$0xff] %vm3126_vm3, %v3047_v21  ;;  %v3934_v21 = vld [vmem:[#allocation3 + $0x49] sm:$0xff] }
 0x51d   : > { %3269 = vrot.lane.b32.xlu0 %v6838_v47, %s5092_s20  ;;  %3273 = vrot.lane.b32.xlu2 %v6893_v43, %s5092_s20 }
 0x51e   : > { %3265 = vrot.lane.b32.xlu1 %v6787_v54, %s5092_s20 }
 0x51f   : > { %v3057_v20 = vpop.permute.xlu0 %3056  ;;  %v3079_v32 = vpop.permute.xlu2 %3078 }
 0x520   : > { %3140 = vst.msk [vmem:[#allocation5 + $0x68] sm:$0xff] %vm3126_vm3, %v3057_v20  ;;  %v3053_v37 = vpop.permute.xlu1 %3052 }
 0x521   : > { %3151 = vst.msk [vmem:[#allocation5 + $0xc0] sm:$0xff] %vm3126_vm3, %v3079_v32 }
 0x522   : > { %3138 = vst.msk [vmem:[#allocation5 + $0x58] sm:$0xff] %vm3126_vm3, %v3053_v37 }
 0x525   : > { %3416 = vrot.lane.b32.xlu0 %v3352_v61, %s5100_s13  ;;  %3803 = vrot.lane.b32.xlu2 %v6656_v1, %s5094_s22 }
 0x526   : > { %3271 = vrot.lane.b32.xlu1 %v6868_v7, %s5092_s20 }
 0x527   : > { %v3063_v17 = vpop.permute.xlu0 %3062  ;;  %v3085_v51 = vpop.permute.xlu2 %3084 }
 0x528   : > { %3143 = vst.msk [vmem:[#allocation5 + $0x80] sm:$0xff] %vm3126_vm3, %v3063_v17  ;;  %v3059_v63 = vpop.permute.xlu1 %3058 }
 0x529   : > { %3154 = vst.msk [vmem:[#allocation5 + $0xd8] sm:$0xff] %vm3126_vm3, %v3085_v51 }
 0x52a   : > { %3141 = vst.msk [vmem:[#allocation5 + $0x70] sm:$0xff] %vm3126_vm3, %v3059_v63  ;;  %v7226_v63 = vld [vmem:[#allocation3 + $0x51] sm:$0xff] }
 0x52d   : > { %3996 = vrot.lane.b32.xlu0 %v3932_v8, %s5101_s14  ;;  %3418 = vrot.lane.b32.xlu2 %v3353_v60, %s5100_s13 }
 0x52e   : > { %3609 = vrot.lane.b32.xlu1 %v6962_v59, %s5102_s16 }
 0x52f   : > { %v3069_v1 = vpop.permute.xlu0 %3068  ;;  %v3091_v30 = vpop.permute.xlu2 %3090 }
 0x530   : > { %3146 = vst.msk [vmem:[#allocation5 + $0x98] sm:$0xff] %vm3126_vm3, %v3069_v1  ;;  %v3065_v26 = vpop.permute.xlu1 %3064 }
 0x531   : > { %3157 = vst.msk [vmem:[#allocation5 + $0xf0] sm:$0xff] %vm3126_vm3, %v3091_v30 }
 0x532   : > { %3144 = vst.msk [vmem:[#allocation5 + $0x88] sm:$0xff] %vm3126_vm3, %v3065_v26  ;;  %v4357_v26 = vld [vmem:[%s7936_s4 + $0x38] sm:$0xff] }
 0x535   : > { %3611 = vrot.lane.b32.xlu0 %v6945_v46, %s5102_s16  ;;  %3805 = vrot.lane.b32.xlu2 %v6644_v50, %s5094_s22 }
 0x536   : > { %4189 = vrot.lane.b32.xlu1 %v6956_v31, %s5103_s17 }
 0x537   : > { %v3075_v59 = vpop.permute.xlu0 %3074  ;;  %v3226_v49 = vpop.permute.xlu2 %3225 }
 0x538   : > { %3149 = vst.msk [vmem:[#allocation5 + $0xb0] sm:$0xff] %vm3126_vm3, %v3075_v59  ;;  %v3071_v23 = vpop.permute.xlu1 %3070  ;;  %v4355_v59 = vld [vmem:[%s7936_s4 + $0x28] sm:$0xff] }
 0x539   : > { %3321 = vst.msk [vmem:[#allocation5 + $0x8] sm:$0xff] %vm3319_vm4, %v3226_v49 }
 0x53a   : > { %3147 = vst.msk [vmem:[#allocation5 + $0xa0] sm:$0xff] %vm3126_vm3, %v3071_v23 }
 0x53d   : > { %3645 = vrot.lane.b32.xlu0 %v7014_v35, %s5102_s16  ;;  %3839 = vrot.lane.b32.xlu2 %v6761_v3, %s5094_s22  ;;  %v3933_v35 = vld [vmem:[#allocation3 + $0x39] sm:$0xff] }
 0x53e   : > { %3452 = vrot.lane.b32.xlu1 %v6859_v45, %s5100_s13 }
 0x53f   : > { %v3081_v50 = vpop.permute.xlu0 %3080  ;;  %v3232_v46 = vpop.permute.xlu2 %3231 }
 0x540   : > { %3152 = vst.msk [vmem:[#allocation5 + $0xc8] sm:$0xff] %vm3126_vm3, %v3081_v50  ;;  %v3077_v19 = vpop.permute.xlu1 %3076  ;;  %v4354_v50 = vld [vmem:[%s7936_s4 + $0x20] sm:$0xff] }
 0x541   : > { %3324 = vst.msk [vmem:[#allocation5 + $0x20] sm:$0xff] %vm3319_vm4, %v3232_v46  ;;  %v4352_v46 = vld [vmem:[%s7936_s4 + $0x10] sm:$0xff] }
 0x542   : > { %3150 = vst.msk [vmem:[#allocation5 + $0xb8] sm:$0xff] %vm3126_vm3, %v3077_v19  ;;  %v4351_v19 = vld [vmem:[%s7936_s4 + $0x8] sm:$0xff] }
 0x545   : > { %4191 = vrot.lane.b32.xlu0 %v6975_v27, %s5103_s17  ;;  %4225 = vrot.lane.b32.xlu2 %v7006_v18, %s5103_s17 }
 0x546   : > { %3998 = vrot.lane.b32.xlu1 %v3933_v35, %s5101_s14 }
 0x547   : > { %v3087_v3 = vpop.permute.xlu0 %3086  ;;  %v3238_v45 = vpop.permute.xlu2 %3237 }
 0x548   : > { %3155 = vst.msk [vmem:[#allocation5 + $0xe0] sm:$0xff] %vm3126_vm3, %v3087_v3  ;;  %v3083_v0 = vpop.permute.xlu1 %3082 }
 0x549   : > { %3327 = vst.msk [vmem:[#allocation5 + $0x38] sm:$0xff] %vm3319_vm4, %v3238_v45  ;;  %v4350_v45 = vld [vmem:[%s7936_s4] sm:$0xff] }
 0x54a   : > { %3153 = vst.msk [vmem:[#allocation5 + $0xd0] sm:$0xff] %vm3126_vm3, %v3083_v0 }
 0x54d   : > { %3420 = vrot.lane.b32.xlu0 %v3932_v8, %s5100_s13  ;;  %3454 = vrot.lane.b32.xlu2 %v6886_v10, %s5100_s13 }
 0x54e   : > { %4032 = vrot.lane.b32.xlu1 %v6907_v28, %s5101_s14 }
 0x54f   : > { %v3093_v40 = vpop.permute.xlu0 %3092  ;;  %v3244_v36 = vpop.permute.xlu2 %3243 }
 0x550   : > { %3158 = vst.msk [vmem:[#allocation5 + $0xf8] sm:$0xff] %vm3126_vm3, %v3093_v40  ;;  %v3089_v53 = vpop.permute.xlu1 %3088 }
 0x551   : > { %3330 = vst.msk [vmem:[#allocation5 + $0x50] sm:$0xff] %vm3319_vm4, %v3244_v36 }
 0x552   : > { %3156 = vst.msk [vmem:[#allocation5 + $0xe8] sm:$0xff] %vm3126_vm3, %v3089_v53 }
 0x555   : > { %3807 = vrot.lane.b32.xlu0 %v6666_v9, %s5094_s22  ;;  %4000 = vrot.lane.b32.xlu2 %v3934_v21, %s5101_s14 }
 0x556   : > { %3613 = vrot.lane.b32.xlu1 %v6956_v31, %s5102_s16 }
 0x557   : > { %v3228_v10 = vpop.permute.xlu0 %3227  ;;  %v3250_v20 = vpop.permute.xlu2 %3249 }
 0x558   : > { %3322 = vst.msk [vmem:[#allocation5 + $0x10] sm:$0xff] %vm3319_vm4, %v3228_v10  ;;  %v3224_v32 = vpop.permute.xlu1 %3223  ;;  %v3937_v10 = vld [vmem:[#allocation3 + $0x69] sm:$0xff] }
 0x559   : > { %3333 = vst.msk [vmem:[#allocation5 + $0x68] sm:$0xff] %vm3319_vm4, %v3250_v20 }
 0x55a   : > { %3320 = vst.msk [vmem:[#allocation5] sm:$0xff] %vm3319_vm4, %v3224_v32  ;;  %v7316_v32 = vld [vmem:[#allocation3 + $0x139] sm:$0xff] }
 0x55d   : > { %3841 = vrot.lane.b32.xlu0 %v6787_v54, %s5094_s22  ;;  %4034 = vrot.lane.b32.xlu2 %v6884_v29, %s5101_s14 }
 0x55e   : > { %3647 = vrot.lane.b32.xlu1 %v6998_v44, %s5102_s16 }
 0x55f   : > { %v3234_v9 = vpop.permute.xlu0 %3233  ;;  %v3256_v31 = vpop.permute.xlu2 %3255 }
 0x560   : > { %3325 = vst.msk [vmem:[#allocation5 + $0x28] sm:$0xff] %vm3319_vm4, %v3234_v9  ;;  %v3230_v37 = vpop.permute.xlu1 %3229 }
 0x561   : > { %3336 = vst.msk [vmem:[#allocation5 + $0x80] sm:$0xff] %vm3319_vm4, %v3256_v31 }
 0x562   : > { %3323 = vst.msk [vmem:[#allocation5 + $0x18] sm:$0xff] %vm3319_vm4, %v3230_v37 }
 0x565   : > { %4227 = vrot.lane.b32.xlu0 %v7028_v55, %s5103_s17  ;;  %3615 = vrot.lane.b32.xlu2 %v6975_v27, %s5102_s16 }
 0x566   : > { %4193 = vrot.lane.b32.xlu1 %v6954_v24, %s5103_s17 }
 0x567   : > { %v3240_v54 = vpop.permute.xlu0 %3239  ;;  %v3262_v44 = vpop.permute.xlu2 %3261 }
 0x568   : > { %3328 = vst.msk [vmem:[#allocation5 + $0x40] sm:$0xff] %vm3319_vm4, %v3240_v54  ;;  %v3236_v61 = vpop.permute.xlu1 %3235  ;;  %v3375_v54 = vld [vmem:[#allocation3 + $0x129] sm:$0xff] }
 0x569   : > { %3339 = vst.msk [vmem:[#allocation5 + $0x98] sm:$0xff] %vm3319_vm4, %v3262_v44 }
 0x56a   : > { %3326 = vst.msk [vmem:[#allocation5 + $0x30] sm:$0xff] %vm3319_vm4, %v3236_v61 }
 0x56d   : > { %3456 = vrot.lane.b32.xlu0 %v6907_v28, %s5100_s13  ;;  %3649 = vrot.lane.b32.xlu2 %v7006_v18, %s5102_s16 }
 0x56e   : > { %3422 = vrot.lane.b32.xlu1 %v3933_v35, %s5100_s13 }
 0x56f   : > { %v3246_v27 = vpop.permute.xlu0 %3245  ;;  %v3268_v17 = vpop.permute.xlu2 %3267 }
 0x570   : > { %3331 = vst.msk [vmem:[#allocation5 + $0x58] sm:$0xff] %vm3319_vm4, %v3246_v27  ;;  %v3242_v51 = vpop.permute.xlu1 %3241  ;;  %v3938_v27 = vld [vmem:[#allocation3 + $0x79] sm:$0xff] }
 0x571   : > { %3342 = vst.msk [vmem:[#allocation5 + $0xb0] sm:$0xff] %vm3319_vm4, %v3268_v17 }
 0x572   : > { %3329 = vst.msk [vmem:[#allocation5 + $0x48] sm:$0xff] %vm3319_vm4, %v3242_v51 }
 0x575   : > { %4002 = vrot.lane.b32.xlu0 %v7226_v63, %s5101_s14  ;;  %4195 = vrot.lane.b32.xlu2 %v6969_v12, %s5103_s17 }
 0x576   : > { %3809 = vrot.lane.b32.xlu1 %v6674_v16, %s5094_s22  ;;  %v4358_v16 = vld [vmem:[%s7936_s4 + $0x40] sm:$0xff] }
 0x577   : > { %v3252_v28 = vpop.permute.xlu0 %3251  ;;  %v3274_v18 = vpop.permute.xlu2 %3273  ;;  %4463 = vmatpush.msra.mxu1 %v4358_v16  ;;  %5043 = vmatpush.msra.mxu3 %v4358_v16 }
 0x578   : > { %3334 = vst.msk [vmem:[#allocation5 + $0x70] sm:$0xff] %vm3319_vm4, %v3252_v28  ;;  %v3248_v8 = vpop.permute.xlu1 %3247 }
 0x579   : > { %3345 = vst.msk [vmem:[#allocation5 + $0xc8] sm:$0xff] %vm3319_vm4, %v3274_v18  ;;  %4464 = vmatpush.msra.mxu1 %v4357_v26  ;;  %5044 = vmatpush.msra.mxu3 %v4357_v26  ;;  %v3955_v18 = vld [vmem:[#allocation3 + $0x141] sm:$0xff] }
 0x57a   : > { %3332 = vst.msk [vmem:[#allocation5 + $0x60] sm:$0xff] %vm3319_vm4, %v3248_v8 }
 0x57d   : > { %4036 = vrot.lane.b32.xlu0 %v6902_v6, %s5101_s14  ;;  %3424 = vrot.lane.b32.xlu2 %v3934_v21, %s5100_s13 }
 0x57e   : > { %3843 = vrot.lane.b32.xlu1 %v6812_v58, %s5094_s22  ;;  %v4356_v58 = vld [vmem:[%s7936_s4 + $0x30] sm:$0xff] }
 0x57f   : > { %v3258_v60 = vpop.permute.xlu0 %3257  ;;  %v7245_v1 = vpop.permute.xlu2 %3803  ;;  %4465 = vmatpush.msra.mxu1 %v4356_v58  ;;  %5045 = vmatpush.msra.mxu3 %v4356_v58 }
 0x580   : > { %3337 = vst.msk [vmem:[#allocation5 + $0x88] sm:$0xff] %vm3319_vm4, %v3258_v60  ;;  %v3254_v30 = vpop.permute.xlu1 %3253  ;;  %v3552_v60 = vld [vmem:[#allocation3 + $0x6a] sm:$0xff] }
 0x581   : > { %3335 = vst.msk [vmem:[#allocation5 + $0x78] sm:$0xff] %vm3319_vm4, %v3254_v30  ;;  %4466 = vmatpush.msra.mxu1 %v4355_v59  ;;  %5046 = vmatpush.msra.mxu3 %v4355_v59 }
 0x583   : > { %4467 = vmatpush.msra.mxu1 %v4354_v50  ;;  %5047 = vmatpush.msra.mxu3 %v4354_v50  ;;  %v3939_v50 = vld [vmem:[#allocation3 + $0x81] sm:$0xff] }
 0x585   : > { %3617 = vrot.lane.b32.xlu0 %v6954_v24, %s5102_s16  ;;  %3811 = vrot.lane.b32.xlu2 %v6689_v52, %s5094_s22  ;;  %v4353_v52 = vld [vmem:[%s7936_s4 + $0x18] sm:$0xff] }
 0x586   : > { %4229 = vrot.lane.b32.xlu1 %v7008_v14, %s5103_s17  ;;  %4468 = vmatpush.msra.mxu1 %v4353_v52 }
 0x587   : > { %v3264_v49 = vpop.permute.xlu0 %3263  ;;  %v3419_v23 = vpop.permute.xlu2 %3418  ;;  %5048 = vmatpush.msra.mxu3 %v4353_v52 }
 0x588   : > { %3340 = vst.msk [vmem:[#allocation5 + $0xa0] sm:$0xff] %vm3319_vm4, %v3264_v49  ;;  %v3260_v24 = vpop.permute.xlu1 %3259  ;;  %4469 = vmatpush.msra.mxu1 %v4352_v46 }
 0x589   : > { %3514 = vst.msk [vmem:[#allocation5 + $0x8] sm:$0xff] %vm3512_vm5, %v3419_v23  ;;  %5049 = vmatpush.msra.mxu3 %v4352_v46 }
 0x58a   : > { %3338 = vst.msk [vmem:[#allocation5 + $0x90] sm:$0xff] %vm3319_vm4, %v3260_v24  ;;  %4470 = vmatpush.msra.mxu1 %v4351_v19 }
 0x58b   : > { %5050 = vmatpush.msra.mxu3 %v4351_v19  ;;  %v3956_v19 = vld [vmem:[#allocation3 + $0x151] sm:$0xff] }
 0x58c   : > { %4471 = vmatpush.msra.mxu1 %v4350_v45 }
 0x58d   : > { %3651 = vrot.lane.b32.xlu0 %v7028_v55, %s5102_s16  ;;  %3845 = vrot.lane.b32.xlu2 %v6838_v47, %s5094_s22  ;;  %v3936_v47 = vld [vmem:[#allocation3 + $0x61] sm:$0xff] }
 0x58e   : > { %3458 = vrot.lane.b32.xlu1 %v6884_v29, %s5100_s13  ;;  %5051 = vmatpush.msra.mxu3 %v4350_v45 }
 0x58f   : > { %v3270_v35 = vpop.permute.xlu0 %3269  ;;  %v3806_v3 = vpop.permute.xlu2 %3805 }
 0x590   : > { %3343 = vst.msk [vmem:[#allocation5 + $0xb8] sm:$0xff] %vm3319_vm4, %v3270_v35  ;;  %v3266_v55 = vpop.permute.xlu1 %3265 }
 0x591   : > { %3341 = vst.msk [vmem:[#allocation5 + $0xa8] sm:$0xff] %vm3319_vm4, %v3266_v55  ;;  %v3747_v55 = vld [vmem:[#allocation3 + $0x90] sm:$0xff] }
 0x595   : > { %4197 = vrot.lane.b32.xlu0 %v6985_v33, %s5103_s17  ;;  %4231 = vrot.lane.b32.xlu2 %v7020_v57, %s5103_s17 }
 0x596   : > { %4004 = vrot.lane.b32.xlu1 %v3936_v47, %s5101_s14 }
 0x597   : > { %v3417_v29 = vpop.permute.xlu0 %3416  ;;  %v3840_v0 = vpop.permute.xlu2 %3839 }
 0x598   : > { %3513 = vst.msk [vmem:[#allocation5] sm:$0xff] %vm3512_vm5, %v3417_v29  ;;  %v3272_v40 = vpop.permute.xlu1 %3271  ;;  %v3553_v29 = vld [vmem:[#allocation3 + $0x7a] sm:$0xff] }
 0x599   : > { %3344 = vst.msk [vmem:[#allocation5 + $0xc0] sm:$0xff] %vm3319_vm4, %v3272_v40 }
 0x59d   : > { %3426 = vrot.lane.b32.xlu0 %v7226_v63, %s5100_s13  ;;  %3460 = vrot.lane.b32.xlu2 %v6902_v6, %s5100_s13 }
 0x59e   : > { %4038 = vrot.lane.b32.xlu1 %v6922_v2, %s5101_s14 }
 0x59f   : > { %v3997_v36 = vpop.permute.xlu0 %3996  ;;  %v4226_v53 = vpop.permute.xlu2 %4225 }
 0x5a0   : > { %v3610_v21 = vpop.permute.xlu1 %3609 }
 0x5a1   : > { %3706 = vst.msk [vmem:[#allocation5] sm:$0xff] %vm3705_vm6, %v3610_v21  ;;  %v7403_v21 = vld [vmem:[#allocation3 + $0x159] sm:$0xff] }
 0x5a2   : > { %3900 = vst.msk [vmem:[#allocation5] sm:$0xff] %vm3899_vm7, %v7245_v1  ;;  %v3746_v1 = vld [vmem:[#allocation3 + $0x80] sm:$0xff] }
 0x5a3   : > { %4093 = vst.msk [vmem:[#allocation5] sm:$0xff] %vm4092_vm8, %v3997_v36 }
 0x5a5   : > { %3813 = vrot.lane.b32.xlu0 %v6714_v5, %s5094_s22  ;;  %4006 = vrot.lane.b32.xlu2 %v3937_v10, %s5101_s14 }
 0x5a6   : > { %3619 = vrot.lane.b32.xlu1 %v6969_v12, %s5102_s16 }
 0x5a7   : > { %v3612_v2 = vpop.permute.xlu0 %3611  ;;  %v3455_v6 = vpop.permute.xlu2 %3454 }
 0x5a8   : > { %3707 = vst.msk [vmem:[#allocation5 + $0x8] sm:$0xff] %vm3705_vm6, %v3612_v2  ;;  %v4190_v20 = vpop.permute.xlu1 %4189 }
 0x5a9   : > { %3901 = vst.msk [vmem:[#allocation5 + $0x8] sm:$0xff] %vm3899_vm7, %v3806_v3 }
 0x5aa   : > { %3532 = vst.msk [vmem:[#allocation5 + $0x98] sm:$0xff] %vm3512_vm5, %v3455_v6 }
 0x5ab   : > { %4286 = vst.msk [vmem:[#allocation5] sm:$0xff] %vm4285_vm9, %v4190_v20 }
 0x5ad   : > { %3847 = vrot.lane.b32.xlu0 %v6868_v7, %s5094_s22  ;;  %4040 = vrot.lane.b32.xlu2 %v7316_v32, %s5101_s14 }
 0x5ae   : > { %3653 = vrot.lane.b32.xlu1 %v7008_v14, %s5102_s16 }
 0x5af   : > { %v3646_v5 = vpop.permute.xlu0 %3645  ;;  %v4001_v12 = vpop.permute.xlu2 %4000 }
 0x5b0   : > { %v3453_v9 = vpop.permute.xlu1 %3452 }
 0x5b1   : > { %3531 = vst.msk [vmem:[#allocation5 + $0x90] sm:$0xff] %vm3512_vm5, %v3453_v9 }
 0x5b2   : > { %3724 = vst.msk [vmem:[#allocation5 + $0x90] sm:$0xff] %vm3705_vm6, %v3646_v5  ;;  %v4318_v31 = vld [vmem:[#allocation5] sm:$0xff]  ;;  %v4150_v5 = vld [vmem:[#allocation3 + $0x15a] sm:$0xff] }
 0x5b3   : > { %3918 = vst.msk [vmem:[#allocation5 + $0x90] sm:$0xff] %vm3899_vm7, %v3840_v0  ;;  %4958 = vmatmul.msk.f32.vlgmr.msra.gmra.mxu1 %vm4359_vm10, %v4318_v31 }
 0x5b5   : > { %4233 = vrot.lane.b32.xlu0 %v7038_v38, %s5103_s17  ;;  %3621 = vrot.lane.b32.xlu2 %v6985_v33, %s5102_s16 }
 0x5b6   : > { %4199 = vrot.lane.b32.xlu1 %v6967_v41, %s5103_s17 }
 0x5b7   : > { %v4192_v7 = vpop.permute.xlu0 %4191  ;;  %v4035_v14 = vpop.permute.xlu2 %4034 }
 0x5b8   : > { %v3999_v37 = vpop.permute.xlu1 %3998 }
 0x5b9   : > { %4094 = vst.msk [vmem:[#allocation5 + $0x8] sm:$0xff] %vm4092_vm8, %v3999_v37 }
 0x5ba   : > { %4287 = vst.msk [vmem:[#allocation5 + $0x8] sm:$0xff] %vm4285_vm9, %v4192_v7 }
 0x5bd   : > { %3462 = vrot.lane.b32.xlu0 %v3375_v54, %s5100_s13  ;;  %3655 = vrot.lane.b32.xlu2 %v7020_v57, %s5102_s16  ;;  %v3745_v57 = vld [vmem:[#allocation3 + $0x78] sm:$0xff] }
 0x5be   : > { %3428 = vrot.lane.b32.xlu1 %v3936_v47, %s5100_s13  ;;  %v7391_v47 = vld [vmem:[#allocation3 + $0x91] sm:$0xff] }
 0x5bf   : > { %v3421_v44 = vpop.permute.xlu0 %3420  ;;  %v3616_v33 = vpop.permute.xlu2 %3615 }
 0x5c0   : > { %3515 = vst.msk [vmem:[#allocation5 + $0x10] sm:$0xff] %vm3512_vm5, %v3421_v44  ;;  %v4033_v41 = vpop.permute.xlu1 %4032 }
 0x5c1   : > { %4111 = vst.msk [vmem:[#allocation5 + $0x90] sm:$0xff] %vm4092_vm8, %v4033_v41  ;;  %v4319_v61 = vld [vmem:[#allocation5 + $0x8] sm:$0xff] }
 0x5c2   : > { %4304 = vst.msk [vmem:[#allocation5 + $0x90] sm:$0xff] %vm4285_vm9, %v4226_v53  ;;  %4959 = vmatmul.msk.f32.gmra.mxu1 %vm4359_vm10, %v4319_v61  ;;  %v7401_v53 = vld [vmem:[#allocation3 + $0x158] sm:$0xff] }
 0x5c5   : > { %4008 = vrot.lane.b32.xlu0 %v3938_v27, %s5101_s14  ;;  %4201 = vrot.lane.b32.xlu2 %v6980_v15, %s5103_s17 }
 0x5c6   : > { %3815 = vrot.lane.b32.xlu1 %v3745_v57, %s5094_s22 }
 0x5c7   : > { %v3808_v17 = vpop.permute.xlu0 %3807  ;;  %v3650_v51 = vpop.permute.xlu2 %3649 }
 0x5c8   : > { %v3614_v63 = vpop.permute.xlu1 %3613 }
 0x5c9   : > { %3708 = vst.msk [vmem:[#allocation5 + $0x10] sm:$0xff] %vm3705_vm6, %v3614_v63  ;;  %v4336_v28 = vld [vmem:[#allocation5 + $0x90] sm:$0xff] }
 0x5ca   : > { %3902 = vst.msk [vmem:[#allocation5 + $0x10] sm:$0xff] %vm3899_vm7, %v3808_v17  ;;  %4976 = vmatmul.msk.f32.vlgmr.msra.gmra.mxu3 %vm4359_vm10, %v4336_v28  ;;  %v7435_v17 = vld [vmem:[#allocation3 + $0x9a] sm:$0xff] }
 0x5cb   : > { %4095 = vst.msk [vmem:[#allocation5 + $0x10] sm:$0xff] %vm4092_vm8, %v4001_v12  ;;  %v4133_v12 = vld [vmem:[#allocation3 + $0x92] sm:$0xff] }
 0x5cd   : > { %4042 = vrot.lane.b32.xlu0 %v3955_v18, %s5101_s14  ;;  %3430 = vrot.lane.b32.xlu2 %v3937_v10, %s5100_s13  ;;  %v3570_v10 = vld [vmem:[#allocation3 + $0x142] sm:$0xff] }
 0x5ce   : > { %3849 = vrot.lane.b32.xlu1 %v6893_v43, %s5094_s22 }
 0x5cf   : > { %v3842_v15 = vpop.permute.xlu0 %3841  ;;  %v4196_v8 = vpop.permute.xlu2 %4195 }
 0x5d0   : > { %v3648_v16 = vpop.permute.xlu1 %3647 }
 0x5d1   : > { %3725 = vst.msk [vmem:[#allocation5 + $0x98] sm:$0xff] %vm3705_vm6, %v3648_v16 }
 0x5d2   : > { %3919 = vst.msk [vmem:[#allocation5 + $0x98] sm:$0xff] %vm3899_vm7, %v3842_v15  ;;  %v3958_v15 = vld [vmem:[#allocation3 + $0x169] sm:$0xff] }
 0x5d3   : > { %4112 = vst.msk [vmem:[#allocation5 + $0x98] sm:$0xff] %vm4092_vm8, %v4035_v14  ;;  %v3748_v14 = vld [vmem:[#allocation3 + $0x98] sm:$0xff] }
 0x5d5   : > { %3623 = vrot.lane.b32.xlu0 %v3552_v60, %s5102_s16  ;;  %3817 = vrot.lane.b32.xlu2 %v3746_v1, %s5094_s22 }
 0x5d6   : > { %4235 = vrot.lane.b32.xlu1 %v7022_v48, %s5103_s17 }
 0x5d7   : > { %v4228_v30 = vpop.permute.xlu0 %4227  ;;  %v3425_v43 = vpop.permute.xlu2 %3424 }
 0x5d8   : > { %4305 = vst.msk [vmem:[#allocation5 + $0x98] sm:$0xff] %vm4285_vm9, %v4228_v30  ;;  %v4194_v26 = vpop.permute.xlu1 %4193 }
 0x5d9   : > { %3517 = vst.msk [vmem:[#allocation5 + $0x20] sm:$0xff] %vm3512_vm5, %v3425_v43 }
 0x5da   : > { %4288 = vst.msk [vmem:[#allocation5 + $0x10] sm:$0xff] %vm4285_vm9, %v4194_v26 }
 0x5dd   : > { %3657 = vrot.lane.b32.xlu0 %v7038_v38, %s5102_s16  ;;  %3851 = vrot.lane.b32.xlu2 %v6911_v25, %s5094_s22  ;;  %v4132_v38 = vld [vmem:[#allocation3 + $0x82] sm:$0xff] }
 0x5de   : > { %3464 = vrot.lane.b32.xlu1 %v7316_v32, %s5100_s13 }
 0x5df   : > { %v3457_v58 = vpop.permute.xlu0 %3456  ;;  %v3812_v48 = vpop.permute.xlu2 %3811  ;;  %v4337_v59 = vld [vmem:[#allocation5 + $0x98] sm:$0xff] }
 0x5e0   : > { %3533 = vst.msk [vmem:[#allocation5 + $0xa0] sm:$0xff] %vm3512_vm5, %v3457_v58  ;;  %v3423_v49 = vpop.permute.xlu1 %3422  ;;  %4977 = vmatmul.msk.f32.gmra.mxu3 %vm4359_vm10, %v4337_v59  ;;  %v7467_v59 = vld [vmem:[#allocation3 + $0xaa] sm:$0xff] }
 0x5e1   : > { %3726 = vst.msk [vmem:[#allocation5 + $0xa0] sm:$0xff] %vm3705_vm6, %v3650_v51  ;;  %v4320_v23 = vld [vmem:[#allocation5 + $0x10] sm:$0xff]  ;;  %v7437_v51 = vld [vmem:[#allocation3 + $0x16a] sm:$0xff] }
 0x5e2   : > { %3516 = vst.msk [vmem:[#allocation5 + $0x18] sm:$0xff] %vm3512_vm5, %v3423_v49  ;;  %4960 = vmatmul.msk.f32.gmra.mxu1 %vm4359_vm10, %v4320_v23  ;;  %v3749_v49 = vld [vmem:[#allocation3 + $0xa8] sm:$0xff] }
 0x5e3   : > { %3709 = vst.msk [vmem:[#allocation5 + $0x18] sm:$0xff] %vm3705_vm6, %v3616_v33  ;;  %v3571_v33 = vld [vmem:[#allocation3 + $0x152] sm:$0xff] }
 0x5e5   : > { %4203 = vrot.lane.b32.xlu0 %v4132_v38, %s5103_s17  ;;  %4237 = vrot.lane.b32.xlu2 %v7033_v13, %s5103_s17 }
 0x5e6   : > { %4010 = vrot.lane.b32.xlu1 %v3939_v50, %s5101_s14 }
 0x5e7   : > { %v4003_v24 = vpop.permute.xlu0 %4002  ;;  %v3846_v52 = vpop.permute.xlu2 %3845 }
 0x5e8   : > { %v3810_v46 = vpop.permute.xlu1 %3809 }
 0x5e9   : > { %3903 = vst.msk [vmem:[#allocation5 + $0x18] sm:$0xff] %vm3899_vm7, %v3810_v46 }
 0x5ea   : > { %4096 = vst.msk [vmem:[#allocation5 + $0x18] sm:$0xff] %vm4092_vm8, %v4003_v24  ;;  %v7477_v24 = vld [vmem:[#allocation3 + $0x171] sm:$0xff] }
 0x5eb   : > { %4289 = vst.msk [vmem:[#allocation5 + $0x18] sm:$0xff] %vm4285_vm9, %v4196_v8 }
 0x5ed   : > { %3432 = vrot.lane.b32.xlu0 %v3938_v27, %s5100_s13  ;;  %3466 = vrot.lane.b32.xlu2 %v3955_v18, %s5100_s13 }
 0x5ee   : > { %4044 = vrot.lane.b32.xlu1 %v3956_v19, %s5101_s14 }
 0x5ef   : > { %v4037_v13 = vpop.permute.xlu0 %4036  ;;  %v4232_v35 = vpop.permute.xlu2 %4231 }
 0x5f0   : > { %v3844_v3 = vpop.permute.xlu1 %3843 }
 0x5f1   : > { %3920 = vst.msk [vmem:[#allocation5 + $0xa0] sm:$0xff] %vm3899_vm7, %v3844_v3  ;;  %v3187_v3 = vld [vmem:[#allocation3 + $0x168] sm:$0xff] }
 0x5f2   : > { %4113 = vst.msk [vmem:[#allocation5 + $0xa0] sm:$0xff] %vm4092_vm8, %v4037_v13  ;;  %v4321_v45 = vld [vmem:[#allocation5 + $0x18] sm:$0xff] }
 0x5f3   : > { %4961 = vmatmul.msk.f32.gmra.mxu1 %vm4359_vm10, %v4321_v45  ;;  %v4152_v45 = vld [vmem:[#allocation3 + $0x172] sm:$0xff] }
 0x5f5   : > { %3819 = vrot.lane.b32.xlu0 %v3747_v55, %s5094_s22  ;;  %4012 = vrot.lane.b32.xlu2 %v7391_v47, %s5101_s14 }
 0x5f6   : > { %3625 = vrot.lane.b32.xlu1 %v3553_v29, %s5102_s16 }
 0x5f7   : > { %v3618_v0 = vpop.permute.xlu0 %3617  ;;  %v3461_v40 = vpop.permute.xlu2 %3460 }
 0x5f8   : > { %3710 = vst.msk [vmem:[#allocation5 + $0x20] sm:$0xff] %vm3705_vm6, %v3618_v0  ;;  %v4230_v36 = vpop.permute.xlu1 %4229  ;;  %v3750_v0 = vld [vmem:[#allocation3 + $0xb0] sm:$0xff] }
 0x5f9   : > { %3904 = vst.msk [vmem:[#allocation5 + $0x20] sm:$0xff] %vm3899_vm7, %v3812_v48  ;;  %v7465_v48 = vld [vmem:[#allocation3 + $0xa9] sm:$0xff] }
 0x5fa   : > { %3535 = vst.msk [vmem:[#allocation5 + $0xb0] sm:$0xff] %vm3512_vm5, %v3461_v40  ;;  %v7493_v40 = vld [vmem:[#allocation3 + $0xb1] sm:$0xff] }
 0x5fb   : > { %4306 = vst.msk [vmem:[#allocation5 + $0xa0] sm:$0xff] %vm4285_vm9, %v4230_v36 }
 0x5fd   : > { %3853 = vrot.lane.b32.xlu0 %v7401_v53, %s5094_s22  ;;  %4046 = vrot.lane.b32.xlu2 %v7403_v21, %s5101_s14 }
 0x5fe   : > { %3659 = vrot.lane.b32.xlu1 %v3570_v10, %s5102_s16 }
 0x5ff   : > { %v3652_v2 = vpop.permute.xlu0 %3651  ;;  %v4007_v6 = vpop.permute.xlu2 %4006 }
 0x600   : > { %v3459_v20 = vpop.permute.xlu1 %3458 }
 0x601   : > { %3534 = vst.msk [vmem:[#allocation5 + $0xa8] sm:$0xff] %vm3512_vm5, %v3459_v20 }
 0x602   : > { %3727 = vst.msk [vmem:[#allocation5 + $0xa8] sm:$0xff] %vm3705_vm6, %v3652_v2  ;;  %v4338_v32 = vld [vmem:[#allocation5 + $0xa0] sm:$0xff]  ;;  %v7504_v2 = vld [vmem:[#allocation3 + $0x180] sm:$0xff] }
 0x603   : > { %3921 = vst.msk [vmem:[#allocation5 + $0xa8] sm:$0xff] %vm3899_vm7, %v3846_v52  ;;  %4978 = vmatmul.msk.f32.gmra.mxu3 %vm4359_vm10, %v4338_v32  ;;  %v3766_v52 = vld [vmem:[#allocation3 + $0x170] sm:$0xff] }
 0x605   : > { %4239 = vrot.lane.b32.xlu0 %v4150_v5, %s5103_s17  ;;  %3275 = vrot.lane.b32.xlu2 %v6911_v25, %s5092_s20 }
 0x606   : > { %4205 = vrot.lane.b32.xlu1 %v4133_v12, %s5103_s17 }
 0x607   : > { %v4198_v9 = vpop.permute.xlu0 %4197  ;;  %v4041_v31 = vpop.permute.xlu2 %4040 }
 0x608   : > { %v4005_v7 = vpop.permute.xlu1 %4004 }
 0x609   : > { %4097 = vst.msk [vmem:[#allocation5 + $0x20] sm:$0xff] %vm4092_vm8, %v4005_v7 }
 0x60a   : > { %4290 = vst.msk [vmem:[#allocation5 + $0x20] sm:$0xff] %vm4285_vm9, %v4198_v9  ;;  %v4136_v9 = vld [vmem:[#allocation3 + $0xb2] sm:$0xff] }
 0x60d   : > { %3627 = vrot.lane.b32.xlu0 %v4132_v38, %s5102_s16  ;;  %3821 = vrot.lane.b32.xlu2 %v3748_v14, %s5094_s22 }
 0x60e   : > { %3434 = vrot.lane.b32.xlu1 %v3939_v50, %s5100_s13 }
 0x60f   : > { %v3427_v37 = vpop.permute.xlu0 %3426  ;;  %v3622_v54 = vpop.permute.xlu2 %3621 }
 0x610   : > { %3518 = vst.msk [vmem:[#allocation5 + $0x28] sm:$0xff] %vm3512_vm5, %v3427_v37  ;;  %v4039_v25 = vpop.permute.xlu1 %4038 }
 0x611   : > { %4114 = vst.msk [vmem:[#allocation5 + $0xa8] sm:$0xff] %vm4092_vm8, %v4039_v25  ;;  %v4322_v44 = vld [vmem:[#allocation5 + $0x20] sm:$0xff] }
 0x612   : > { %4307 = vst.msk [vmem:[#allocation5 + $0xa8] sm:$0xff] %vm4285_vm9, %v4232_v35  ;;  %4962 = vmatmul.msk.f32.gmra.mxu1 %vm4359_vm10, %v4322_v44 }
 0x615   : > { %3661 = vrot.lane.b32.xlu0 %v3571_v33, %s5102_s16  ;;  %3855 = vrot.lane.b32.xlu2 %v6935_v42, %s5094_s22  ;;  %v3941_v42 = vld [vmem:[#allocation3 + $0x99] sm:$0xff] }
 0x616   : > { %3468 = vrot.lane.b32.xlu1 %v3956_v19, %s5100_s13 }
 0x617   : > { %v3814_v41 = vpop.permute.xlu0 %3813  ;;  %v3656_v61 = vpop.permute.xlu2 %3655 }
 0x618   : > { %v3620_v27 = vpop.permute.xlu1 %3619 }
 0x619   : > { %3711 = vst.msk [vmem:[#allocation5 + $0x28] sm:$0xff] %vm3705_vm6, %v3620_v27  ;;  %v4339_v57 = vld [vmem:[#allocation5 + $0xa8] sm:$0xff] }
 0x61a   : > { %3905 = vst.msk [vmem:[#allocation5 + $0x28] sm:$0xff] %vm3899_vm7, %v3814_v41  ;;  %4979 = vmatmul.msk.f32.gmra.mxu3 %vm4359_vm10, %v4339_v57 }
 0x61b   : > { %4098 = vst.msk [vmem:[#allocation5 + $0x28] sm:$0xff] %vm4092_vm8, %v4007_v6  ;;  %v7506_v6 = vld [vmem:[#allocation3 + $0x181] sm:$0xff] }
 0x61d   : > { %4207 = vrot.lane.b32.xlu0 %v7435_v17, %s5103_s17  ;;  %4241 = vrot.lane.b32.xlu2 %v7437_v51, %s5103_s17 }
 0x61e   : > { %4014 = vrot.lane.b32.xlu1 %v3941_v42, %s5101_s14 }
 0x61f   : > { %v3848_v63 = vpop.permute.xlu0 %3847  ;;  %v4202_v28 = vpop.permute.xlu2 %4201 }
 0x620   : > { %v3654_v18 = vpop.permute.xlu1 %3653 }
 0x621   : > { %3728 = vst.msk [vmem:[#allocation5 + $0xb0] sm:$0xff] %vm3705_vm6, %v3654_v18 }
 0x622   : > { %3922 = vst.msk [vmem:[#allocation5 + $0xb0] sm:$0xff] %vm3899_vm7, %v3848_v63  ;;  %v3944_v63 = vld [vmem:[#allocation3 + $0xc1] sm:$0xff] }
 0x623   : > { %4115 = vst.msk [vmem:[#allocation5 + $0xb0] sm:$0xff] %vm4092_vm8, %v4041_v31 }
 0x625   : > { %3436 = vrot.lane.b32.xlu0 %v7391_v47, %s5100_s13  ;;  %3629 = vrot.lane.b32.xlu2 %v4133_v12, %s5102_s16  ;;  %v4153_v12 = vld [vmem:[#allocation3 + $0x182] sm:$0xff] }
 0x626   : > { %4048 = vrot.lane.b32.xlu1 %v3958_v15, %s5101_s14 }
 0x627   : > { %v4234_v8 = vpop.permute.xlu0 %4233  ;;  %v3431_v16 = vpop.permute.xlu2 %3430 }
 0x628   : > { %4308 = vst.msk [vmem:[#allocation5 + $0xb0] sm:$0xff] %vm4285_vm9, %v4234_v8  ;;  %v4200_v60 = vpop.permute.xlu1 %4199  ;;  %v3961_v8 = vld [vmem:[#allocation3 + $0x189] sm:$0xff] }
 0x629   : > { %3520 = vst.msk [vmem:[#allocation5 + $0x38] sm:$0xff] %vm3512_vm5, %v3431_v16 }
 0x62a   : > { %4291 = vst.msk [vmem:[#allocation5 + $0x28] sm:$0xff] %vm4285_vm9, %v4200_v60 }
 0x62d   : > { %3470 = vrot.lane.b32.xlu0 %v7403_v21, %s5100_s13  ;;  %3663 = vrot.lane.b32.xlu2 %v4150_v5, %s5102_s16 }
 0x62e   : > { %3277 = vrot.lane.b32.xlu1 %v7401_v53, %s5092_s20 }
 0x62f   : > { %v3463_v1 = vpop.permute.xlu0 %3462  ;;  %v3818_v30 = vpop.permute.xlu2 %3817  ;;  %v4340_v43 = vld [vmem:[#allocation5 + $0xb0] sm:$0xff] }
 0x630   : > { %3536 = vst.msk [vmem:[#allocation5 + $0xb8] sm:$0xff] %vm3512_vm5, %v3463_v1  ;;  %v3429_v26 = vpop.permute.xlu1 %3428  ;;  %4980 = vmatmul.msk.f32.gmra.mxu3 %vm4359_vm10, %v4340_v43 }
 0x631   : > { %3729 = vst.msk [vmem:[#allocation5 + $0xb8] sm:$0xff] %vm3705_vm6, %v3656_v61  ;;  %v4323_v58 = vld [vmem:[#allocation5 + $0x28] sm:$0xff]  ;;  %v7533_v61 = vld [vmem:[#allocation3 + $0x188] sm:$0xff] }
 0x632   : > { %3519 = vst.msk [vmem:[#allocation5 + $0x30] sm:$0xff] %vm3512_vm5, %v3429_v26  ;;  %4963 = vmatmul.msk.f32.gmra.mxu1 %vm4359_vm10, %v4323_v58 }
 0x633   : > { %3712 = vst.msk [vmem:[#allocation5 + $0x30] sm:$0xff] %vm3705_vm6, %v3622_v54  ;;  %v3751_v54 = vld [vmem:[#allocation3 + $0xc0] sm:$0xff] }
 0x635   : > { %4016 = vrot.lane.b32.xlu0 %v7465_v48, %s5101_s14  ;;  %4209 = vrot.lane.b32.xlu2 %v7467_v59, %s5103_s17 }
 0x636   : > { %3823 = vrot.lane.b32.xlu1 %v3749_v49, %s5094_s22  ;;  %v4138_v49 = vld [vmem:[#allocation3 + $0xca] sm:$0xff] }
 0x637   : > { %v4009_v23 = vpop.permute.xlu0 %4008  ;;  %v3852_v38 = vpop.permute.xlu2 %3851 }
 0x638   : > { %v3816_v50 = vpop.permute.xlu1 %3815 }
 0x639   : > { %3906 = vst.msk [vmem:[#allocation5 + $0x30] sm:$0xff] %vm3899_vm7, %v3816_v50 }
 0x63a   : > { %4099 = vst.msk [vmem:[#allocation5 + $0x30] sm:$0xff] %vm4092_vm8, %v4009_v23  ;;  %v3752_v23 = vld [vmem:[#allocation3 + $0xc8] sm:$0xff] }
 0x63b   : > { %4292 = vst.msk [vmem:[#allocation5 + $0x30] sm:$0xff] %vm4285_vm9, %v4202_v28 }
 0x63d   : > { %4050 = vrot.lane.b32.xlu0 %v7477_v24, %s5101_s14  ;;  %3438 = vrot.lane.b32.xlu2 %v3941_v42, %s5100_s13  ;;  %v7545_v42 = vld [vmem:[#allocation3 + $0x18a] sm:$0xff] }
 0x63e   : > { %3857 = vrot.lane.b32.xlu1 %v3766_v52, %s5094_s22 }
 0x63f   : > { %v4043_v46 = vpop.permute.xlu0 %4042  ;;  %v4238_v19 = vpop.permute.xlu2 %4237 }
 0x640   : > { %v3850_v13 = vpop.permute.xlu1 %3849 }
 0x641   : > { %3923 = vst.msk [vmem:[#allocation5 + $0xb8] sm:$0xff] %vm3899_vm7, %v3850_v13 }
 0x642   : > { %4116 = vst.msk [vmem:[#allocation5 + $0xb8] sm:$0xff] %vm4092_vm8, %v4043_v46  ;;  %v4324_v35 = vld [vmem:[#allocation5 + $0x30] sm:$0xff]  ;;  %v3769_v46 = vld [vmem:[#allocation3 + $0x198] sm:$0xff] }
 0x643   : > { %4964 = vmatmul.msk.f32.gmra.mxu1 %vm4359_vm10, %v4324_v35 }
 0x645   : > { %3279 = vrot.lane.b32.xlu0 %v3187_v3, %s5092_s20  ;;  %3472 = vrot.lane.b32.xlu2 %v3958_v15, %s5100_s13 }
 0x646   : > { %4243 = vrot.lane.b32.xlu1 %v4152_v45, %s5103_s17 }
 0x647   : > { %v3624_v55 = vpop.permute.xlu0 %3623  ;;  %v3467_v47 = vpop.permute.xlu2 %3466 }
 0x648   : > { %3713 = vst.msk [vmem:[#allocation5 + $0x38] sm:$0xff] %vm3705_vm6, %v3624_v55  ;;  %v4236_v29 = vpop.permute.xlu1 %4235 }
 0x649   : > { %3907 = vst.msk [vmem:[#allocation5 + $0x38] sm:$0xff] %vm3899_vm7, %v3818_v30 }
 0x64a   : > { %3538 = vst.msk [vmem:[#allocation5 + $0xc8] sm:$0xff] %vm3512_vm5, %v3467_v47 }
 0x64b   : > { %4309 = vst.msk [vmem:[#allocation5 + $0xb8] sm:$0xff] %vm4285_vm9, %v4236_v29 }
 0x64d   : > { %3825 = vrot.lane.b32.xlu0 %v3750_v0, %s5094_s22  ;;  %4018 = vrot.lane.b32.xlu2 %v7493_v40, %s5101_s14 }
 0x64e   : > { %3631 = vrot.lane.b32.xlu1 %v7435_v17, %s5102_s16 }
 0x64f   : > { %v3658_v36 = vpop.permute.xlu0 %3657  ;;  %v4013_v53 = vpop.permute.xlu2 %4012 }
 0x650   : > { %v3465_v21 = vpop.permute.xlu1 %3464 }
 0x651   : > { %3537 = vst.msk [vmem:[#allocation5 + $0xc0] sm:$0xff] %vm3512_vm5, %v3465_v21 }
 0x652   : > { %3730 = vst.msk [vmem:[#allocation5 + $0xc0] sm:$0xff] %vm3705_vm6, %v3658_v36  ;;  %v4341_v10 = vld [vmem:[#allocation5 + $0xb8] sm:$0xff]  ;;  %v3946_v36 = vld [vmem:[#allocation3 + $0xd9] sm:$0xff] }
 0x653   : > { %3924 = vst.msk [vmem:[#allocation5 + $0xc0] sm:$0xff] %vm3899_vm7, %v3852_v38  ;;  %4981 = vmatmul.msk.f32.gmra.mxu3 %vm4359_vm10, %v4341_v10 }
 0x655   : > { %3859 = vrot.lane.b32.xlu0 %v7504_v2, %s5094_s22  ;;  %4052 = vrot.lane.b32.xlu2 %v7506_v6, %s5101_s14 }
 0x656   : > { %3665 = vrot.lane.b32.xlu1 %v7437_v51, %s5102_s16  ;;  %v7543_v51 = vld [vmem:[#allocation3 + $0xc2] sm:$0xff] }
 0x657   : > { %v4204_v20 = vpop.permute.xlu0 %4203  ;;  %v4047_v32 = vpop.permute.xlu2 %4046 }
 0x658   : > { %v4011_v5 = vpop.permute.xlu1 %4010 }
 0x659   : > { %4100 = vst.msk [vmem:[#allocation5 + $0x38] sm:$0xff] %vm4092_vm8, %v4011_v5 }
 0x65a   : > { %4293 = vst.msk [vmem:[#allocation5 + $0x38] sm:$0xff] %vm4285_vm9, %v4204_v20 }
 0x65d   : > { %4245 = vrot.lane.b32.xlu0 %v4153_v12, %s5103_s17  ;;  %3281 = vrot.lane.b32.xlu2 %v3766_v52, %s5092_s20  ;;  %v3962_v52 = vld [vmem:[#allocation3 + $0x199] sm:$0xff] }
 0x65e   : > { %4211 = vrot.lane.b32.xlu1 %v4136_v9, %s5103_s17 }
 0x65f   : > { %v3433_v31 = vpop.permute.xlu0 %3432  ;;  %v3276_v7 = vpop.permute.xlu2 %3275 }
 0x660   : > { %3521 = vst.msk [vmem:[#allocation5 + $0x40] sm:$0xff] %vm3512_vm5, %v3433_v31  ;;  %v4045_v14 = vpop.permute.xlu1 %4044  ;;  %v4139_v31 = vld [vmem:[#allocation3 + $0xda] sm:$0xff] }
 0x661   : > { %3346 = vst.msk [vmem:[#allocation5 + $0xd0] sm:$0xff] %vm3319_vm4, %v3276_v7  ;;  %v4325_v37 = vld [vmem:[#allocation5 + $0x38] sm:$0xff] }
 0x662   : > { %4117 = vst.msk [vmem:[#allocation5 + $0xc0] sm:$0xff] %vm4092_vm8, %v4045_v14  ;;  %4965 = vmatmul.msk.f32.gmra.mxu1 %vm4359_vm10, %v4325_v37 }
 0x663   : > { %4310 = vst.msk [vmem:[#allocation5 + $0xc0] sm:$0xff] %vm4285_vm9, %v4238_v19 }
 0x665   : > { %3633 = vrot.lane.b32.xlu0 %v7467_v59, %s5102_s16  ;;  %3827 = vrot.lane.b32.xlu2 %v3751_v54, %s5094_s22  ;;  %v7571_v59 = vld [vmem:[#allocation3 + $0xc9] sm:$0xff]  ;;  %v3754_v54 = vld [vmem:[#allocation3 + $0xe0] sm:$0xff] }
 0x666   : > { %3440 = vrot.lane.b32.xlu1 %v7465_v48, %s5100_s13 }
 0x667   : > { %v3820_v25 = vpop.permute.xlu0 %3819  ;;  %v3822_v44 = vpop.permute.xlu2 %3821 }
 0x668   : > { %v3626_v33 = vpop.permute.xlu1 %3625 }
 0x669   : > { %3714 = vst.msk [vmem:[#allocation5 + $0x40] sm:$0xff] %vm3705_vm6, %v3626_v33 }
 0x66a   : > { %3908 = vst.msk [vmem:[#allocation5 + $0x40] sm:$0xff] %vm3899_vm7, %v3820_v25  ;;  %v4342_v41 = vld [vmem:[#allocation5 + $0xc0] sm:$0xff]  ;;  %v4140_v25 = vld [vmem:[#allocation3 + $0xe2] sm:$0xff] }
 0x66b   : > { %4101 = vst.msk [vmem:[#allocation5 + $0x40] sm:$0xff] %vm4092_vm8, %v4013_v53  ;;  %4982 = vmatmul.msk.f32.gmra.mxu3 %vm4359_vm10, %v4342_v41 }
 0x66d   : > { %3667 = vrot.lane.b32.xlu0 %v4152_v45, %s5102_s16  ;;  %3861 = vrot.lane.b32.xlu2 %v7533_v61, %s5094_s22  ;;  %v4155_v45 = vld [vmem:[#allocation3 + $0x19a] sm:$0xff] }
 0x66e   : > { %3474 = vrot.lane.b32.xlu1 %v7477_v24, %s5100_s13 }
 0x66f   : > { %v3854_v27 = vpop.permute.xlu0 %3853  ;;  %v3856_v57 = vpop.permute.xlu2 %3855 }
 0x670   : > { %v3660_v17 = vpop.permute.xlu1 %3659 }
 0x671   : > { %3731 = vst.msk [vmem:[#allocation5 + $0xc8] sm:$0xff] %vm3705_vm6, %v3660_v17 }
 0x672   : > { %3925 = vst.msk [vmem:[#allocation5 + $0xc8] sm:$0xff] %vm3899_vm7, %v3854_v27  ;;  %v3755_v27 = vld [vmem:[#allocation3 + $0xf0] sm:$0xff] }
 0x673   : > { %4118 = vst.msk [vmem:[#allocation5 + $0xc8] sm:$0xff] %vm4092_vm8, %v4047_v32 }
 0x675   : > { %4213 = vrot.lane.b32.xlu0 %v7543_v51, %s5103_s17  ;;  %4247 = vrot.lane.b32.xlu2 %v7545_v42, %s5103_s17 }
 0x676   : > { %4020 = vrot.lane.b32.xlu1 %v3944_v63, %s5101_s14 }
 0x677   : > { %v4240_v28 = vpop.permute.xlu0 %4239  ;;  %v4242_v18 = vpop.permute.xlu2 %4241 }
 0x678   : > { %4311 = vst.msk [vmem:[#allocation5 + $0xc8] sm:$0xff] %vm4285_vm9, %v4240_v28  ;;  %v4206_v15 = vpop.permute.xlu1 %4205 }
 0x679   : > { %4294 = vst.msk [vmem:[#allocation5 + $0x40] sm:$0xff] %vm4285_vm9, %v4206_v15 }
 0x67d   : > { %3442 = vrot.lane.b32.xlu0 %v7493_v40, %s5100_s13  ;;  %3635 = vrot.lane.b32.xlu2 %v4136_v9, %s5102_s16  ;;  %v3753_v40 = vld [vmem:[#allocation3 + $0xd8] sm:$0xff] }
 0x67e   : > { %4054 = vrot.lane.b32.xlu1 %v3961_v8, %s5101_s14 }
 0x67f   : > { %v3628_v16 = vpop.permute.xlu0 %3627  ;;  %v4343_v60 = vld [vmem:[#allocation5 + $0xc8] sm:$0xff]  ;;  %v3630_v1 = vpop.permute.xlu2 %3629 }
 0x680   : > { %4983 = vmatmul.msk.f32.gmra.mxu3 %vm4359_vm10, %v4343_v60  ;;  %v3435_v30 = vpop.permute.xlu1 %3434  ;;  %v4326_v43 = vld [vmem:[#allocation5 + $0x40] sm:$0xff] }
 0x681   : > { %3522 = vst.msk [vmem:[#allocation5 + $0x48] sm:$0xff] %vm3512_vm5, %v3435_v30  ;;  %4966 = vmatmul.msk.f32.gmra.mxu1 %vm4359_vm10, %v4326_v43 }
 0x682   : > { %3715 = vst.msk [vmem:[#allocation5 + $0x48] sm:$0xff] %vm3705_vm6, %v3628_v16  ;;  %v4141_v16 = vld [vmem:[#allocation3 + $0xf2] sm:$0xff] }
 0x683   : > { %3909 = vst.msk [vmem:[#allocation5 + $0x48] sm:$0xff] %vm3899_vm7, %v3822_v44 }
 0x685   : > { %3476 = vrot.lane.b32.xlu0 %v7506_v6, %s5100_s13  ;;  %3669 = vrot.lane.b32.xlu2 %v4153_v12, %s5102_s16  ;;  %v3963_v6 = vld [vmem:[#allocation3 + $0x1a1] sm:$0xff] }
 0x686   : > { %3283 = vrot.lane.b32.xlu1 %v7504_v2, %s5092_s20  ;;  %v3770_v2 = vld [vmem:[#allocation3 + $0x1a0] sm:$0xff] }
 0x687   : > { %v3662_v26 = vpop.permute.xlu0 %3661  ;;  %v3664_v58 = vpop.permute.xlu2 %3663  ;;  %v4156_v12 = vld [vmem:[#allocation3 + $0x1a2] sm:$0xff] }
 0x688   : > { %v3469_v48 = vpop.permute.xlu1 %3468 }
 0x689   : > { %3539 = vst.msk [vmem:[#allocation5 + $0xd0] sm:$0xff] %vm3512_vm5, %v3469_v48  ;;  %v3756_v48 = vld [vmem:[#allocation3 + $0xf8] sm:$0xff] }
 0x68a   : > { %3732 = vst.msk [vmem:[#allocation5 + $0xd0] sm:$0xff] %vm3705_vm6, %v3662_v26 }
 0x68b   : > { %3926 = vst.msk [vmem:[#allocation5 + $0xd0] sm:$0xff] %vm3899_vm7, %v3856_v57  ;;  %v3947_v57 = vld [vmem:[#allocation3 + $0xe1] sm:$0xff] }
 0x68d   : > { %4022 = vrot.lane.b32.xlu0 %v7571_v59, %s5101_s14  ;;  %4215 = vrot.lane.b32.xlu2 %v4138_v49, %s5103_s17 }
 0x68e   : > { %3829 = vrot.lane.b32.xlu1 %v3752_v23, %s5094_s22 }
 0x68f   : > { %v4208_v38 = vpop.permute.xlu0 %4207  ;;  %v4210_v50 = vpop.permute.xlu2 %4209 }
 0x690   : > { %v4015_v24 = vpop.permute.xlu1 %4014 }
 0x691   : > { %4102 = vst.msk [vmem:[#allocation5 + $0x48] sm:$0xff] %vm4092_vm8, %v4015_v24 }
 0x692   : > { %4295 = vst.msk [vmem:[#allocation5 + $0x48] sm:$0xff] %vm4285_vm9, %v4208_v38 }
 0x695   : > { %4056 = vrot.lane.b32.xlu0 %v3962_v52, %s5101_s14  ;;  %3444 = vrot.lane.b32.xlu2 %v3944_v63, %s5100_s13  ;;  %v3948_v63 = vld [vmem:[#allocation3 + $0xf1] sm:$0xff] }
 0x696   : > { %3863 = vrot.lane.b32.xlu1 %v3769_v46, %s5094_s22 }
 0x697   : > { %v3437_v19 = vpop.permute.xlu0 %3436  ;;  %v3439_v13 = vpop.permute.xlu2 %3438 }
 0x698   : > { %3523 = vst.msk [vmem:[#allocation5 + $0x50] sm:$0xff] %vm3512_vm5, %v3437_v19  ;;  %v4049_v35 = vpop.permute.xlu1 %4048 }
 0x699   : > { %3716 = vst.msk [vmem:[#allocation5 + $0x50] sm:$0xff] %vm3705_vm6, %v3630_v1  ;;  %v4327_v3 = vld [vmem:[#allocation5 + $0x48] sm:$0xff] }
 0x69a   : > { %3524 = vst.msk [vmem:[#allocation5 + $0x58] sm:$0xff] %vm3512_vm5, %v3439_v13  ;;  %4967 = vmatmul.msk.f32.gmra.mxu1 %vm4359_vm10, %v4327_v3 }
 0x69b   : > { %4119 = vst.msk [vmem:[#allocation5 + $0xd0] sm:$0xff] %vm4092_vm8, %v4049_v35 }
 0x69c   : > { %4312 = vst.msk [vmem:[#allocation5 + $0xd0] sm:$0xff] %vm4285_vm9, %v4242_v18 }
 0x69d   : > { %3285 = vrot.lane.b32.xlu0 %v7533_v61, %s5092_s20  ;;  %3478 = vrot.lane.b32.xlu2 %v3961_v8, %s5100_s13  ;;  %v3949_v8 = vld [vmem:[#allocation3 + $0xf9] sm:$0xff] }
 0x69e   : > { %4249 = vrot.lane.b32.xlu1 %v4155_v45, %s5103_s17 }
 0x69f   : > { %v3471_v55 = vpop.permute.xlu0 %3470  ;;  %v3473_v47 = vpop.permute.xlu2 %3472 }
 0x6a0   : > { %v3278_v29 = vpop.permute.xlu1 %3277 }
 0x6a1   : > { %3347 = vst.msk [vmem:[#allocation5 + $0xd8] sm:$0xff] %vm3319_vm4, %v3278_v29 }
 0x6a2   : > { %3540 = vst.msk [vmem:[#allocation5 + $0xd8] sm:$0xff] %vm3512_vm5, %v3471_v55 }
 0x6a3   : > { %v4344_v0 = vld [vmem:[#allocation5 + $0xd0] sm:$0xff]  ;;  %3733 = vst.msk [vmem:[#allocation5 + $0xd8] sm:$0xff] %vm3705_vm6, %v3664_v58 }
 0x6a4   : > { %4984 = vmatmul.msk.f32.gmra.mxu3 %vm4359_vm10, %v4344_v0  ;;  %v4142_v58 = vld [vmem:[#allocation3 + $0xfa] sm:$0xff] }
 0x6a5   : > { %3831 = vrot.lane.b32.xlu0 %v3753_v40, %s5094_s22  ;;  %4024 = vrot.lane.b32.xlu2 %v3946_v36, %s5101_s14 }
 0x6a6   : > { %3637 = vrot.lane.b32.xlu1 %v7543_v51, %s5102_s16 }
 0x6a7   : > { %v4017_v53 = vpop.permute.xlu0 %4016  ;;  %v4019_v21 = vpop.permute.xlu2 %4018 }
 0x6a8   : > { %v3824_v10 = vpop.permute.xlu1 %3823 }
 0x6a9   : > { %3910 = vst.msk [vmem:[#allocation5 + $0x50] sm:$0xff] %vm3899_vm7, %v3824_v10 }
 0x6aa   : > { %4103 = vst.msk [vmem:[#allocation5 + $0x50] sm:$0xff] %vm4092_vm8, %v4017_v53 }
 0x6ab   : > { %4296 = vst.msk [vmem:[#allocation5 + $0x50] sm:$0xff] %vm4285_vm9, %v4210_v50 }
 0x6ad   : > { %3865 = vrot.lane.b32.xlu0 %v3770_v2, %s5094_s22  ;;  %4058 = vrot.lane.b32.xlu2 %v3963_v6, %s5101_s14 }
 0x6ae   : > { %3671 = vrot.lane.b32.xlu1 %v7545_v42, %s5102_s16 }
 0x6af   : > { %v4051_v20 = vpop.permute.xlu0 %4050  ;;  %v4053_v32 = vpop.permute.xlu2 %4052 }
 0x6b0   : > { %v3858_v5 = vpop.permute.xlu1 %3857 }
 0x6b1   : > { %3927 = vst.msk [vmem:[#allocation5 + $0xd8] sm:$0xff] %vm3899_vm7, %v3858_v5 }
 0x6b2   : > { %4120 = vst.msk [vmem:[#allocation5 + $0xd8] sm:$0xff] %vm4092_vm8, %v4051_v20  ;;  %v4328_v9 = vld [vmem:[#allocation5 + $0x50] sm:$0xff] }
 0x6b3   : > { %4968 = vmatmul.msk.f32.gmra.mxu1 %vm4359_vm10, %v4328_v9 }
 0x6b5   : > { %4251 = vrot.lane.b32.xlu0 %v4156_v12, %s5103_s17  ;;  %3639 = vrot.lane.b32.xlu2 %v4138_v49, %s5102_s16 }
 0x6b6   : > { %4217 = vrot.lane.b32.xlu1 %v4139_v31, %s5103_s17 }
 0x6b7   : > { %v3280_v7 = vpop.permute.xlu0 %3279  ;;  %v3282_v14 = vpop.permute.xlu2 %3281 }
 0x6b8   : > { %3348 = vst.msk [vmem:[#allocation5 + $0xe0] sm:$0xff] %vm3319_vm4, %v3280_v7  ;;  %v4244_v37 = vpop.permute.xlu1 %4243 }
 0x6b9   : > { %3541 = vst.msk [vmem:[#allocation5 + $0xe0] sm:$0xff] %vm3512_vm5, %v3473_v47 }
 0x6ba   : > { %3349 = vst.msk [vmem:[#allocation5 + $0xe8] sm:$0xff] %vm3319_vm4, %v3282_v14 }
 0x6bb   : > { %4313 = vst.msk [vmem:[#allocation5 + $0xd8] sm:$0xff] %vm4285_vm9, %v4244_v37 }
 0x6bd   : > { %3833 = vrot.lane.b32.xlu0 %v3754_v54, %s5094_s22  ;;  %4219 = vrot.lane.b32.xlu2 %v4140_v25, %s5103_s17 }
 0x6be   : > { %3446 = vrot.lane.b32.xlu1 %v7571_v59, %s5100_s13 }
 0x6bf   : > { %v3826_v44 = vpop.permute.xlu0 %3825  ;;  %v3828_v33 = vpop.permute.xlu2 %3827 }
 0x6c0   : > { %v3632_v41 = vpop.permute.xlu1 %3631 }
 0x6c1   : > { %3717 = vst.msk [vmem:[#allocation5 + $0x58] sm:$0xff] %vm3705_vm6, %v3632_v41 }
 0x6c2   : > { %v4345_v61 = vld [vmem:[#allocation5 + $0xd8] sm:$0xff]  ;;  %3911 = vst.msk [vmem:[#allocation5 + $0x58] sm:$0xff] %vm3899_vm7, %v3826_v44 }
 0x6c3   : > { %4985 = vmatmul.msk.f32.gmra.mxu3 %vm4359_vm10, %v4345_v61  ;;  %4104 = vst.msk [vmem:[#allocation5 + $0x58] sm:$0xff] %vm4092_vm8, %v4019_v21 }
 0x6c5   : > { %3448 = vrot.lane.b32.xlu0 %v3946_v36, %s5100_s13  ;;  %3835 = vrot.lane.b32.xlu2 %v3755_v27, %s5094_s22 }
 0x6c6   : > { %4026 = vrot.lane.b32.xlu1 %v3947_v57, %s5101_s14 }
 0x6c7   : > { %v3860_v17 = vpop.permute.xlu0 %3859  ;;  %v3862_v51 = vpop.permute.xlu2 %3861 }
 0x6c8   : > { %v3666_v42 = vpop.permute.xlu1 %3665 }
 0x6c9   : > { %3734 = vst.msk [vmem:[#allocation5 + $0xe0] sm:$0xff] %vm3705_vm6, %v3666_v42 }
 0x6ca   : > { %3928 = vst.msk [vmem:[#allocation5 + $0xe0] sm:$0xff] %vm3899_vm7, %v3860_v17 }
 0x6cb   : > { %4121 = vst.msk [vmem:[#allocation5 + $0xe0] sm:$0xff] %vm4092_vm8, %v4053_v32 }
 0x6cd   : > { %4028 = vrot.lane.b32.xlu0 %v3948_v63, %s5101_s14  ;;  %3450 = vrot.lane.b32.xlu2 %v3947_v57, %s5100_s13  ;;  %v7692_v63 = vpop.f32.mrf.mxu1 }
 0x6ce   : > { %3641 = vrot.lane.b32.xlu1 %v4139_v31, %s5102_s16 }
 0x6cf   : > { %v4246_v28 = vpop.permute.xlu0 %4245  ;;  %v4248_v18 = vpop.permute.xlu2 %4247 }
 0x6d0   : > { %4314 = vst.msk [vmem:[#allocation5 + $0xe0] sm:$0xff] %vm4285_vm9, %v4246_v28  ;;  %v4212_v15 = vpop.permute.xlu1 %4211 }
 0x6d1   : > { %4297 = vst.msk [vmem:[#allocation5 + $0x58] sm:$0xff] %vm4285_vm9, %v4212_v15 }
 0x6d5   : > { %3643 = vrot.lane.b32.xlu0 %v4140_v25, %s5102_s16  ;;  %4030 = vrot.lane.b32.xlu2 %v3949_v8, %s5101_s14  ;;  %v7698_v15 = vpop.f32.mrf.mxu1 }
 0x6d6   : > { %4221 = vrot.lane.b32.xlu1 %v4141_v16, %s5103_s17 }
 0x6d7   : > { %v3634_v60 = vpop.permute.xlu0 %3633  ;;  %v4346_v1 = vld [vmem:[#allocation5 + $0xe0] sm:$0xff]  ;;  %v3636_v30 = vpop.permute.xlu2 %3635 }
 0x6d8   : > { %4986 = vmatmul.msk.f32.gmra.mxu3 %vm4359_vm10, %v4346_v1  ;;  %v3441_v43 = vpop.permute.xlu1 %3440  ;;  %v4329_v26 = vld [vmem:[#allocation5 + $0x58] sm:$0xff] }
 0x6d9   : > { %3525 = vst.msk [vmem:[#allocation5 + $0x60] sm:$0xff] %vm3512_vm5, %v3441_v43  ;;  %4969 = vmatmul.msk.f32.gmra.mxu1 %vm4359_vm10, %v4329_v26 }
 0x6da   : > { %3718 = vst.msk [vmem:[#allocation5 + $0x60] sm:$0xff] %vm3705_vm6, %v3634_v60 }
 0x6db   : > { %3912 = vst.msk [vmem:[#allocation5 + $0x60] sm:$0xff] %vm3899_vm7, %v3828_v33 }
 0x6dd   : > { %4223 = vrot.lane.b32.xlu0 %v4142_v58, %s5103_s17  ;;  %v7706_v43 = vpop.f32.mrf.mxu1 }
 0x6de   : > { %3837 = vrot.lane.b32.xlu1 %v3756_v48, %s5094_s22 }
 0x6df   : > { %v3668_v59 = vpop.permute.xlu0 %3667  ;;  %v3670_v49 = vpop.permute.xlu2 %3669 }
 0x6e0   : > { %v3475_v23 = vpop.permute.xlu1 %3474 }
 0x6e1   : > { %3542 = vst.msk [vmem:[#allocation5 + $0xe8] sm:$0xff] %vm3512_vm5, %v3475_v23 }
 0x6e2   : > { %3735 = vst.msk [vmem:[#allocation5 + $0xe8] sm:$0xff] %vm3705_vm6, %v3668_v59 }
 0x6e3   : > { %3929 = vst.msk [vmem:[#allocation5 + $0xe8] sm:$0xff] %vm3899_vm7, %v3862_v51 }
 0x6e5   : > { %v7711_v48 = vpop.f32.mrf.mxu1 }
 0x6e7   : > { %v4214_v38 = vpop.permute.xlu0 %4213  ;;  %v4216_v50 = vpop.permute.xlu2 %4215 }
 0x6e8   : > { %v4021_v24 = vpop.permute.xlu1 %4020 }
 0x6e9   : > { %4105 = vst.msk [vmem:[#allocation5 + $0x60] sm:$0xff] %vm4092_vm8, %v4021_v24 }
 0x6ea   : > { %4298 = vst.msk [vmem:[#allocation5 + $0x60] sm:$0xff] %vm4285_vm9, %v4214_v38 }
 0x6ef   : > { %v3443_v52 = vpop.permute.xlu0 %3442  ;;  %v3445_v46 = vpop.permute.xlu2 %3444 }
 0x6f0   : > { %3526 = vst.msk [vmem:[#allocation5 + $0x68] sm:$0xff] %vm3512_vm5, %v3443_v52  ;;  %v4055_v19 = vpop.permute.xlu1 %4054 }
 0x6f1   : > { %3719 = vst.msk [vmem:[#allocation5 + $0x68] sm:$0xff] %vm3705_vm6, %v3636_v30  ;;  %v4330_v13 = vld [vmem:[#allocation5 + $0x60] sm:$0xff] }
 0x6f2   : > { %3527 = vst.msk [vmem:[#allocation5 + $0x70] sm:$0xff] %vm3512_vm5, %v3445_v46  ;;  %4970 = vmatmul.msk.f32.gmra.mxu1 %vm4359_vm10, %v4330_v13 }
 0x6f3   : > { %4122 = vst.msk [vmem:[#allocation5 + $0xe8] sm:$0xff] %vm4092_vm8, %v4055_v19 }
 0x6f4   : > { %4315 = vst.msk [vmem:[#allocation5 + $0xe8] sm:$0xff] %vm4285_vm9, %v4248_v18  ;;  %v7696_v18 = vpop.f32.mrf.mxu3 }
 0x6f7   : > { %v3477_v35 = vpop.permute.xlu0 %3476  ;;  %v3479_v3 = vpop.permute.xlu2 %3478 }
 0x6f8   : > { %v3284_v45 = vpop.permute.xlu1 %3283 }
 0x6f9   : > { %3350 = vst.msk [vmem:[#allocation5 + $0xf0] sm:$0xff] %vm3319_vm4, %v3284_v45 }
 0x6fa   : > { %3543 = vst.msk [vmem:[#allocation5 + $0xf0] sm:$0xff] %vm3512_vm5, %v3477_v35 }
 0x6fb   : > { %v4347_v55 = vld [vmem:[#allocation5 + $0xe8] sm:$0xff]  ;;  %3736 = vst.msk [vmem:[#allocation5 + $0xf0] sm:$0xff] %vm3705_vm6, %v3670_v49  ;;  %v7715_v49 = vpop.f32.mrf.mxu1 }
 0x6fc   : > { %4987 = vmatmul.msk.f32.gmra.mxu3 %vm4359_vm10, %v4347_v55  ;;  %v7702_v1 = vpop.f32.mrf.mxu3 }
 0x6ff   : > { %v4023_v47 = vpop.permute.xlu0 %4022  ;;  %v4025_v29 = vpop.permute.xlu2 %4024 }
 0x700   : > { %v3830_v0 = vpop.permute.xlu1 %3829 }
 0x701   : > { %3913 = vst.msk [vmem:[#allocation5 + $0x68] sm:$0xff] %vm3899_vm7, %v3830_v0 }
 0x702   : > { %4106 = vst.msk [vmem:[#allocation5 + $0x68] sm:$0xff] %vm4092_vm8, %v4023_v47 }
 0x703   : > { %4299 = vst.msk [vmem:[#allocation5 + $0x68] sm:$0xff] %vm4285_vm9, %v4216_v50  ;;  %v7719_v38 = vpop.f32.mrf.mxu1 }
 0x704   : > { %v7708_v26 = vpop.f32.mrf.mxu3 }
 0x707   : > { %v4057_v40 = vpop.permute.xlu0 %4056  ;;  %v4059_v36 = vpop.permute.xlu2 %4058 }
 0x708   : > { %v3864_v53 = vpop.permute.xlu1 %3863 }
 0x709   : > { %3930 = vst.msk [vmem:[#allocation5 + $0xf0] sm:$0xff] %vm3899_vm7, %v3864_v53  ;;  %v7736_v53 = vld [vmem:[%s7939_s7] ss:$0 sm:$0xff] }
 0x70a   : > { %4123 = vst.msk [vmem:[#allocation5 + $0xf0] sm:$0xff] %vm4092_vm8, %v4057_v40  ;;  %v4331_v21 = vld [vmem:[#allocation5 + $0x68] sm:$0xff] }
 0x70b   : > { %4971 = vmatmul.msk.f32.gmra.mxu1 %vm4359_vm10, %v4331_v21  ;;  %v7723_v24 = vpop.f32.mrf.mxu1 }
 0x70c   : > { %v7713_v59 = vpop.f32.mrf.mxu3 }
 0x70f   : > { %v3286_v10 = vpop.permute.xlu0 %3285  ;;  %v3640_v2 = vpop.permute.xlu2 %3639 }
 0x710   : > { %3351 = vst.msk [vmem:[#allocation5 + $0xf8] sm:$0xff] %vm3319_vm4, %v3286_v10  ;;  %v4250_v6 = vpop.permute.xlu1 %4249 }
 0x711   : > { %3544 = vst.msk [vmem:[#allocation5 + $0xf8] sm:$0xff] %vm3512_vm5, %v3479_v3 }
 0x712   : > { %4316 = vst.msk [vmem:[#allocation5 + $0xf0] sm:$0xff] %vm4285_vm9, %v4250_v6  ;;  %v7742_v6 = vld [vmem:[%s7940_s8] ss:$0 sm:$0xff] }
 0x713   : > { %v7725_v46 = vpop.f32.mrf.mxu1 }
 0x714   : > { %v7717_v23 = vpop.f32.mrf.mxu3 }
 0x717   : > { %v3832_v20 = vpop.permute.xlu0 %3831  ;;  %v4220_v32 = vpop.permute.xlu2 %4219 }
 0x718   : > { %v3638_v5 = vpop.permute.xlu1 %3637 }
 0x719   : > { %v4348_v12 = vld [vmem:[#allocation5 + $0xf0] sm:$0xff]  ;;  %3720 = vst.msk [vmem:[#allocation5 + $0x70] sm:$0xff] %vm3705_vm6, %v3638_v5 }
 0x71a   : > { %4988 = vmatmul.msk.f32.gmra.mxu3 %vm4359_vm10, %v4348_v12  ;;  %3914 = vst.msk [vmem:[#allocation5 + $0x70] sm:$0xff] %vm3899_vm7, %v3832_v20 }
 0x71b   : > { %4107 = vst.msk [vmem:[#allocation5 + $0x70] sm:$0xff] %vm4092_vm8, %v4025_v29  ;;  %v7727_v13 = vpop.f32.mrf.mxu1 }
 0x71c   : > { %v7721_v50 = vpop.f32.mrf.mxu3 }
 0x71f   : > { %v3866_v9 = vpop.permute.xlu0 %3865  ;;  %v3836_v31 = vpop.permute.xlu2 %3835 }
 0x720   : > { %v3672_v7 = vpop.permute.xlu1 %3671 }
 0x721   : > { %3737 = vst.msk [vmem:[#allocation5 + $0xf8] sm:$0xff] %vm3705_vm6, %v3672_v7 }
 0x722   : > { %3931 = vst.msk [vmem:[#allocation5 + $0xf8] sm:$0xff] %vm3899_vm7, %v3866_v9 }
 0x723   : > { %4124 = vst.msk [vmem:[#allocation5 + $0xf8] sm:$0xff] %vm4092_vm8, %v4059_v36  ;;  %v7729_v3 = vpop.f32.mrf.mxu1 }
 0x724   : > { %v4545_v52 = vpop.f32.mrf.mxu3 }
 0x727   : > { %v4252_v14 = vpop.permute.xlu0 %4251  ;;  %v3451_v37 = vpop.permute.xlu2 %3450 }
 0x728   : > { %4317 = vst.msk [vmem:[#allocation5 + $0xf8] sm:$0xff] %vm4285_vm9, %v4252_v14  ;;  %v4218_v54 = vpop.permute.xlu1 %4217 }
 0x729   : > { %3530 = vst.msk [vmem:[#allocation5 + $0x88] sm:$0xff] %vm3512_vm5, %v3451_v37 }
 0x72a   : > { %4300 = vst.msk [vmem:[#allocation5 + $0x70] sm:$0xff] %vm4285_vm9, %v4218_v54 }
 0x72c   : > { %v4548_v19 = vpop.f32.mrf.mxu3 }
 0x72f   : > { %v3834_v25 = vpop.permute.xlu0 %3833  ;;  %v4349_v44 = vld [vmem:[#allocation5 + $0xf8] sm:$0xff]  ;;  %v4031_v60 = vpop.permute.xlu2 %4030 }
 0x730   : > { %4989 = vmatmul.msk.f32.gmra.mxu3 %vm4359_vm10, %v4349_v44  ;;  %v3447_v33 = vpop.permute.xlu1 %3446  ;;  %v7731_v55 = vpop.f32.mrf.mxu1 }
 0x731   : > { %v4332_v41 = vld [vmem:[#allocation5 + $0x70] sm:$0xff]  ;;  %3528 = vst.msk [vmem:[#allocation5 + $0x78] sm:$0xff] %vm3512_vm5, %v3447_v33 }
 0x732   : > { %4972 = vmatmul.msk.f32.gmra.mxu1 %vm4359_vm10, %v4332_v41  ;;  %3721 = vst.msk [vmem:[#allocation5 + $0x78] sm:$0xff] %vm3705_vm6, %v3640_v2 }
 0x733   : > { %3915 = vst.msk [vmem:[#allocation5 + $0x78] sm:$0xff] %vm3899_vm7, %v3834_v25 }
 0x734   : > { %v4551_v35 = vpop.f32.mrf.mxu3 }
 0x735   : > { %v4599_v62 = vmul.f32 %v7736_v53, %v4551_v35 }
 0x737   : > { %v3449_v61 = vpop.permute.xlu0 %3448 }
 0x738   : > { %3529 = vst.msk [vmem:[#allocation5 + $0x80] sm:$0xff] %vm3512_vm5, %v3449_v61  ;;  %v4027_v27 = vpop.permute.xlu1 %4026 }
 0x739   : > { %4108 = vst.msk [vmem:[#allocation5 + $0x78] sm:$0xff] %vm4092_vm8, %v4027_v27 }
 0x73a   : > { %4301 = vst.msk [vmem:[#allocation5 + $0x78] sm:$0xff] %vm4285_vm9, %v4220_v32 }
 0x73f   : > { %v4029_v57 = vpop.permute.xlu0 %4028 }
 0x740   : > { %v3642_v17 = vpop.permute.xlu1 %3641 }
 0x741   : > { %3722 = vst.msk [vmem:[#allocation5 + $0x80] sm:$0xff] %vm3705_vm6, %v3642_v17  ;;  %v4333_v51 = vld [vmem:[#allocation5 + $0x78] sm:$0xff] }
 0x742   : > { %3916 = vst.msk [vmem:[#allocation5 + $0x80] sm:$0xff] %vm3899_vm7, %v3836_v31  ;;  %4973 = vmatmul.msk.f32.gmra.mxu1 %vm4359_vm10, %v4333_v51  ;;  %v8110_v51 = vmax.f32 %v6871_v11, 0.0 }
 0x743   : > { %4109 = vst.msk [vmem:[#allocation5 + $0x80] sm:$0xff] %vm4092_vm8, %v4029_v57 }
 0x746   : > { %v4554_v45 = vpop.f32.mrf.mxu3 }
 0x747   : > { %v3644_v42 = vpop.permute.xlu0 %3643  ;;  %v4600_v25 = vmul.f32 %v7736_v53, %v4554_v45 }
 0x748   : > { %3723 = vst.msk [vmem:[#allocation5 + $0x88] sm:$0xff] %vm3705_vm6, %v3644_v42  ;;  %v4222_v28 = vpop.permute.xlu1 %4221 }
 0x749   : > { %4302 = vst.msk [vmem:[#allocation5 + $0x80] sm:$0xff] %vm4285_vm9, %v4222_v28 }
 0x74f   : > { %v4224_v30 = vpop.permute.xlu0 %4223 }
 0x750   : > { %v3838_v8 = vpop.permute.xlu1 %3837  ;;  %v4334_v16 = vld [vmem:[#allocation5 + $0x80] sm:$0xff] }
 0x751   : > { %3917 = vst.msk [vmem:[#allocation5 + $0x88] sm:$0xff] %vm3899_vm7, %v3838_v8  ;;  %4974 = vmatmul.msk.f32.gmra.mxu1 %vm4359_vm10, %v4334_v16  ;;  %v4598_v16 = vmul.f32 %v7736_v53, %v4548_v19  ;;  %v4597_v19 = vmul.f32 %v7736_v53, %v4545_v52  ;;  %v4596_v52 = vmul.f32 %v7736_v53, %v7721_v50 }
 0x752   : > { %4110 = vst.msk [vmem:[#allocation5 + $0x88] sm:$0xff] %vm4092_vm8, %v4031_v60  ;;  %v4635_v60 = vadd.f32 %v7742_v6, %v4599_v62  ;;  %v4595_v50 = vmul.f32 %v7736_v53, %v7717_v23  ;;  %v8121_v62 = vld [vmem:[#allocation24_spill] sm:$0xff]  ;;  %v4594_v23 = vmul.f32 %v7736_v53, %v7713_v59  ;;  %v4593_v59 = vmul.f32 %v7736_v53, %v7708_v26 }
 0x753   : > { %4303 = vst.msk [vmem:[#allocation5 + $0x88] sm:$0xff] %vm4285_vm9, %v4224_v30  ;;  %v4592_v26 = vmul.f32 %v7736_v53, %v7702_v1  ;;  %v4591_v1 = vmul.f32 %v7736_v53, %v7696_v18 }
 0x755   : > { %v4627_v18 = vadd.f32 %v7742_v6, %v4591_v1 }
 0x756   : > { %v4506_v29 = vpop.f32.mrf.mxu1 }
 0x75a   : > { %v4335_v58 = vld [vmem:[#allocation5 + $0x88] sm:$0xff] }
 0x75b   : > { %4975 = vmatmul.msk.f32.gmra.mxu1 %vm4359_vm10, %v4335_v58  ;;  %v4557_v47 = vpop.f32.mrf.mxu3  ;;  %v8111_v58 = vmax.f32 %v6841_v56, 0.0 }
 0x75c   : > { %v4601_v7 = vmul.f32 %v7736_v53, %v4557_v47 }
 0x75e   : > { %v4637_v44 = vadd.f32 %v7742_v6, %v4601_v7 }
 0x760   : > { %v4669_v17 = vmax.f32 %v4637_v44, 0.0 }
 0x762   : > { %v4701_v35 = vadd.f32 %v4669_v17, %v8111_v58 }
 0x76f   : > { %v4509_v40 = vpop.f32.mrf.mxu1 }
 0x770   : > { %v4585_v11 = vmul.f32 %v7736_v53, %v4509_v40  ;;  %v4584_v40 = vmul.f32 %v7736_v53, %v4506_v29  ;;  %v4583_v29 = vmul.f32 %v7736_v53, %v7731_v55  ;;  %v4582_v55 = vmul.f32 %v7736_v53, %v7729_v3 }
 0x771   : > { %v4581_v3 = vmul.f32 %v7736_v53, %v7727_v13  ;;  %v4580_v13 = vmul.f32 %v7736_v53, %v7725_v46 }
 0x77f   : > { %v4560_v0 = vpop.f32.mrf.mxu3 }
 0x780   : > { %v4602_v32 = vmul.f32 %v7736_v53, %v4560_v0  ;;  %v8112_v0 = vmax.f32 %v6799_v34, 0.0 }
 0x782   : > { %v4638_v14 = vadd.f32 %v7742_v6, %v4602_v32  ;;  %v4621_v32 = vadd.f32 %v7742_v6, %v4585_v11 }
 0x784   : > { %v4670_v33 = vmax.f32 %v4638_v14, 0.0  ;;  %v8117_v14 = vld [vmem:[#allocation27_spill] sm:$0xff]  ;;  %v4653_v44 = vmax.f32 %v4621_v32, 0.0  ;;  %v8131_v32 = vld [vmem:[#allocation25_spill] sm:$0xff] }
 0x786   : > { %v4702_v42 = vadd.f32 %v4670_v33, %v8110_v51  ;;  %v8119_v33 = vld [vmem:[#allocation26_spill] sm:$0xff]  ;;  %v4619_v51 = vadd.f32 %v7742_v6, %v4583_v29 }
 0x788   : > { %v4512_v21 = vpop.f32.mrf.mxu1  ;;  %v4651_v11 = vmax.f32 %v4619_v51, 0.0 }
 0x789   : > { %v4586_v28 = vmul.f32 %v7736_v53, %v4512_v21  ;;  %v4634_v21 = vadd.f32 %v7742_v6, %v4598_v16 }
 0x78b   : > { %v4622_v45 = vadd.f32 %v7742_v6, %v4586_v28  ;;  %v4666_v7 = vmax.f32 %v4634_v21, 0.0  ;;  %v8123_v28 = vld [vmem:[#allocation23_spill] sm:$0xff]  ;;  %v8129_v21 = vld [vmem:[#allocation28_spill] sm:$0xff] }
 0x79d   : > { %v4563_v36 = vpop.f32.mrf.mxu3 }
 0x79e   : > { %v4603_v10 = vmul.f32 %v7736_v53, %v4563_v36 }
 0x7a0   : > { %v4639_v5 = vadd.f32 %v7742_v6, %v4603_v10  ;;  %v4667_v10 = vmax.f32 %v4635_v60, 0.0  ;;  %v8125_v60 = vld [vmem:[#allocation21_spill] sm:$0xff] }
 0x7a2   : > { %v4671_v37 = vmax.f32 %v4639_v5, 0.0  ;;  %v4654_v5 = vmax.f32 %v4622_v45, 0.0  ;;  %v8127_v45 = vld [vmem:[#allocation18_spill] sm:$0xff] }
 0x7a4   : > { %v4703_v41 = vadd.f32 %v4671_v37, %v2674_v22  ;;  %v8118_v37 = vmax.f32 %v8117_v14, 0.0  ;;  %v4616_v14 = vadd.f32 %v7742_v6, %v4580_v13  ;;  %v8149_v13 = vld [vmem:[#allocation9_spill] sm:$0xff] }
 0x7af   : > { %v4515_v9 = vpop.f32.mrf.mxu1 }
 0x7b0   : > { %v4587_v61 = vmul.f32 %v7736_v53, %v4515_v9 }
 0x7b2   : > { %v4623_v39 = vadd.f32 %v7742_v6, %v4587_v61 }
 0x7b3   : > { %v4566_v2 = vpop.f32.mrf.mxu3 }
 0x7b4   : > { %v4604_v20 = vmul.f32 %v7736_v53, %v4566_v2  ;;  %v4655_v47 = vmax.f32 %v4623_v39, 0.0  ;;  %v8113_v2 = vld [vmem:[#allocation31_spill] sm:$0xff]  ;;  %v8124_v39 = vmax.f32 %v8123_v28, 0.0  ;;  %v8141_v28 = vld [vmem:[#allocation22_spill] sm:$0xff] }
 0x7b5   : > { %v8114_v56 = vmax.f32 %v8113_v2, 0.0 }
 0x7b6   : > { %v4640_v12 = vadd.f32 %v7742_v6, %v4604_v20 }
 0x7b8   : > { %v4672_v31 = vmax.f32 %v4640_v12, 0.0  ;;  %v8115_v12 = vld [vmem:[#allocation29_spill] sm:$0xff] }
 0x7b9   : > { %v8116_v34 = vmax.f32 %v8115_v12, 0.0 }
 0x7ba   : > { %v4704_v54 = vadd.f32 %v4672_v31, %v2675_v4  ;;  %v4636_v4 = vadd.f32 %v7742_v6, %v4600_v25  ;;  %v4633_v31 = vadd.f32 %v7742_v6, %v4597_v19  ;;  %v4620_v25 = vadd.f32 %v7742_v6, %v4584_v40 }
 0x7bb   : > { %v4687_v9 = vadd.f32 %v4655_v47, %v8116_v34  ;;  %v8128_v47 = vmax.f32 %v8127_v45, 0.0  ;;  %v4629_v34 = vadd.f32 %v7742_v6, %v4593_v59 }
 0x7bc   : > { %5007 = vmatpush.xpose.msk.msrb.mxu3 %vm399_vm0, %v4704_v54  ;;  %v4668_v30 = vmax.f32 %v4636_v4, 0.0  ;;  %v4699_v54 = vadd.f32 %v4667_v10, %v8118_v37  ;;  %v8122_v4 = vmax.f32 %v8121_v62, 0.0  ;;  %v8130_v10 = vmax.f32 %v8129_v21, 0.0 }
 0x7be   : > { %v4700_v20 = vadd.f32 %v4668_v30, %v8114_v56  ;;  %v4698_v17 = vadd.f32 %v4666_v7, %v8122_v4  ;;  %v8126_v30 = vmax.f32 %v8125_v60, 0.0  ;;  %v4617_v56 = vadd.f32 %v7742_v6, %v4581_v3  ;;  %v8139_v4 = vld [vmem:[#allocation12_spill] sm:$0xff] }
 0x7bf   : > { %v4518_v27 = vpop.f32.mrf.mxu1  ;;  %v4579_v7 = vmul.f32 %v7736_v53, %v7723_v24  ;;  %v4578_v24 = vmul.f32 %v7736_v53, %v7719_v38  ;;  %v4577_v38 = vmul.f32 %v7736_v53, %v7715_v49  ;;  %v4576_v49 = vmul.f32 %v7736_v53, %v7711_v48 }
 0x7c0   : > { %5008 = vmatpush.xpose.msk.msrb.mxu3 %vm399_vm0, %v4703_v41  ;;  %v4588_v57 = vmul.f32 %v7736_v53, %v4518_v27  ;;  %v8120_v41 = vmax.f32 %v8119_v33, 0.0  ;;  %v4632_v27 = vadd.f32 %v7742_v6, %v4596_v52  ;;  %v8133_v52 = vld [vmem:[#allocation20_spill] sm:$0xff]  ;;  %v4649_v37 = vmax.f32 %v4617_v56, 0.0 }
 0x7c1   : > { %v4661_v33 = vmax.f32 %v4629_v34, 0.0  ;;  %v8150_v56 = vmax.f32 %v8149_v13, 0.0  ;;  %v4612_v48 = vadd.f32 %v7742_v6, %v4576_v49 }
 0x7c2   : > { %v4624_v22 = vadd.f32 %v7742_v6, %v4588_v57  ;;  %v4686_v61 = vadd.f32 %v4654_v5, %v8120_v41  ;;  %v4665_v57 = vmax.f32 %v4633_v31, 0.0  ;;  %v4664_v16 = vmax.f32 %v4632_v27, 0.0  ;;  %v8137_v41 = vld [vmem:[#allocation15_spill] sm:$0xff] }
 0x7c3   : > { %v8132_v5 = vmax.f32 %v8131_v32, 0.0  ;;  %v8134_v31 = vmax.f32 %v8133_v52, 0.0  ;;  %v4615_v27 = vadd.f32 %v7742_v6, %v4579_v7 }
 0x7c4   : > { %5009 = vmatpush.xpose.msk.msrb.mxu3 %vm399_vm0, %v4702_v42  ;;  %v4656_v8 = vmax.f32 %v4624_v22, 0.0  ;;  %v4652_v42 = vmax.f32 %v4620_v25, 0.0  ;;  %v4685_v22 = vadd.f32 %v4653_v44, %v8124_v39  ;;  %v4697_v58 = vadd.f32 %v4665_v57, %v8126_v30 }
 0x7c5   : > { %v4696_v2 = vadd.f32 %v4664_v16, %v8130_v10  ;;  %v4683_v12 = vadd.f32 %v4651_v11, %v8132_v5  ;;  %v4628_v44 = vadd.f32 %v7742_v6, %v4592_v26  ;;  %v4648_v57 = vmax.f32 %v4616_v14, 0.0  ;;  %v8143_v16 = vld [vmem:[#allocation19_spill] sm:$0xff]  ;;  %v8145_v11 = vld [vmem:[#allocation14_spill] sm:$0xff]  ;;  %v8151_v5 = vld [vmem:[#allocation16_spill] sm:$0xff] }
 0x7c6   : > { %v4688_v36 = vadd.f32 %v4656_v8, %v8112_v0  ;;  %v4631_v8 = vadd.f32 %v7742_v6, %v4595_v50  ;;  %v4684_v0 = vadd.f32 %v4652_v42, %v8128_v47  ;;  %v8142_v39 = vmax.f32 %v8141_v28, 0.0  ;;  %v8155_v14 = vld [vmem:[#allocation7_spill] sm:$0xff] }
 0x7c7   : > { %v4660_v51 = vmax.f32 %v4628_v44, 0.0  ;;  %v8144_v60 = vmax.f32 %v8143_v16, 0.0  ;;  %v8146_v45 = vmax.f32 %v8145_v11, 0.0  ;;  %v4573_v44 = vmul.f32 %v7736_v53, %v7692_v63 }
 0x7c8   : > { %5010 = vmatpush.xpose.msk.msrb.mxu3 %vm399_vm0, %v4701_v35  ;;  %4990 = vmatpush.xpose.msk.msrb.mxu2 %vm399_vm0, %v4688_v36  ;;  %v4618_v35 = vadd.f32 %v7742_v6, %v4582_v55  ;;  %v4630_v36 = vadd.f32 %v7742_v6, %v4594_v23  ;;  %v4663_v19 = vmax.f32 %v4631_v8, 0.0  ;;  %v4614_v23 = vadd.f32 %v7742_v6, %v4578_v24  ;;  %v4705_v24 = vld [vmem:[%s7932_s0] sm:$0xff] }
 0x7c9   : > { %v4647_v8 = vmax.f32 %v4615_v27, 0.0  ;;  %v4680_v30 = vadd.f32 %v4648_v57, %v8144_v60  ;;  %v4692_v47 = vadd.f32 %v4660_v51, %v8146_v45  ;;  %v4609_v27 = vadd.f32 %v7742_v6, %v4573_v44  ;;  %v8165_v51 = vld [vmem:[#allocation10_spill] sm:$0xff] }
 0x7ca   : > { %v4695_v46 = vadd.f32 %v4663_v19, %v8134_v31  ;;  %v4646_v59 = vmax.f32 %v4614_v23, 0.0 }
 0x7cc   : > { %5011 = vmatpush.xpose.msk.msrb.mxu3 %vm399_vm0, %v4700_v20  ;;  %4991 = vmatpush.xpose.msk.msrb.mxu2 %vm399_vm0, %v4687_v9  ;;  %v4650_v20 = vmax.f32 %v4618_v35, 0.0  ;;  %v4662_v9 = vmax.f32 %v4630_v36, 0.0  ;;  %v8147_v36 = vld [vmem:[#allocation11_spill] sm:$0xff] }
 0x7cd   : > { %v8148_v19 = vmax.f32 %v8147_v36, 0.0 }
 0x7ce   : > { %v4521_v40 = vpop.f32.mrf.mxu1 }
 0x7cf   : > { %v4589_v3 = vmul.f32 %v7736_v53, %v4521_v40  ;;  %v4679_v21 = vadd.f32 %v4647_v8, %v8148_v19  ;;  %v4575_v40 = vmul.f32 %v7736_v53, %v7706_v43  ;;  %v4644_v43 = vmax.f32 %v4612_v48, 0.0 }
 0x7d0   : > { %5012 = vmatpush.xpose.msk.msrb.mxu3 %vm399_vm0, %v4699_v54  ;;  %4992 = vmatpush.xpose.msk.msrb.mxu2 %vm399_vm0, %v4686_v61  ;;  %v8135_v54 = vld [vmem:[#allocation17_spill] sm:$0xff]  ;;  %v8138_v61 = vmax.f32 %v8137_v41, 0.0 }
 0x7d1   : > { %v8136_v29 = vmax.f32 %v8135_v54, 0.0  ;;  %v4625_v10 = vadd.f32 %v7742_v6, %v4589_v3  ;;  %v4611_v7 = vadd.f32 %v7742_v6, %v4575_v40 }
 0x7d2   : > { %v4694_v50 = vadd.f32 %v4662_v9, %v8138_v61  ;;  %v8153_v9 = vld [vmem:[#allocation32_spill] sm:$0xff] }
 0x7d3   : > { %v4682_v25 = vadd.f32 %v4650_v20, %v8136_v29  ;;  %v4657_v34 = vmax.f32 %v4625_v10, 0.0  ;;  %v8154_v52 = vmax.f32 %v8153_v9, 0.0  ;;  %v8157_v29 = vld [vmem:[#allocation30_spill] sm:$0xff]  ;;  %v4643_v41 = vmax.f32 %v4611_v7, 0.0 }
 0x7d4   : > { %5013 = vmatpush.xpose.msk.msrb.mxu3 %vm399_vm0, %v4698_v17  ;;  %4993 = vmatpush.xpose.msk.msrb.mxu2 %vm399_vm0, %v4685_v22  ;;  %v8140_v17 = vmax.f32 %v8139_v4, 0.0  ;;  %v4693_v22 = vadd.f32 %v4661_v33, %v8142_v39  ;;  %v4641_v4 = vmax.f32 %v4609_v27, 0.0 }
 0x7d6   : > { %v4681_v55 = vadd.f32 %v4649_v37, %v8140_v17  ;;  %v8156_v37 = vmax.f32 %v8155_v14, 0.0  ;;  %v8163_v17 = vld [vmem:[#allocation6_spill] sm:$0xff] }
 0x7d8   : > { %5014 = vmatpush.xpose.msk.msrb.mxu3 %vm399_vm0, %v4697_v58  ;;  %4994 = vmatpush.xpose.msk.msrb.mxu2 %vm399_vm0, %v4684_v0  ;;  %v4524_v62 = vpop.f32.mrf.mxu1  ;;  %v4659_v58 = vmax.f32 %v4627_v18, 0.0  ;;  %v4613_v0 = vadd.f32 %v7742_v6, %v4577_v38 }
 0x7d9   : > { %v4590_v42 = vmul.f32 %v7736_v53, %v4524_v62  ;;  %v8161_v62 = vld [vmem:[#allocation13_spill] sm:$0xff] }
 0x7da   : > { %v4691_v20 = vadd.f32 %v4659_v58, %v8150_v56  ;;  %v4645_v32 = vmax.f32 %v4613_v0, 0.0  ;;  %v8162_v63 = vmax.f32 %v8161_v62, 0.0 }
 0x7db   : > { %v4626_v35 = vadd.f32 %v7742_v6, %v4590_v42  ;;  %v8166_v42 = vmax.f32 %v8165_v51, 0.0 }
 0x7dc   : > { %5015 = vmatpush.xpose.msk.msrb.mxu3 %vm399_vm0, %v4696_v2  ;;  %4995 = vmatpush.xpose.msk.msrb.mxu2 %vm399_vm0, %v4683_v12  ;;  %v8152_v12 = vmax.f32 %v8151_v5, 0.0  ;;  %v4677_v54 = vadd.f32 %v4645_v32, %v8156_v37 }
 0x7dd   : > { %v4658_v2 = vmax.f32 %v4626_v35, 0.0  ;;  %v4673_v28 = vadd.f32 %v4641_v4, %v8166_v42 }
 0x7de   : > { %v4678_v26 = vadd.f32 %v4646_v59, %v8152_v12 }
 0x7df   : > { %v4690_v31 = vadd.f32 %v4658_v2, %v8154_v52 }
 0x7e0   : > { %5016 = vmatpush.xpose.msk.msrb.mxu3 %vm399_vm0, %v4695_v46  ;;  %4996 = vmatpush.xpose.msk.msrb.mxu2 %vm399_vm0, %v4682_v25  ;;  %v4574_v46 = vmul.f32 %v7736_v53, %v7698_v15  ;;  %v8158_v25 = vmax.f32 %v8157_v29, 0.0  ;;  %v8159_v15 = vld [vmem:[#allocation8_spill] sm:$0xff]  ;;  %v4675_v53 = vadd.f32 %v4643_v41, %v8162_v63 }
 0x7e1   : > { %v8160_v61 = vmax.f32 %v8159_v15, 0.0 }
 0x7e2   : > { %v4689_v1 = vadd.f32 %v4657_v34, %v8158_v25  ;;  %v4610_v33 = vadd.f32 %v7742_v6, %v4574_v46 }
 0x7e4   : > { %5017 = vmatpush.xpose.msk.msrb.mxu3 %vm399_vm0, %v4694_v50  ;;  %4997 = vmatpush.xpose.msk.msrb.mxu2 %vm399_vm0, %v4681_v55  ;;  %v4676_v50 = vadd.f32 %v4644_v43, %v8160_v61  ;;  %v4642_v57 = vmax.f32 %v4610_v33, 0.0  ;;  %v8164_v55 = vmax.f32 %v8163_v17, 0.0 }
 0x7e6   : > { %v4674_v18 = vadd.f32 %v4642_v57, %v8164_v55 }
 0x7e8   : > { %5018 = vmatpush.xpose.msk.msrb.mxu3 %vm399_vm0, %v4693_v22  ;;  %4998 = vmatpush.xpose.msk.msrb.mxu2 %vm399_vm0, %v4680_v30 }
 0x7ec   : > { %5019 = vmatpush.xpose.msk.msrb.mxu3 %vm399_vm0, %v4692_v47  ;;  %4999 = vmatpush.xpose.msk.msrb.mxu2 %vm399_vm0, %v4679_v21 }
 0x7f0   : > { %5020 = vmatpush.xpose.msk.msrb.mxu3 %vm399_vm0, %v4691_v20  ;;  %5000 = vmatpush.xpose.msk.msrb.mxu2 %vm399_vm0, %v4678_v26 }
 0x7f4   : > { %5021 = vmatpush.xpose.msk.msrb.mxu3 %vm399_vm0, %v4690_v31  ;;  %5001 = vmatpush.xpose.msk.msrb.mxu2 %vm399_vm0, %v4677_v54 }
 0x7f8   : > { %5022 = vmatpush.xpose.msk.msrb.mxu3 %vm399_vm0, %v4689_v1  ;;  %5002 = vmatpush.xpose.msk.msrb.mxu2 %vm399_vm0, %v4676_v50 }
 0x7fb   : > { %5023 = vmatmul.msk.f32.vlgmr.msrb.gmra.mxu3 %vm399_vm0, %v4705_v24 }
 0x7fc   : > { %5003 = vmatpush.xpose.msk.msrb.mxu2 %vm399_vm0, %v4675_v53 }
 0x800   : > { %5004 = vmatpush.xpose.msk.msrb.mxu2 %vm399_vm0, %v4674_v18 }
 0x804   : > { %5005 = vmatpush.xpose.msk.msrb.mxu2 %vm399_vm0, %v4673_v28 }
 0x807   : > { %5006 = vmatmul.msk.f32.vlgmr.msrb.gmra.mxu2 %vm399_vm0, %v4705_v24 }
 0x87e   : > { %v4842_v6 = vpop.f32.mrf.mxu3 }
 0x87f   : > { %4846 = vst [vmem:[%s352_s28 + $0x8] sm:$0xff] %v4842_v6 }
 0x88a   : > { %v4822_v39 = vpop.f32.mrf.mxu2 }
 0x88b   : > { %4845 = vst [vmem:[%s352_s28] sm:$0xff] %v4822_v39 }
 0x88c PF: > { %s19_s30 = sadd.s32 1, %s5087_s30  }
 0x88d   : > { %p16_p4 = scmp.ge.s32.totalorder %s19_s30, 4  }
 0x88f   :  { %18 = sbr.rel (!%p16_p4) target bundleno = 1 (0x1), region = 95 }

</bundles_post_ra>
